<compile_context>
chip_gen: v7x
topology: tpu7x:2x2x1
jax: 0.10.0
libtpu: 0.0.40
codegen_flags: <defaults>
</compile_context>

<pallas_src>
import functools

import jax
import jax.numpy as jnp
from jax import lax
from jax.experimental import pallas as pl
from jax.experimental.pallas import tpu as pltpu

Z_DIM = 32
IMG_C = 3
IMG_S = 16
BN_EPS = 1e-5

_VMEM = pl.BlockSpec(memory_space=pltpu.MemorySpace.VMEM)


# ----------------------------- Pallas kernels ------------------------------

def _gen_l1_kernel(z_ref, w_ref, b_ref, g_ref, bt_ref, p_ref, pt_ref, o_ref):
    """Dense GEMM (== ConvTranspose2d on a 1x1 input) + BatchNorm + ReLU.

    z: (B, Z) bf16, w: (Z, S*C) bf16, columns ordered (oy, ox, co) [co minor].
    b/g/bt: (1, S*C) f32 bias / BN gamma / BN beta, expanded per column.
    p: (S*C, C) column->channel one-hot pooling matrix, pt: (C, S*C).
    """
    y = jnp.dot(z_ref[...], w_ref[...], preferred_element_type=jnp.float32)
    y = y + b_ref[...]
    n_ch = p_ref.shape[1]
    n = y.shape[0] * (y.shape[1] // n_ch)          # B * H * W samples per channel
    p = p_ref[...]
    pt = pt_ref[...]
    # per-channel batch stats via one-hot pooling matmuls (channels are strided
    # across the lane-dense columns, so no in-kernel reshape is needed)
    col_sum = jnp.sum(y, axis=0, keepdims=True)                       # (1, S*C)
    mean_ch = jnp.dot(col_sum, p, preferred_element_type=jnp.float32) / n
    mean_col = jnp.dot(mean_ch, pt, preferred_element_type=jnp.float32)
    cen = y - mean_col
    var_ch = jnp.dot(jnp.sum(cen * cen, axis=0, keepdims=True), p,
                     preferred_element_type=jnp.float32) / n
    var_col = jnp.dot(var_ch, pt, preferred_element_type=jnp.float32)
    ybn = cen * lax.rsqrt(var_col + BN_EPS) * g_ref[...] + bt_ref[...]
    o_ref[...] = jnp.maximum(ybn, 0.0)                                # ReLU


def _gemm_act_kernel(a_ref, w_ref, b_ref, o_ref, *, act, slope):
    """im2col GEMM + bias + activation (no BN).  Rows = (n, oy, ox), cols = Cout."""
    y = jnp.dot(a_ref[...], w_ref[...], preferred_element_type=jnp.float32)
    y = y + b_ref[...]
    if act == "tanh":
        o_ref[...] = jnp.tanh(y)
    else:                                           # (leaky) relu
        o_ref[...] = jnp.where(y >= 0, y, slope * y)


def _gemm_bn_act_kernel(a_ref, w_ref, b_ref, g_ref, bt_ref, o_ref, *, slope):
    """im2col GEMM + bias + BatchNorm (training-mode batch stats, biased var)
    + (Leaky)ReLU.  Columns are channels, so BN reduces over rows."""
    y = jnp.dot(a_ref[...], w_ref[...], preferred_element_type=jnp.float32)
    y = y + b_ref[...]
    mean = jnp.mean(y, axis=0, keepdims=True)
    var = jnp.mean(jnp.square(y - mean), axis=0, keepdims=True)
    y = (y - mean) * lax.rsqrt(var + BN_EPS) * g_ref[...] + bt_ref[...]
    o_ref[...] = jnp.where(y >= 0, y, slope * y)


def _critic_tail_kernel(a_ref, w2_ref, b2_ref, g_ref, bt_ref, w3_ref, b3_ref,
                        gl_ref, cl_ref, *, batch):
    """Critic conv2 GEMM + per-half BatchNorm + LeakyReLU + conv3 (full 4x4xC
    contraction) + both WGAN losses, fused in one kernel.

    Rows of `a`: (sample, oy, ox), the `batch` real samples first, then fake.
    """
    y = jnp.dot(a_ref[...], w2_ref[...], preferred_element_type=jnp.float32)
    y = y + b2_ref[...]
    gamma = g_ref[...]
    beta = bt_ref[...]
    w3 = w3_ref[...]                 # (batch*16, C2): conv3 weight tiled per sample
    rows_half = batch * 16           # 4x4 spatial positions per sample

    def half_score_sum(yh):
        # BatchNorm uses this half's own batch statistics, matching a separate
        # critic(x) / critic(fake) call in the PyTorch reference.
        m = jnp.mean(yh, axis=0, keepdims=True)
        v = jnp.mean(jnp.square(yh - m), axis=0, keepdims=True)
        h = (yh - m) * lax.rsqrt(v + BN_EPS) * gamma + beta
        h = jnp.where(h >= 0, h, 0.2 * h)           # LeakyReLU(0.2)
        # conv3 (k=4, no pad, 4x4 input) is a full contraction per sample:
        # the sum over all rows/cols gives the sum of per-sample scores.
        return jnp.sum(h * w3)

    s_real = half_score_sum(y[:rows_half, :])
    s_fake = half_score_sum(y[rows_half:, :])
    b3 = b3_ref[0, 0]
    mean_real = s_real / batch + b3
    mean_fake = s_fake / batch + b3
    gl_ref[...] = jnp.reshape(-mean_fake, (1, 1))              # generator loss
    cl_ref[...] = jnp.reshape(mean_fake - mean_real, (1, 1))   # critic loss


# --------------------------- Pallas call wrappers ---------------------------

def pallas_gen_l1(z, w, bias, gamma, beta, pool, pool_t):
    b = z.shape[0]
    n = w.shape[1]
    return pl.pallas_call(
        _gen_l1_kernel,
        out_shape=jax.ShapeDtypeStruct((b, n), jnp.float32),
        in_specs=[_VMEM] * 7,
        out_specs=_VMEM,
    )(z, w, bias, gamma, beta, pool, pool_t)


def pallas_gemm_act(a, w, bias, *, act, slope=0.0):
    m = a.shape[0]
    n = w.shape[1]
    return pl.pallas_call(
        functools.partial(_gemm_act_kernel, act=act, slope=slope),
        out_shape=jax.ShapeDtypeStruct((m, n), jnp.float32),
        in_specs=[_VMEM] * 3,
        out_specs=_VMEM,
    )(a, w, bias)


def pallas_gemm_bn_act(a, w, bias, gamma, beta, *, slope):
    m = a.shape[0]
    n = w.shape[1]
    return pl.pallas_call(
        functools.partial(_gemm_bn_act_kernel, slope=slope),
        out_shape=jax.ShapeDtypeStruct((m, n), jnp.float32),
        in_specs=[_VMEM] * 5,
        out_specs=_VMEM,
    )(a, w, bias, gamma, beta)


def pallas_critic_tail(a, w2, b2, gamma, beta, w3_rep, b3, *, batch):
    gl, cl = pl.pallas_call(
        functools.partial(_critic_tail_kernel, batch=batch),
        out_shape=(jax.ShapeDtypeStruct((1, 1), jnp.float32),
                   jax.ShapeDtypeStruct((1, 1), jnp.float32)),
        in_specs=[_VMEM] * 7,
        out_specs=(_VMEM, _VMEM),
    )(a, w2, b2, gamma, beta, w3_rep, b3)
    return gl[0, 0], cl[0, 0]


# ------------------------- conv lowering (JAX glue) -------------------------

def _conv_patches(x_nhwc, k, stride, pad):
    """NHWC im2col: (N,H,W,C) -> (N*OH*OW, k*k*C), column order (kh, kw, c)
    with c minor, rows ordered (n, oy, ox).  Patches cast to bf16 for the MXU."""
    n, h, w, c = x_nhwc.shape
    oh = (h + 2 * pad - k) // stride + 1
    ow = (w + 2 * pad - k) // stride + 1
    xp = jnp.pad(x_nhwc, ((0, 0), (pad, pad), (pad, pad), (0, 0)))
    slabs = [xp[:, i:i + stride * oh:stride, j:j + stride * ow:stride, :]
             for i in range(k) for j in range(k)]
    pats = jnp.stack(slabs, axis=3)                       # (N, OH, OW, k*k, C)
    return pats.reshape(n * oh * ow, k * k * c).astype(jnp.bfloat16), (n, oh, ow)


def _deconv_patches(x_nhwc, k, stride, pad):
    """ConvTranspose2d == stride-1 conv on the zero-inserted (lhs-dilated) input
    padded by k-1-pad; one lax.pad with interior padding does both at once."""
    zero = jnp.zeros((), x_nhwc.dtype)
    e = k - 1 - pad
    cfg = [(0, 0, 0), (e, e, stride - 1), (e, e, stride - 1), (0, 0, 0)]
    return _conv_patches(lax.pad(x_nhwc, zero, cfg), k, stride=1, pad=0)


def _conv_w(w):
    """(Cout, Cin, k, k) PyTorch Conv2d weight -> (k*k*Cin, Cout) bf16."""
    co, ci, k, _ = w.shape
    return jnp.transpose(w, (2, 3, 1, 0)).reshape(k * k * ci, co).astype(jnp.bfloat16)


def _deconv_w(w):
    """(Cin, Cout, k, k) ConvTranspose2d weight -> equivalent stride-1 conv
    weight (spatially flipped, channels swapped), (k*k*Cin, Cout) bf16."""
    w_conv = jnp.transpose(jnp.flip(w, (2, 3)), (1, 0, 2, 3))   # (Cout, Cin, k, k)
    return _conv_w(w_conv)


# ------------------------------ model forward -------------------------------

def generator_forward(p, z):
    # DCGAN-style generator: z (B, Z_DIM) -> NHWC image (B, 16, 16, 3)
    b = z.shape[0]
    c1, c2 = 32, 16

    # layer 1: ConvTranspose2d(Z, 32, 4, s=1, p=0) on 1x1 input == dense GEMM.
    # GEMM columns ordered (oy, ox, co) so the NHWC reshape afterwards is free.
    w1 = jnp.transpose(p["ct1_w"], (0, 2, 3, 1)).reshape(Z_DIM, 16 * c1)
    b1 = jnp.tile(p["ct1_b"], 16).reshape(1, 16 * c1)
    g1 = jnp.tile(p["bn1_g"], 16).reshape(1, 16 * c1)
    t1 = jnp.tile(p["bn1_b"], 16).reshape(1, 16 * c1)
    ch = jnp.arange(16 * c1) % c1
    pool = (ch[:, None] == jnp.arange(c1)[None, :]).astype(jnp.float32)  # (512, 32)
    h = pallas_gen_l1(z.astype(jnp.bfloat16), w1.astype(jnp.bfloat16),
                      b1, g1, t1, pool, pool.T)                          # (B, 512)
    h = h.reshape(b, 4, 4, c1)                                           # NHWC

    # layer 2: ConvTranspose2d(32, 16, 4, s=2, p=1) + BN + ReLU
    pats, _ = _deconv_patches(h, 4, 2, 1)                                # (B*64, 512)
    h = pallas_gemm_bn_act(pats, _deconv_w(p["ct2_w"]),
                           p["ct2_b"].reshape(1, -1),
                           p["bn2_g"].reshape(1, -1),
                           p["bn2_b"].reshape(1, -1), slope=0.0)         # (B*64, 16)
    h = h.reshape(b, 8, 8, c2)

    # layer 3: ConvTranspose2d(16, 3, 4, s=2, p=1) + tanh
    pats, _ = _deconv_patches(h, 4, 2, 1)                                # (B*256, 256)
    img = pallas_gemm_act(pats, _deconv_w(p["ct3_w"]),
                          p["ct3_b"].reshape(1, -1), act="tanh")         # (B*256, 3)
    return img.reshape(b, IMG_S, IMG_S, IMG_C)                           # NHWC


def critic_forward(p, x_nhwc, batch):
    # DCGAN-style critic on concat([real, fake]) (2B, 16, 16, 3), real first.
    # Returns (gen_loss, critic_loss) straight from the fused tail kernel.
    # conv1 (3 -> 16, s=2, p=1) + LeakyReLU(0.2)
    pats, _ = _conv_patches(x_nhwc, 4, 2, 1)                             # (2B*64, 48)
    h = pallas_gemm_act(pats, _conv_w(p["c1_w"]),
                        p["c1_b"].reshape(1, -1), act="leaky", slope=0.2)
    h = h.reshape(2 * batch, 8, 8, 16)

    # conv2 (16 -> 32, s=2, p=1) + per-half BN + LeakyReLU, conv3 (32 -> 1) and
    # the WGAN loss means are all fused into a single kernel.
    pats, _ = _conv_patches(h, 4, 2, 1)                                  # (2B*16, 256)
    w3 = jnp.transpose(p["c3_w"][0], (1, 2, 0)).reshape(16, 32)          # ((oy,ox), ci)
    w3_rep = jnp.tile(w3, (batch, 1))                                    # (B*16, 32)
    return pallas_critic_tail(pats, _conv_w(p["c2_w"]),
                              p["c2_b"].reshape(1, -1),
                              p["bn2_g"].reshape(1, -1),
                              p["bn2_b"].reshape(1, -1),
                              w3_rep, p["c3_b"].reshape(1, 1),
                              batch=batch)


def wgan_forward(params, x, noise_key):
    b = x.shape[0]
    noise = jax.random.normal(noise_key, (b, Z_DIM), jnp.float32)        # torch.randn
    fake_nhwc = generator_forward(params["gen"], noise)                  # (B,16,16,3)
    fake = jnp.transpose(fake_nhwc, (0, 3, 1, 2))                        # NCHW output
    x_nhwc = jnp.transpose(x, (0, 2, 3, 1))
    # One batched critic pass over [real; fake]; BatchNorm stats are computed
    # per half inside the kernel so this matches two separate critic calls.
    # critic(fake) and critic(fake.detach()) are forward-identical -> computed once.
    both = jnp.concatenate([x_nhwc, fake_nhwc], axis=0)
    gen_loss, critic_loss = critic_forward(params["critic"], both, b)
    return fake, gen_loss, critic_loss


# ------------------------------ parameter init ------------------------------

def init_params(key):
    # Conv / ConvTranspose / BatchNorm weights ~ N(0, 0.02) (matches initialize()).
    # Biases -> 0 (PyTorch default bias init is random and untouched by
    # initialize(); zeros keep this script deterministic).
    ks = jax.random.split(key, 9)
    w = lambda k, s: 0.02 * jax.random.normal(k, s, jnp.float32)
    gen = {
        "ct1_w": w(ks[0], (Z_DIM, 32, 4, 4)), "ct1_b": jnp.zeros((32,), jnp.float32),
        "bn1_g": w(ks[1], (32,)),             "bn1_b": jnp.zeros((32,), jnp.float32),
        "ct2_w": w(ks[2], (32, 16, 4, 4)),    "ct2_b": jnp.zeros((16,), jnp.float32),
        "bn2_g": w(ks[3], (16,)),             "bn2_b": jnp.zeros((16,), jnp.float32),
        "ct3_w": w(ks[4], (16, IMG_C, 4, 4)), "ct3_b": jnp.zeros((IMG_C,), jnp.float32),
    }
    critic = {
        "c1_w": w(ks[5], (16, IMG_C, 4, 4)), "c1_b": jnp.zeros((16,), jnp.float32),
        "c2_w": w(ks[6], (32, 16, 4, 4)),    "c2_b": jnp.zeros((32,), jnp.float32),
        "bn2_g": w(ks[7], (32,)),            "bn2_b": jnp.zeros((32,), jnp.float32),
        "c3_w": w(ks[8], (1, 32, 4, 4)),     "c3_b": jnp.zeros((1,), jnp.float32),
    }
    return {"gen": gen, "critic": critic}


# ----------------------------------- main ------------------------------------

if __name__ == "__main__":
    key = jax.random.PRNGKey(0)
    k_param, k_data, k_noise = jax.random.split(key, 3)

    params = init_params(k_param)
    x = jax.random.normal(k_data, (2, IMG_C, IMG_S, IMG_S), jnp.float32)  # NCHW

    fwd = jax.jit(wgan_forward)
    fake, gen_loss, critic_loss = fwd(params, x, k_noise)
    jax.block_until_ready((fake, gen_loss, critic_loss))

    assert fake.shape == (2, IMG_C, IMG_S, IMG_S)
    assert gen_loss.shape == () and critic_loss.shape == ()
    assert bool(jnp.isfinite(gen_loss)) and bool(jnp.isfinite(critic_loss))
    print("KERNEL_OK")
</pallas_src>

<mosaic_0001>
module attributes {stable_mosaic.version = 11 : i64} {
  func.func @_gen_l1_kernel(%arg0: memref<2x32xbf16, #tpu.memory_space<vmem>>, %arg1: memref<32x512xbf16, #tpu.memory_space<vmem>>, %arg2: memref<1x512xf32, #tpu.memory_space<vmem>>, %arg3: memref<1x512xf32, #tpu.memory_space<vmem>>, %arg4: memref<1x512xf32, #tpu.memory_space<vmem>>, %arg5: memref<512x32xf32, #tpu.memory_space<vmem>>, %arg6: memref<32x512xf32, #tpu.memory_space<vmem>>, %arg7: memref<2x512xf32, #tpu.memory_space<vmem>>) attributes {dimension_semantics = [], scalar_prefetch = 0 : i64, scratch_operands = 0 : i64, tpu.core_type = #tpu.core_type<tc>} {
    %c0 = arith.constant 0 : index
    %c0_0 = arith.constant 0 : index
    %0 = vector.load %arg0[%c0, %c0_0] : memref<2x32xbf16, #tpu.memory_space<vmem>>, vector<2x32xbf16>
    %c0_1 = arith.constant 0 : index
    %c0_2 = arith.constant 0 : index
    %1 = vector.load %arg1[%c0_1, %c0_2] : memref<32x512xbf16, #tpu.memory_space<vmem>>, vector<32x512xbf16>
    %cst = arith.constant dense<0.000000e+00> : vector<2x512xf32>
    %2 = tpu.matmul %0, %1, %cst {dimension_numbers = #tpu.dot_dimension_numbers<[1], [0], [0], [1], [0, 0, 1, 1], [], []>} : vector<2x32xbf16>, vector<32x512xbf16>, vector<2x512xf32> -> vector<2x512xf32>
    %c0_3 = arith.constant 0 : index
    %c0_4 = arith.constant 0 : index
    %3 = vector.load %arg2[%c0_3, %c0_4] : memref<1x512xf32, #tpu.memory_space<vmem>>, vector<1x512xf32>
    %4 = vector.broadcast %3 : vector<1x512xf32> to vector<2x512xf32>
    %5 = arith.addf %2, %4 : vector<2x512xf32>
    %c0_5 = arith.constant 0 : index
    %c0_6 = arith.constant 0 : index
    %6 = vector.load %arg5[%c0_5, %c0_6] : memref<512x32xf32, #tpu.memory_space<vmem>>, vector<512x32xf32>
    %c0_7 = arith.constant 0 : index
    %c0_8 = arith.constant 0 : index
    %7 = vector.load %arg6[%c0_7, %c0_8] : memref<32x512xf32, #tpu.memory_space<vmem>>, vector<32x512xf32>
    %cst_9 = arith.constant dense<0.000000e+00> : vector<512xf32>
    %8 = vector.multi_reduction <add>, %5, %cst_9 [0] : vector<2x512xf32> to vector<512xf32>
    %9 = vector.shape_cast %8 : vector<512xf32> to vector<1x512xf32>
    %cst_10 = arith.constant dense<0.000000e+00> : vector<1x32xf32>
    %10 = tpu.matmul %9, %6, %cst_10 {dimension_numbers = #tpu.dot_dimension_numbers<[1], [0], [0], [1], [0, 0, 1, 1], [], []>} : vector<1x512xf32>, vector<512x32xf32>, vector<1x32xf32> -> vector<1x32xf32>
    %cst_11 = arith.constant 3.200000e+01 : f32
    %11 = vector.broadcast %cst_11 : f32 to vector<1x32xf32>
    %12 = arith.divf %10, %11 : vector<1x32xf32>
    %cst_12 = arith.constant dense<0.000000e+00> : vector<1x512xf32>
    %13 = tpu.matmul %12, %7, %cst_12 {dimension_numbers = #tpu.dot_dimension_numbers<[1], [0], [0], [1], [0, 0, 1, 1], [], []>} : vector<1x32xf32>, vector<32x512xf32>, vector<1x512xf32> -> vector<1x512xf32>
    %14 = vector.broadcast %13 : vector<1x512xf32> to vector<2x512xf32>
    %15 = arith.subf %5, %14 : vector<2x512xf32>
    %16 = arith.mulf %15, %15 : vector<2x512xf32>
    %cst_13 = arith.constant dense<0.000000e+00> : vector<512xf32>
    %17 = vector.multi_reduction <add>, %16, %cst_13 [0] : vector<2x512xf32> to vector<512xf32>
    %18 = vector.shape_cast %17 : vector<512xf32> to vector<1x512xf32>
    %cst_14 = arith.constant dense<0.000000e+00> : vector<1x32xf32>
    %19 = tpu.matmul %18, %6, %cst_14 {dimension_numbers = #tpu.dot_dimension_numbers<[1], [0], [0], [1], [0, 0, 1, 1], [], []>} : vector<1x512xf32>, vector<512x32xf32>, vector<1x32xf32> -> vector<1x32xf32>
    %cst_15 = arith.constant 3.200000e+01 : f32
    %20 = vector.broadcast %cst_15 : f32 to vector<1x32xf32>
    %21 = arith.divf %19, %20 : vector<1x32xf32>
    %cst_16 = arith.constant dense<0.000000e+00> : vector<1x512xf32>
    %22 = tpu.matmul %21, %7, %cst_16 {dimension_numbers = #tpu.dot_dimension_numbers<[1], [0], [0], [1], [0, 0, 1, 1], [], []>} : vector<1x32xf32>, vector<32x512xf32>, vector<1x512xf32> -> vector<1x512xf32>
    %cst_17 = arith.constant 9.99999974E-6 : f32
    %23 = vector.broadcast %cst_17 : f32 to vector<1x512xf32>
    %24 = arith.addf %22, %23 : vector<1x512xf32>
    %25 = math.rsqrt %24 : vector<1x512xf32>
    %26 = vector.broadcast %25 : vector<1x512xf32> to vector<2x512xf32>
    %27 = arith.mulf %15, %26 : vector<2x512xf32>
    %c0_18 = arith.constant 0 : index
    %c0_19 = arith.constant 0 : index
    %28 = vector.load %arg3[%c0_18, %c0_19] : memref<1x512xf32, #tpu.memory_space<vmem>>, vector<1x512xf32>
    %29 = vector.broadcast %28 : vector<1x512xf32> to vector<2x512xf32>
    %30 = arith.mulf %27, %29 : vector<2x512xf32>
    %c0_20 = arith.constant 0 : index
    %c0_21 = arith.constant 0 : index
    %31 = vector.load %arg4[%c0_20, %c0_21] : memref<1x512xf32, #tpu.memory_space<vmem>>, vector<1x512xf32>
    %32 = vector.broadcast %31 : vector<1x512xf32> to vector<2x512xf32>
    %33 = arith.addf %30, %32 : vector<2x512xf32>
    %cst_22 = arith.constant 0.000000e+00 : f32
    %34 = vector.broadcast %cst_22 : f32 to vector<2x512xf32>
    %35 = arith.maximumf %33, %34 : vector<2x512xf32>
    %c0_23 = arith.constant 0 : index
    %c0_24 = arith.constant 0 : index
    %36 = vector.load %arg7[%c0_23, %c0_24] : memref<2x512xf32, #tpu.memory_space<vmem>>, vector<2x512xf32>
    tpu.vector_store %arg7[%c0_23, %c0_24], %35 {strides = array<i32>} : memref<2x512xf32, #tpu.memory_space<vmem>>, vector<2x512xf32>,
    return
  }
}

module attributes {stable_mosaic.version = 11 : i64} {
  func.func @_gemm_bn_act_kernel(%arg0: memref<128x512xbf16, #tpu.memory_space<vmem>>, %arg1: memref<512x16xbf16, #tpu.memory_space<vmem>>, %arg2: memref<1x16xf32, #tpu.memory_space<vmem>>, %arg3: memref<1x16xf32, #tpu.memory_space<vmem>>, %arg4: memref<1x16xf32, #tpu.memory_space<vmem>>, %arg5: memref<128x16xf32, #tpu.memory_space<vmem>>) attributes {dimension_semantics = [], scalar_prefetch = 0 : i64, scratch_operands = 0 : i64, tpu.core_type = #tpu.core_type<tc>} {
    %c0 = arith.constant 0 : index
    %c0_0 = arith.constant 0 : index
    %0 = vector.load %arg0[%c0, %c0_0] : memref<128x512xbf16, #tpu.memory_space<vmem>>, vector<128x512xbf16>
    %c0_1 = arith.constant 0 : index
    %c0_2 = arith.constant 0 : index
    %1 = vector.load %arg1[%c0_1, %c0_2] : memref<512x16xbf16, #tpu.memory_space<vmem>>, vector<512x16xbf16>
    %cst = arith.constant dense<0.000000e+00> : vector<128x16xf32>
    %2 = tpu.matmul %0, %1, %cst {dimension_numbers = #tpu.dot_dimension_numbers<[1], [0], [0], [1], [0, 0, 1, 1], [], []>} : vector<128x512xbf16>, vector<512x16xbf16>, vector<128x16xf32> -> vector<128x16xf32>
    %c0_3 = arith.constant 0 : index
    %c0_4 = arith.constant 0 : index
    %3 = vector.load %arg2[%c0_3, %c0_4] : memref<1x16xf32, #tpu.memory_space<vmem>>, vector<1x16xf32>
    %4 = vector.broadcast %3 : vector<1x16xf32> to vector<128x16xf32>
    %5 = arith.addf %2, %4 : vector<128x16xf32>
    %cst_5 = arith.constant dense<0.000000e+00> : vector<16xf32>
    %6 = vector.multi_reduction <add>, %5, %cst_5 [0] : vector<128x16xf32> to vector<16xf32>
    %7 = vector.shape_cast %6 : vector<16xf32> to vector<1x16xf32>
    %cst_6 = arith.constant 1.280000e+02 : f32
    %8 = vector.broadcast %cst_6 : f32 to vector<1x16xf32>
    %9 = arith.divf %7, %8 : vector<1x16xf32>
    %10 = vector.broadcast %9 : vector<1x16xf32> to vector<128x16xf32>
    %11 = arith.subf %5, %10 : vector<128x16xf32>
    %12 = arith.mulf %11, %11 : vector<128x16xf32>
    %cst_7 = arith.constant dense<0.000000e+00> : vector<16xf32>
    %13 = vector.multi_reduction <add>, %12, %cst_7 [0] : vector<128x16xf32> to vector<16xf32>
    %14 = vector.shape_cast %13 : vector<16xf32> to vector<1x16xf32>
    %cst_8 = arith.constant 1.280000e+02 : f32
    %15 = vector.broadcast %cst_8 : f32 to vector<1x16xf32>
    %16 = arith.divf %14, %15 : vector<1x16xf32>
    %17 = vector.broadcast %9 : vector<1x16xf32> to vector<128x16xf32>
    %18 = arith.subf %5, %17 : vector<128x16xf32>
    %cst_9 = arith.constant 9.99999974E-6 : f32
    %19 = vector.broadcast %cst_9 : f32 to vector<1x16xf32>
    %20 = arith.addf %16, %19 : vector<1x16xf32>
    %21 = math.rsqrt %20 : vector<1x16xf32>
    %22 = vector.broadcast %21 : vector<1x16xf32> to vector<128x16xf32>
    %23 = arith.mulf %18, %22 : vector<128x16xf32>
    %c0_10 = arith.constant 0 : index
    %c0_11 = arith.constant 0 : index
    %24 = vector.load %arg3[%c0_10, %c0_11] : memref<1x16xf32, #tpu.memory_space<vmem>>, vector<1x16xf32>
    %25 = vector.broadcast %24 : vector<1x16xf32> to vector<128x16xf32>
    %26 = arith.mulf %23, %25 : vector<128x16xf32>
    %c0_12 = arith.constant 0 : index
    %c0_13 = arith.constant 0 : index
    %27 = vector.load %arg4[%c0_12, %c0_13] : memref<1x16xf32, #tpu.memory_space<vmem>>, vector<1x16xf32>
    %28 = vector.broadcast %27 : vector<1x16xf32> to vector<128x16xf32>
    %29 = arith.addf %26, %28 : vector<128x16xf32>
    %cst_14 = arith.constant 0.000000e+00 : f32
    %30 = vector.broadcast %cst_14 : f32 to vector<128x16xf32>
    %31 = arith.cmpf oge, %29, %30 : vector<128x16xf32>
    %cst_15 = arith.constant 0.000000e+00 : f32
    %32 = vector.broadcast %cst_15 : f32 to vector<128x16xf32>
    %33 = arith.mulf %32, %29 : vector<128x16xf32>
    %34 = arith.select %31, %29, %33 : vector<128x16xi1>, vector<128x16xf32>
    %c0_16 = arith.constant 0 : index
    %c0_17 = arith.constant 0 : index
    %35 = vector.load %arg5[%c0_16, %c0_17] : memref<128x16xf32, #tpu.memory_space<vmem>>, vector<128x16xf32>
    tpu.vector_store %arg5[%c0_16, %c0_17], %34 {strides = array<i32>} : memref<128x16xf32, #tpu.memory_space<vmem>>, vector<128x16xf32>,
    return
  }
}

module attributes {stable_mosaic.version = 11 : i64} {
  func.func @_gemm_act_kernel(%arg0: memref<512x256xbf16, #tpu.memory_space<vmem>>, %arg1: memref<256x3xbf16, #tpu.memory_space<vmem>>, %arg2: memref<1x3xf32, #tpu.memory_space<vmem>>, %arg3: memref<512x3xf32, #tpu.memory_space<vmem>>) attributes {dimension_semantics = [], scalar_prefetch = 0 : i64, scratch_operands = 0 : i64, tpu.core_type = #tpu.core_type<tc>} {
    %c0 = arith.constant 0 : index
    %c0_0 = arith.constant 0 : index
    %0 = vector.load %arg0[%c0, %c0_0] : memref<512x256xbf16, #tpu.memory_space<vmem>>, vector<512x256xbf16>
    %c0_1 = arith.constant 0 : index
    %c0_2 = arith.constant 0 : index
    %1 = vector.load %arg1[%c0_1, %c0_2] : memref<256x3xbf16, #tpu.memory_space<vmem>>, vector<256x3xbf16>
    %cst = arith.constant dense<0.000000e+00> : vector<512x3xf32>
    %2 = tpu.matmul %0, %1, %cst {dimension_numbers = #tpu.dot_dimension_numbers<[1], [0], [0], [1], [0, 0, 1, 1], [], []>} : vector<512x256xbf16>, vector<256x3xbf16>, vector<512x3xf32> -> vector<512x3xf32>
    %c0_3 = arith.constant 0 : index
    %c0_4 = arith.constant 0 : index
    %3 = vector.load %arg2[%c0_3, %c0_4] : memref<1x3xf32, #tpu.memory_space<vmem>>, vector<1x3xf32>
    %4 = vector.broadcast %3 : vector<1x3xf32> to vector<512x3xf32>
    %5 = arith.addf %2, %4 : vector<512x3xf32>
    %6 = math.tanh %5 : vector<512x3xf32>
    %c0_5 = arith.constant 0 : index
    %c0_6 = arith.constant 0 : index
    %7 = vector.load %arg3[%c0_5, %c0_6] : memref<512x3xf32, #tpu.memory_space<vmem>>, vector<512x3xf32>
    tpu.vector_store %arg3[%c0_5, %c0_6], %6 {strides = array<i32>} : memref<512x3xf32, #tpu.memory_space<vmem>>, vector<512x3xf32>,
    return
  }
}

module attributes {stable_mosaic.version = 11 : i64} {
  func.func @_gemm_act_kernel(%arg0: memref<256x48xbf16, #tpu.memory_space<vmem>>, %arg1: memref<48x16xbf16, #tpu.memory_space<vmem>>, %arg2: memref<1x16xf32, #tpu.memory_space<vmem>>, %arg3: memref<256x16xf32, #tpu.memory_space<vmem>>) attributes {dimension_semantics = [], scalar_prefetch = 0 : i64, scratch_operands = 0 : i64, tpu.core_type = #tpu.core_type<tc>} {
    %c0 = arith.constant 0 : index
    %c0_0 = arith.constant 0 : index
    %0 = vector.load %arg0[%c0, %c0_0] : memref<256x48xbf16, #tpu.memory_space<vmem>>, vector<256x48xbf16>
    %c0_1 = arith.constant 0 : index
    %c0_2 = arith.constant 0 : index
    %1 = vector.load %arg1[%c0_1, %c0_2] : memref<48x16xbf16, #tpu.memory_space<vmem>>, vector<48x16xbf16>
    %cst = arith.constant dense<0.000000e+00> : vector<256x16xf32>
    %2 = tpu.matmul %0, %1, %cst {dimension_numbers = #tpu.dot_dimension_numbers<[1], [0], [0], [1], [0, 0, 1, 1], [], []>} : vector<256x48xbf16>, vector<48x16xbf16>, vector<256x16xf32> -> vector<256x16xf32>
    %c0_3 = arith.constant 0 : index
    %c0_4 = arith.constant 0 : index
    %3 = vector.load %arg2[%c0_3, %c0_4] : memref<1x16xf32, #tpu.memory_space<vmem>>, vector<1x16xf32>
    %4 = vector.broadcast %3 : vector<1x16xf32> to vector<256x16xf32>
    %5 = arith.addf %2, %4 : vector<256x16xf32>
    %cst_5 = arith.constant 0.000000e+00 : f32
    %6 = vector.broadcast %cst_5 : f32 to vector<256x16xf32>
    %7 = arith.cmpf oge, %5, %6 : vector<256x16xf32>
    %cst_6 = arith.constant 2.000000e-01 : f32
    %8 = vector.broadcast %cst_6 : f32 to vector<256x16xf32>
    %9 = arith.mulf %8, %5 : vector<256x16xf32>
    %10 = arith.select %7, %5, %9 : vector<256x16xi1>, vector<256x16xf32>
    %c0_7 = arith.constant 0 : index
    %c0_8 = arith.constant 0 : index
    %11 = vector.load %arg3[%c0_7, %c0_8] : memref<256x16xf32, #tpu.memory_space<vmem>>, vector<256x16xf32>
    tpu.vector_store %arg3[%c0_7, %c0_8], %10 {strides = array<i32>} : memref<256x16xf32, #tpu.memory_space<vmem>>, vector<256x16xf32>,
    return
  }
}

module attributes {stable_mosaic.version = 11 : i64} {
  func.func @_critic_tail_kernel(%arg0: memref<64x256xbf16, #tpu.memory_space<vmem>>, %arg1: memref<256x32xbf16, #tpu.memory_space<vmem>>, %arg2: memref<1x32xf32, #tpu.memory_space<vmem>>, %arg3: memref<1x32xf32, #tpu.memory_space<vmem>>, %arg4: memref<1x32xf32, #tpu.memory_space<vmem>>, %arg5: memref<32x32xf32, #tpu.memory_space<vmem>>, %arg6: memref<1x1xf32, #tpu.memory_space<vmem>>, %arg7: memref<1x1xf32, #tpu.memory_space<vmem>>, %arg8: memref<1x1xf32, #tpu.memory_space<vmem>>) attributes {dimension_semantics = [], scalar_prefetch = 0 : i64, scratch_operands = 0 : i64, tpu.core_type = #tpu.core_type<tc>} {
    %c0 = arith.constant 0 : index
    %c0_0 = arith.constant 0 : index
    %0 = vector.load %arg0[%c0, %c0_0] : memref<64x256xbf16, #tpu.memory_space<vmem>>, vector<64x256xbf16>
    %c0_1 = arith.constant 0 : index
    %c0_2 = arith.constant 0 : index
    %1 = vector.load %arg1[%c0_1, %c0_2] : memref<256x32xbf16, #tpu.memory_space<vmem>>, vector<256x32xbf16>
    %cst = arith.constant dense<0.000000e+00> : vector<64x32xf32>
    %2 = tpu.matmul %0, %1, %cst {dimension_numbers = #tpu.dot_dimension_numbers<[1], [0], [0], [1], [0, 0, 1, 1], [], []>} : vector<64x256xbf16>, vector<256x32xbf16>, vector<64x32xf32> -> vector<64x32xf32>
    %c0_3 = arith.constant 0 : index
    %c0_4 = arith.constant 0 : index
    %3 = vector.load %arg2[%c0_3, %c0_4] : memref<1x32xf32, #tpu.memory_space<vmem>>, vector<1x32xf32>
    %4 = vector.broadcast %3 : vector<1x32xf32> to vector<64x32xf32>
    %5 = arith.addf %2, %4 : vector<64x32xf32>
    %c0_5 = arith.constant 0 : index
    %c0_6 = arith.constant 0 : index
    %6 = vector.load %arg3[%c0_5, %c0_6] : memref<1x32xf32, #tpu.memory_space<vmem>>, vector<1x32xf32>
    %c0_7 = arith.constant 0 : index
    %c0_8 = arith.constant 0 : index
    %7 = vector.load %arg4[%c0_7, %c0_8] : memref<1x32xf32, #tpu.memory_space<vmem>>, vector<1x32xf32>
    %c0_9 = arith.constant 0 : index
    %c0_10 = arith.constant 0 : index
    %8 = vector.load %arg5[%c0_9, %c0_10] : memref<32x32xf32, #tpu.memory_space<vmem>>, vector<32x32xf32>
    %9 = vector.extract_strided_slice %5 {offsets = [0, 0], sizes = [32, 32], strides = [1, 1]} : vector<64x32xf32> to vector<32x32xf32>
    %cst_11 = arith.constant dense<0.000000e+00> : vector<32xf32>
    %10 = vector.multi_reduction <add>, %9, %cst_11 [0] : vector<32x32xf32> to vector<32xf32>
    %11 = vector.shape_cast %10 : vector<32xf32> to vector<1x32xf32>
    %cst_12 = arith.constant 3.200000e+01 : f32
    %12 = vector.broadcast %cst_12 : f32 to vector<1x32xf32>
    %13 = arith.divf %11, %12 : vector<1x32xf32>
    %14 = vector.broadcast %13 : vector<1x32xf32> to vector<32x32xf32>
    %15 = arith.subf %9, %14 : vector<32x32xf32>
    %16 = arith.mulf %15, %15 : vector<32x32xf32>
    %cst_13 = arith.constant dense<0.000000e+00> : vector<32xf32>
    %17 = vector.multi_reduction <add>, %16, %cst_13 [0] : vector<32x32xf32> to vector<32xf32>
    %18 = vector.shape_cast %17 : vector<32xf32> to vector<1x32xf32>
    %cst_14 = arith.constant 3.200000e+01 : f32
    %19 = vector.broadcast %cst_14 : f32 to vector<1x32xf32>
    %20 = arith.divf %18, %19 : vector<1x32xf32>
    %21 = vector.broadcast %13 : vector<1x32xf32> to vector<32x32xf32>
    %22 = arith.subf %9, %21 : vector<32x32xf32>
    %cst_15 = arith.constant 9.99999974E-6 : f32
    %23 = vector.broadcast %cst_15 : f32 to vector<1x32xf32>
    %24 = arith.addf %20, %23 : vector<1x32xf32>
    %25 = math.rsqrt %24 : vector<1x32xf32>
    %26 = vector.broadcast %25 : vector<1x32xf32> to vector<32x32xf32>
    %27 = arith.mulf %22, %26 : vector<32x32xf32>
    %28 = vector.broadcast %6 : vector<1x32xf32> to vector<32x32xf32>
    %29 = arith.mulf %27, %28 : vector<32x32xf32>
    %30 = vector.broadcast %7 : vector<1x32xf32> to vector<32x32xf32>
    %31 = arith.addf %29, %30 : vector<32x32xf32>
    %cst_16 = arith.constant 0.000000e+00 : f32
    %32 = vector.broadcast %cst_16 : f32 to vector<32x32xf32>
    %33 = arith.cmpf oge, %31, %32 : vector<32x32xf32>
    %cst_17 = arith.constant 2.000000e-01 : f32
    %34 = vector.broadcast %cst_17 : f32 to vector<32x32xf32>
    %35 = arith.mulf %34, %31 : vector<32x32xf32>
    %36 = arith.select %33, %31, %35 : vector<32x32xi1>, vector<32x32xf32>
    %37 = arith.mulf %36, %8 : vector<32x32xf32>
    %38 = vector.shape_cast %37 : vector<32x32xf32> to vector<1x32x32xf32>
    %cst_18 = arith.constant dense<0.000000e+00> : vector<1xf32>
    %39 = vector.multi_reduction <add>, %38, %cst_18 [1, 2] : vector<1x32x32xf32> to vector<1xf32>
    %40 = vector.shape_cast %39 : vector<1xf32> to vector<1x1x1xf32>
    %41 = vector.extract %40[0, 0, 0] : f32 from vector<1x1x1xf32>
    %42 = vector.extract_strided_slice %5 {offsets = [32, 0], sizes = [32, 32], strides = [1, 1]} : vector<64x32xf32> to vector<32x32xf32>
    %cst_19 = arith.constant dense<0.000000e+00> : vector<32xf32>
    %43 = vector.multi_reduction <add>, %42, %cst_19 [0] : vector<32x32xf32> to vector<32xf32>
    %44 = vector.shape_cast %43 : vector<32xf32> to vector<1x32xf32>
    %cst_20 = arith.constant 3.200000e+01 : f32
    %45 = vector.broadcast %cst_20 : f32 to vector<1x32xf32>
    %46 = arith.divf %44, %45 : vector<1x32xf32>
    %47 = vector.broadcast %46 : vector<1x32xf32> to vector<32x32xf32>
    %48 = arith.subf %42, %47 : vector<32x32xf32>
    %49 = arith.mulf %48, %48 : vector<32x32xf32>
    %cst_21 = arith.constant dense<0.000000e+00> : vector<32xf32>
    %50 = vector.multi_reduction <add>, %49, %cst_21 [0] : vector<32x32xf32> to vector<32xf32>
    %51 = vector.shape_cast %50 : vector<32xf32> to vector<1x32xf32>
    %cst_22 = arith.constant 3.200000e+01 : f32
    %52 = vector.broadcast %cst_22 : f32 to vector<1x32xf32>
    %53 = arith.divf %51, %52 : vector<1x32xf32>
    %54 = vector.broadcast %46 : vector<1x32xf32> to vector<32x32xf32>
    %55 = arith.subf %42, %54 : vector<32x32xf32>
    %cst_23 = arith.constant 9.99999974E-6 : f32
    %56 = vector.broadcast %cst_23 : f32 to vector<1x32xf32>
    %57 = arith.addf %53, %56 : vector<1x32xf32>
    %58 = math.rsqrt %57 : vector<1x32xf32>
    %59 = vector.broadcast %58 : vector<1x32xf32> to vector<32x32xf32>
    %60 = arith.mulf %55, %59 : vector<32x32xf32>
    %61 = vector.broadcast %6 : vector<1x32xf32> to vector<32x32xf32>
    %62 = arith.mulf %60, %61 : vector<32x32xf32>
    %63 = vector.broadcast %7 : vector<1x32xf32> to vector<32x32xf32>
    %64 = arith.addf %62, %63 : vector<32x32xf32>
    %cst_24 = arith.constant 0.000000e+00 : f32
    %65 = vector.broadcast %cst_24 : f32 to vector<32x32xf32>
    %66 = arith.cmpf oge, %64, %65 : vector<32x32xf32>
    %cst_25 = arith.constant 2.000000e-01 : f32
    %67 = vector.broadcast %cst_25 : f32 to vector<32x32xf32>
    %68 = arith.mulf %67, %64 : vector<32x32xf32>
    %69 = arith.select %66, %64, %68 : vector<32x32xi1>, vector<32x32xf32>
    %70 = arith.mulf %69, %8 : vector<32x32xf32>
    %71 = vector.shape_cast %70 : vector<32x32xf32> to vector<1x32x32xf32>
    %cst_26 = arith.constant dense<0.000000e+00> : vector<1xf32>
    %72 = vector.multi_reduction <add>, %71, %cst_26 [1, 2] : vector<1x32x32xf32> to vector<1xf32>
    %73 = vector.shape_cast %72 : vector<1xf32> to vector<1x1x1xf32>
    %74 = vector.extract %73[0, 0, 0] : f32 from vector<1x1x1xf32>
    %c0_27 = arith.constant 0 : index
    %c0_28 = arith.constant 0 : index
    %75 = vector.load %arg6[%c0_27, %c0_28] : memref<1x1xf32, #tpu.memory_space<vmem>>, vector<1x1xf32>
    %76 = vector.extract %75[0, 0] : f32 from vector<1x1xf32>
    %cst_29 = arith.constant 2.000000e+00 : f32
    %77 = arith.divf %41, %cst_29 : f32
    %78 = arith.addf %77, %76 : f32
    %cst_30 = arith.constant 2.000000e+00 : f32
    %79 = arith.divf %74, %cst_30 : f32
    %80 = arith.addf %79, %76 : f32
    %cst_31 = arith.constant 0.000000e+00 : f32
    %81 = arith.subf %cst_31, %80 : f32
    %82 = vector.broadcast %81 : f32 to vector<1x1xf32>
    %c0_32 = arith.constant 0 : index
    %c0_33 = arith.constant 0 : index
    %83 = vector.load %arg7[%c0_32, %c0_33] : memref<1x1xf32, #tpu.memory_space<vmem>>, vector<1x1xf32>
    tpu.vector_store %arg7[%c0_32, %c0_33], %82 {strides = array<i32>} : memref<1x1xf32, #tpu.memory_space<vmem>>, vector<1x1xf32>,
    %84 = arith.subf %80, %78 : f32
    %85 = vector.broadcast %84 : f32 to vector<1x1xf32>
    %c0_34 = arith.constant 0 : index
    %c0_35 = arith.constant 0 : index
    %86 = vector.load %arg8[%c0_34, %c0_35] : memref<1x1xf32, #tpu.memory_space<vmem>>, vector<1x1xf32>
    tpu.vector_store %arg8[%c0_34, %c0_35], %85 {strides = array<i32>} : memref<1x1xf32, #tpu.memory_space<vmem>>, vector<1x1xf32>,
    return
  }
}

</mosaic_0001>

<bundles_post_ra>
// kernel: tile.22
= control target key start
LH: loop header
LB: loop body
LE: loop exit
PB: predicated region body
PF: predicated region fallthrough
CT: control target
= control target key end

     0   :  { %2 = vsyncpa [#allocation1], 0  ;;  %s47_s6 = smov [#allocation0]   ;;  %s76_s0 = inlined_call_operand.hbm [shape: f32[32], index: 0, kind: input, shape index: {}]   ;;  %s77_s1 = inlined_call_operand.vmem [shape: f32[16,32], index: 1, kind: output, shape index: {}]  }
   0x1   :  { %s9_s7 = sshll.u32 %s47_s6, 4  ;;  %s23_s10 = scalar_lea.hbm %s76_s0, 16  ;;  %s10_s7 = int_to_ptr.vmem [resolvable:$true] %s9_s7 }
   0x2   :  { %p24_p0 = scmp.ne.s32.totalorder %s76_s0, %s23_s10  ;;  %p27_p1 = scmp.lt.u32.totalorder %s23_s10, %s76_s0 }
   0x4   :  { %p29_p2 = pnand %p27_p1, %p24_p0 }
   0x6   :  { %32 = shalt.err (!%p29_p2)
}
   0x7   :  { %s33_s15 = scalar_lea.vmem %s10_s7, 16  ;;  %s37_s16 = scalar_lea.vmem %s10_s7, 32 }
   0x8   :  { %p34_p3 = scmp.ne.s32.totalorder %s10_s7, %s33_s15  ;;  %p38_p4 = scmp.lt.s32.totalorder %s10_s7, %s10_s7 }
   0x9   :  { %p39_p5 = scmp.lt.s32.totalorder %s37_s16, %s33_s15 }
   0xb   :  { %p40_p6 = por %p39_p5, %p38_p4 }
   0xd   :  { %p41_p7 = pnand %p40_p6, %p34_p3 }
   0xf   :  { %44 = shalt.err (!%p41_p7)
}
  0x10   :  { %12 = dma.hbm_to_vmem [thread:$0]  %s76_s0, 16, %s10_s7, [#allocation1]  }
  0x11   :  { %45 = dma.done.wait [#allocation1], 16  }
  0x12   :  { %46 = vsyncadd [#allocation1], 4294967280  ;;  %v16_v0 = vld [vmem:[#allocation0] ss:$0 sm:$0xff] }
  0x13   :  { %17 = vst [vmem:[%s77_s1] sm:$0xff] %v16_v0  ;;  %21 = vst [vmem:[%s77_s1 + $0x8] sm:$0xff] %v16_v0 }
  0x14   :  { %20 = vsyncpa [#allocation1], 1 }

// kernel: tile.23
= control target key start
LH: loop header
LB: loop body
LE: loop exit
PB: predicated region body
PF: predicated region fallthrough
CT: control target
= control target key end

     0   :  { %s57_s8 = smov 96   ;;  %vm3_vm0 = vcmask 261120   ;;  %s59_s15 = smov 64   ;;  %vm9_vm1 = vcmask 1048320   ;;  %vm15_vm2 = vcmask 785920   ;;  %vm21_vm3 = vcmask 523520   ;;  %s94_s0 = inlined_call_operand.vmem [shape: f32[16,32], index: 0, kind: input, shape index: {}]   ;;  %s95_s1 = inlined_call_operand.vmem [shape: f32[1,512], index: 1, kind: output, shape index: {}]  }
   0x1   :  { %v48_v0 = vld [vmem:[%s94_s0 + $0x3] ss:$4 sm:$0xf]   ;;  %v49_v1 = vld [vmem:[%s94_s0 + $0x2] ss:$4 sm:$0xf]  }
   0x2   :  { %7 = vrot.lane.b32.xlu0 %v48_v0, %s57_s8  ;;  %v50_v2 = vld [vmem:[%s94_s0 + $0x1] ss:$4 sm:$0xf]   ;;  %v2_v3 = vld [vmem:[%s94_s0] ss:$4 sm:$0xf]  }
   0x3   :  { %s58_s0 = smov 32   ;;  %4 = vst.msk [vmem:[#allocation0] ss:$8 sm:$0xf] %vm3_vm0, %v2_v3  }
   0x4   :  { %19 = vrot.lane.b32.xlu1 %v50_v2, %s58_s0 }
   0x6   :  { %13 = vrot.lane.b32.xlu0 %v49_v1, %s59_s15 }
  0x74   :  { %v8_v4 = vpop.permute.xlu0 %7  }
  0x75   :  { %10 = vst.msk [vmem:[#allocation0] ss:$8 sm:$0xf] %vm9_vm1, %v8_v4  }
  0x76   :  { %v20_v5 = vpop.permute.xlu1 %19  }
  0x78   :  { %v14_v6 = vpop.permute.xlu0 %13  }
  0x79   :  { %16 = vst.msk [vmem:[#allocation0] ss:$8 sm:$0xf] %vm15_vm2, %v14_v6  }
  0x7a   :  { %22 = vst.msk [vmem:[#allocation0] ss:$8 sm:$0xf] %vm21_vm3, %v20_v5  }
  0x81   :  { %v26_v7 = vld [vmem:[#allocation0] sm:$0x1]  ;;  %v30_v8 = vld [vmem:[#allocation0 + $0x8] sm:$0x1]  ;;  %v35_v9 = vld [vmem:[#allocation0 + $0x10] sm:$0x1] }
  0x82   :  { %28 = vst [vmem:[%s95_s1] sm:$0x1] %v26_v7  ;;  %51 = vst [vmem:[%s95_s1 + $0x1] sm:$0x1] %v30_v8  ;;  %v41_v10 = vld [vmem:[#allocation0 + $0x18] sm:$0x1] }
  0x83   :  { %52 = vst [vmem:[%s95_s1 + $0x2] sm:$0x1] %v35_v9  ;;  %53 = vst [vmem:[%s95_s1 + $0x3] sm:$0x1] %v41_v10 }

// kernel: wgan_forward.5
= control target key start
LH: loop header
LB: loop body
LE: loop exit
PB: predicated region body
PF: predicated region fallthrough
CT: control target
= control target key end

     0   :  { %v1362_v1 = vmov 0   ;;  %vm98_vm0 = vcmask 261120   ;;  %vm264_vm1 = vcmask 1041408   ;;  %s1933_s1 = inlined_call_operand.vmem [shape: bf16[32,512], index: 1, kind: input, shape index: {}]   ;;  %s1934_s5 = inlined_call_operand.vmem [shape: f32[512,32], index: 5, kind: input, shape index: {}]   ;;  %s1935_s0 = inlined_call_operand.vmem [shape: bf16[2,32], index: 0, kind: input, shape index: {}]   ;;  %s1936_s2 = inlined_call_operand.vmem [shape: f32[1,512], index: 2, kind: input, shape index: {}]   ;;  %s1937_s6 = inlined_call_operand.vmem [shape: f32[32,512], index: 6, kind: input, shape index: {}]   ;;  %s1938_s3 = inlined_call_operand.vmem [shape: f32[1,512], index: 3, kind: input, shape index: {}]   ;;  %s1939_s4 = inlined_call_operand.vmem [shape: f32[1,512], index: 4, kind: input, shape index: {}]   ;;  %s1940_s7 = inlined_call_operand.vmem [shape: f32[2,512], index: 7, kind: output, shape index: {}]  }
   0x1   :  { %v1342_v0 = vld [vmem:[%s1933_s1 + $0x4] ss:$16 sps:$4 sm:$0xff]   ;;  %134 = vmatprep.mubr.bf16.mxu0 %v1362_v1  ;;  %175 = vmatprep.mubr.bf16.mxu1 %v1362_v1  ;;  %v1344_v2 = vld [vmem:[%s1933_s1 + $0xc] ss:$16 sps:$4 sm:$0xff]   ;;  %v1346_v3 = vld [vmem:[%s1933_s1] ss:$16 sps:$4 sm:$0xff]  }
   0x2   :  { %102 = vmatprep.subr.bf16.mxu0 %v1342_v0  ;;  %v1347_v4 = vld [vmem:[%s1933_s1 + $0x8] ss:$16 sps:$4 sm:$0xff]   ;;  %143 = vmatprep.subr.bf16.mxu1 %v1344_v2  ;;  %v1348_v5 = vld [vmem:[%s1933_s1 + $0x24] ss:$16 sps:$4 sm:$0xff]   ;;  %v1350_v6 = vld [vmem:[%s1933_s1 + $0x2c] ss:$16 sps:$4 sm:$0xff]  }
   0x3   :  { %103 = vmatpush1.bf16.msra.mxu0 %v1346_v3  ;;  %144 = vmatpush1.bf16.msra.mxu1 %v1347_v4  ;;  %v1352_v7 = vld [vmem:[%s1933_s1 + $0x20] ss:$16 sps:$4 sm:$0xff]   ;;  %v1353_v8 = vld [vmem:[%s1933_s1 + $0x28] ss:$16 sps:$4 sm:$0xff]  }
   0x4   :  { %104 = vmatprep.subr.bf16.mxu0 %v1348_v5  ;;  %v200_v9 = vld [vmem:[%s1934_s5 + $0x80] sm:$0xff]  ;;  %145 = vmatprep.subr.bf16.mxu1 %v1350_v6  ;;  %v201_v11 = vld [vmem:[%s1934_s5 + $0x88] sm:$0xff]  ;;  %v202_v21 = vld [vmem:[%s1934_s5 + $0x90] sm:$0xff] }
   0x5   :  { %v27_v10 = vld [vmem:[%s1935_s0] sm:$0x1]  ;;  %v233_v13 = vld [vmem:[%s1934_s5 + $0x188] sm:$0xff]  ;;  %v1444_v14 = vpack.c.bf16 %v201_v11, %v200_v9  ;;  %v203_v22 = vld [vmem:[%s1934_s5 + $0x98] sm:$0xff] }
   0x6   :  { %v232_v12 = vld [vmem:[%s1934_s5 + $0x180] sm:$0xff]  ;;  %v185_v17 = vld [vmem:[%s1934_s5 + $0x8] sm:$0xff]  ;;  %v1472_v24 = vpack.c.bf16 %v203_v22, %v202_v21  ;;  %v234_v25 = vld [vmem:[%s1934_s5 + $0x190] sm:$0xff] }
   0x7   :  { %v1446_v15 = vpack.c.bf16 %v233_v13, %v232_v12  ;;  %v184_v16 = vld [vmem:[%s1934_s5] sm:$0xff]  ;;  %105 = vmatpush1.bf16.msra.mxu0 %v1352_v7  ;;  %146 = vmatpush1.bf16.msra.mxu1 %v1353_v8  ;;  %v217_v20 = vld [vmem:[%s1934_s5 + $0x108] sm:$0xff]  ;;  %v235_v26 = vld [vmem:[%s1934_s5 + $0x198] sm:$0xff] }
   0x8   :  { %v216_v18 = vld [vmem:[%s1934_s5 + $0x100] sm:$0xff]  ;;  %v1457_v19 = vpack.c.bf16 %v185_v17, %v184_v16  ;;  %1180 = vmatprep.subr.bf16.mxu0 %v1444_v14  ;;  %v186_v27 = vld [vmem:[%s1934_s5 + $0x10] sm:$0xff]  ;;  %v1483_v28 = vpack.c.bf16 %v235_v26, %v234_v25  ;;  %v187_v29 = vld [vmem:[%s1934_s5 + $0x18] sm:$0xff] }
   0x9   :  { %1212 = vmatprep.subr.bf16.mxu1 %v1446_v15  ;;  %v1470_v23 = vpack.c.bf16 %v217_v20, %v216_v18  ;;  %v218_v30 = vld [vmem:[%s1934_s5 + $0x110] sm:$0xff]  ;;  %v219_v31 = vld [vmem:[%s1934_s5 + $0x118] sm:$0xff]  ;;  %v204_v32 = vld [vmem:[%s1934_s5 + $0xa0] sm:$0xff]  ;;  %v1507_v35 = vpack.c.bf16 %v187_v29, %v186_v27 }
   0xa   :  { %1033 = vmatmul.mubr.msk.bf16.vlgmr.msra.gmra.mrb[0].mxu0 %vm98_vm0, %v27_v10  ;;  %1034 = vmatmul.mubr.msk.bf16.vlgmr.msra.gmra.mrb[0].mxu1 %vm98_vm0, %v27_v10  ;;  %v205_v33 = vld [vmem:[%s1934_s5 + $0xa8] sm:$0xff]  ;;  %v236_v34 = vld [vmem:[%s1934_s5 + $0x1a0] sm:$0xff]  ;;  %v1509_v36 = vpack.c.bf16 %v219_v31, %v218_v30  ;;  %v206_v44 = vld [vmem:[%s1934_s5 + $0xb0] sm:$0xff] }
   0xb   :  { %1182 = vmatpush3.bf16.msra.mxu0 %v1457_v19  ;;  %1214 = vmatpush3.bf16.msra.mxu1 %v1470_v23  ;;  %v237_v37 = vld [vmem:[%s1934_s5 + $0x1a8] sm:$0xff]  ;;  %v188_v38 = vld [vmem:[%s1934_s5 + $0x20] sm:$0xff]  ;;  %v1522_v40 = vpack.c.bf16 %v205_v33, %v204_v32  ;;  %v207_v45 = vld [vmem:[%s1934_s5 + $0xb8] sm:$0xff] }
   0xc   :  { %v189_v39 = vld [vmem:[%s1934_s5 + $0x28] sm:$0xff]  ;;  %1184 = vmatprep.subr.bf16.mxu0 %v1472_v24  ;;  %1216 = vmatprep.subr.bf16.mxu1 %v1483_v28  ;;  %v1524_v41 = vpack.c.bf16 %v237_v37, %v236_v34  ;;  %v220_v42 = vld [vmem:[%s1934_s5 + $0x120] sm:$0xff]  ;;  %v238_v46 = vld [vmem:[%s1934_s5 + $0x1b0] sm:$0xff]  ;;  %v1555_v51 = vpack.c.bf16 %v207_v45, %v206_v44 }
   0xd   :  { %v221_v43 = vld [vmem:[%s1934_s5 + $0x128] sm:$0xff]  ;;  %v239_v47 = vld [vmem:[%s1934_s5 + $0x1b8] sm:$0xff]  ;;  %v1546_v48 = vpack.c.bf16 %v189_v39, %v188_v38  ;;  %v190_v50 = vld [vmem:[%s1934_s5 + $0x30] sm:$0xff] }
   0xe   :  { %v1548_v49 = vpack.c.bf16 %v221_v43, %v220_v42  ;;  %v1557_v52 = vpack.c.bf16 %v239_v47, %v238_v46  ;;  %v191_v53 = vld [vmem:[%s1934_s5 + $0x38] sm:$0xff]  ;;  %v222_v54 = vld [vmem:[%s1934_s5 + $0x130] sm:$0xff]  ;;  %v208_v58 = vld [vmem:[%s1934_s5 + $0xc0] sm:$0xff] }
   0xf   :  { %1186 = vmatpush3.bf16.msra.mxu0 %v1507_v35  ;;  %1218 = vmatpush3.bf16.msra.mxu1 %v1509_v36  ;;  %v223_v55 = vld [vmem:[%s1934_s5 + $0x138] sm:$0xff]  ;;  %v1570_v56 = vpack.c.bf16 %v191_v53, %v190_v50  ;;  %v209_v59 = vld [vmem:[%s1934_s5 + $0xc8] sm:$0xff]  ;;  %v240_v60 = vld [vmem:[%s1934_s5 + $0x1c0] sm:$0xff] }
  0x10   :  { %1188 = vmatprep.subr.bf16.mxu0 %v1522_v40  ;;  %1220 = vmatprep.subr.bf16.mxu1 %v1524_v41  ;;  %v1572_v57 = vpack.c.bf16 %v223_v55, %v222_v54  ;;  %v1587_v61 = vpack.c.bf16 %v209_v59, %v208_v58  ;;  %v241_v62 = vld [vmem:[%s1934_s5 + $0x1c8] sm:$0xff]  ;;  %v192_v63 = vld [vmem:[%s1934_s5 + $0x40] sm:$0xff]  ;;  %v210_v6 = vld [vmem:[%s1934_s5 + $0xd0] sm:$0xff]  ;;  %v38_v58 = vlaneseq }
  0x11   :  { %v193_v0 = vld [vmem:[%s1934_s5 + $0x48] sm:$0xff]  ;;  %v1598_v1 = vpack.c.bf16 %v241_v62, %v240_v60  ;;  %v224_v3 = vld [vmem:[%s1934_s5 + $0x140] sm:$0xff]  ;;  %v211_v7 = vld [vmem:[%s1934_s5 + $0xd8] sm:$0xff] }
  0x12   :  { %v1600_v2 = vpack.c.bf16 %v193_v0, %v192_v63  ;;  %v225_v4 = vld [vmem:[%s1934_s5 + $0x148] sm:$0xff]  ;;  %v242_v8 = vld [vmem:[%s1934_s5 + $0x1d0] sm:$0xff]  ;;  %v1623_v9 = vpack.c.bf16 %v211_v7, %v210_v6  ;;  %v243_v10 = vld [vmem:[%s1934_s5 + $0x1d8] sm:$0xff]  ;;  %v1722_v59 = vshrl.u32 %v38_v58, 7 }
  0x13   :  { %1190 = vmatpush3.bf16.msra.mxu0 %v1546_v48  ;;  %1222 = vmatpush3.bf16.msra.mxu1 %v1548_v49  ;;  %v1609_v5 = vpack.c.bf16 %v225_v4, %v224_v3  ;;  %v194_v11 = vld [vmem:[%s1934_s5 + $0x50] sm:$0xff]  ;;  %v195_v12 = vld [vmem:[%s1934_s5 + $0x58] sm:$0xff]  ;;  %v1634_v13 = vpack.c.bf16 %v243_v10, %v242_v8  ;;  %v212_v21 = vld [vmem:[%s1934_s5 + $0xe0] sm:$0xff] }
  0x14   :  { %1192 = vmatprep.subr.bf16.mxu0 %v1555_v51  ;;  %1224 = vmatprep.subr.bf16.mxu1 %v1557_v52  ;;  %v1636_v16 = vpack.c.bf16 %v195_v12, %v194_v11  ;;  %v226_v17 = vld [vmem:[%s1934_s5 + $0x150] sm:$0xff]  ;;  %v227_v18 = vld [vmem:[%s1934_s5 + $0x158] sm:$0xff]  ;;  %v213_v22 = vld [vmem:[%s1934_s5 + $0xe8] sm:$0xff]  ;;  %1949 = vst [vmem:[#allocation2_spill] sm:$0xff] %v1722_v59  ;;  %v1725_v60 = vsub.s32 0, %v1722_v59  ;;  %v1728_v62 = vsub.s32 2, %v1722_v59 }
  0x15   :  { %v1645_v20 = vpack.c.bf16 %v227_v18, %v226_v17  ;;  %v244_v25 = vld [vmem:[%s1934_s5 + $0x1e0] sm:$0xff]  ;;  %v1659_v26 = vpack.c.bf16 %v213_v22, %v212_v21  ;;  %v245_v27 = vld [vmem:[%s1934_s5 + $0x1e8] sm:$0xff]  ;;  %v214_v38 = vld [vmem:[%s1934_s5 + $0xf0] sm:$0xff]  ;;  %v1734_v0 = vsub.s32 1, %v1722_v59  ;;  %v1737_v3 = vsub.s32 3, %v1722_v59 }
  0x16   :  { %v196_v29 = vld [vmem:[%s1934_s5 + $0x60] sm:$0xff]  ;;  %v197_v30 = vld [vmem:[%s1934_s5 + $0x68] sm:$0xff]  ;;  %v1670_v31 = vpack.c.bf16 %v245_v27, %v244_v25  ;;  %v215_v39 = vld [vmem:[%s1934_s5 + $0xf8] sm:$0xff]  ;;  %1950 = vst [vmem:[#allocation3_spill] sm:$0xff] %v1728_v62 }
  0x17   :  { %1194 = vmatpush3.bf16.msra.mxu0 %v1570_v56  ;;  %1226 = vmatpush3.bf16.msra.mxu1 %v1572_v57  ;;  %v1672_v32 = vpack.c.bf16 %v197_v30, %v196_v29  ;;  %v228_v33 = vld [vmem:[%s1934_s5 + $0x160] sm:$0xff]  ;;  %v229_v34 = vld [vmem:[%s1934_s5 + $0x168] sm:$0xff]  ;;  %v246_v42 = vld [vmem:[%s1934_s5 + $0x1f0] sm:$0xff]  ;;  %v1695_v43 = vpack.c.bf16 %v215_v39, %v214_v38  ;;  %1951 = vst [vmem:[#allocation4_spill] sm:$0xff] %v1734_v0 }
  0x18   :  { %1196 = vmatprep.subr.bf16.mxu0 %v1587_v61  ;;  %1228 = vmatprep.subr.bf16.mxu1 %v1598_v1  ;;  %v1681_v37 = vpack.c.bf16 %v229_v34, %v228_v33  ;;  %v247_v44 = vld [vmem:[%s1934_s5 + $0x1f8] sm:$0xff]  ;;  %v198_v45 = vld [vmem:[%s1934_s5 + $0x70] sm:$0xff]  ;;  %v36_v63 = vld [vmem:[%s1936_s2] sm:$0xf]  ;;  %1952 = vst [vmem:[#allocation5_spill] sm:$0xff] %v1737_v3 }
  0x19   :  { %v199_v46 = vld [vmem:[%s1934_s5 + $0x78] sm:$0xff]  ;;  %v1706_v47 = vpack.c.bf16 %v247_v44, %v246_v42  ;;  %v230_v53 = vld [vmem:[%s1934_s5 + $0x170] sm:$0xff]  ;;  %v41_v4 = vrot.slane %v36_v63, %v1725_v60  ;;  %v49_v6 = vrot.slane %v36_v63, %v1728_v62  ;;  %v45_v7 = vrot.slane %v36_v63, %v1734_v0 }
  0x1a   :  { %v1708_v50 = vpack.c.bf16 %v199_v46, %v198_v45  ;;  %v231_v54 = vld [vmem:[%s1934_s5 + $0x178] sm:$0xff]  ;;  %v53_v8 = vrot.slane %v36_v63, %v1737_v3 }
  0x1b   :  { %1198 = vmatpush3.bf16.msra.mxu0 %v1600_v2  ;;  %1230 = vmatpush3.bf16.msra.mxu1 %v1609_v5  ;;  %v1719_v55 = vpack.c.bf16 %v231_v54, %v230_v53 }
  0x1c   :  { %1200 = vmatprep.subr.bf16.mxu0 %v1623_v9  ;;  %1232 = vmatprep.subr.bf16.mxu1 %v1634_v13 }
  0x1f   :  { %1202 = vmatpush3.bf16.msra.mxu0 %v1636_v16  ;;  %1234 = vmatpush3.bf16.msra.mxu1 %v1645_v20 }
  0x20   :  { %1204 = vmatprep.subr.bf16.mxu0 %v1659_v26  ;;  %1236 = vmatprep.subr.bf16.mxu1 %v1670_v31 }
  0x23   :  { %1206 = vmatpush3.bf16.msra.mxu0 %v1672_v32  ;;  %1238 = vmatpush3.bf16.msra.mxu1 %v1681_v37 }
  0x24   :  { %1208 = vmatprep.subr.bf16.mxu0 %v1695_v43  ;;  %1240 = vmatprep.subr.bf16.mxu1 %v1706_v47 }
  0x27   :  { %1210 = vmatpush3.bf16.msra.mxu0 %v1708_v50  ;;  %1242 = vmatpush3.bf16.msra.mxu1 %v1719_v55 }
  0xdd   :  { %v136_v10 = vpop.f32.mrb[0].mxu0  ;;  %v177_v11 = vpop.f32.mrb[0].mxu1 }
  0xde   :  { %v1743_v12 = vadd.f32 %v136_v10, %v41_v4  ;;  %v1745_v17 = vadd.f32 %v177_v11, %v49_v6  ;;  %v138_v18 = vpop.f32.mrb[1].mxu0  ;;  %v179_v21 = vpop.f32.mrb[1].mxu1 }
  0xdf   :  { %v1747_v22 = vadd.f32 %v138_v18, %v45_v7  ;;  %v1749_v25 = vadd.f32 %v179_v21, %v53_v8  ;;  %v140_v27 = vpop.f32.mrb[2].mxu0  ;;  %v181_v29 = vpop.f32.mrb[2].mxu1 }
  0xe0   :  { %v265_v30 = vsel %vm264_vm1, %v1743_v12, 0.0  ;;  %v279_v33 = vsel %vm264_vm1, %v1745_v17, 0.0  ;;  %v141_v34 = vpop.f32.mrb[3].mxu0  ;;  %v182_v38 = vpop.f32.mrb[3].mxu1 }
  0xe1   :  { %1953 = vst [vmem:[#allocation6_spill] sm:$0xff] %v1749_v25  ;;  %v266_v39 = vrot.slane %v265_v30, 4  ;;  %v280_v42 = vrot.slane %v279_v33, 4  ;;  %v272_v44 = vsel %vm264_vm1, %v1747_v22, 0.0  ;;  %v286_v45 = vsel %vm264_vm1, %v1749_v25, 0.0 }
  0xe2   :  { %v273_v46 = vrot.slane %v272_v44, 4  ;;  %v287_v53 = vrot.slane %v286_v45, 4 }
  0xe3   :  { %v267_v54 = vadd.f32 %v266_v39, %v265_v30  ;;  %v281_v58 = vadd.f32 %v280_v42, %v279_v33  ;;  %v249_v30 = vld [vmem:[%s1937_s6 + $0x8] sm:$0xff]  ;;  %v251_v39 = vld [vmem:[%s1937_s6 + $0x18] sm:$0xff] }
  0xe4   :  { %v274_v63 = vadd.f32 %v273_v46, %v272_v44  ;;  %v288_v4 = vadd.f32 %v287_v53, %v286_v45  ;;  %v253_v33 = vld [vmem:[%s1937_s6 + $0x28] sm:$0xff]  ;;  %v250_v44 = vld [vmem:[%s1937_s6 + $0x10] sm:$0xff] }
  0xe5   :  { %v268_v6 = vrot.slane %v267_v54, 2  ;;  %v282_v7 = vrot.slane %v281_v58, 2  ;;  %v1768_v42 = vpack.c.bf16 %v253_v33, %v249_v30  ;;  %v254_v45 = vld [vmem:[%s1937_s6 + $0x30] sm:$0xff]  ;;  %v257_v53 = vld [vmem:[%s1937_s6 + $0x48] sm:$0xff] }
  0xe6   :  { %v275_v8 = vrot.slane %v274_v63, 2  ;;  %v289_v10 = vrot.slane %v288_v4, 2  ;;  %v1790_v46 = vpack.c.bf16 %v254_v45, %v250_v44 }
  0xe7   :  { %v269_v11 = vadd.f32 %v268_v6, %v267_v54  ;;  %v283_v18 = vadd.f32 %v282_v7, %v281_v58  ;;  %1244 = vmatprep.subr.bf16.mxu0 %v1768_v42  ;;  %v261_v54 = vld [vmem:[%s1937_s6 + $0x68] sm:$0xff]  ;;  %v259_v58 = vld [vmem:[%s1937_s6 + $0x58] sm:$0xff]  ;;  %v256_v6 = vld [vmem:[%s1937_s6 + $0x40] sm:$0xff] }
  0xe8   :  { %v276_v21 = vadd.f32 %v275_v8, %v274_v63  ;;  %v290_v27 = vadd.f32 %v289_v10, %v288_v4  ;;  %v1804_v63 = vpack.c.bf16 %v261_v54, %v257_v53  ;;  %v263_v4 = vld [vmem:[%s1937_s6 + $0x78] sm:$0xff]  ;;  %v260_v7 = vld [vmem:[%s1937_s6 + $0x60] sm:$0xff] }
  0xe9   :  { %v270_v29 = vrot.slane %v269_v11, 1  ;;  %v284_v34 = vrot.slane %v283_v18, 1  ;;  %v1815_v8 = vpack.c.bf16 %v263_v4, %v259_v58  ;;  %v1817_v10 = vpack.c.bf16 %v260_v7, %v256_v6 }
  0xea   :  { %v277_v38 = vrot.slane %v276_v21, 1  ;;  %v291_v59 = vrot.slane %v290_v27, 1 }
  0xeb   :  { %v271_v62 = vadd.f32 %v270_v29, %v269_v11  ;;  %v285_v25 = vadd.f32 %v284_v34, %v283_v18  ;;  %v258_v11 = vld [vmem:[%s1937_s6 + $0x50] sm:$0xff] }
  0xec   :  { %v278_v3 = vadd.f32 %v277_v38, %v276_v21  ;;  %v292_v0 = vadd.f32 %v291_v59, %v290_v27  ;;  %v255_v59 = vld [vmem:[%s1937_s6 + $0x38] sm:$0xff]  ;;  %v262_v18 = vld [vmem:[%s1937_s6 + $0x70] sm:$0xff]  ;;  %v1363_v27 = vmov 0.0  }
  0xed   :  { %v1826_v21 = vpack.c.bf16 %v262_v18, %v258_v11 }
  0xee   :  { %357 = vmatprep.mubr.f32.mxu0 %v278_v3  ;;  %427 = vmatprep.mubr.f32.mxu1 %v292_v0  ;;  %v252_v0 = vld [vmem:[%s1937_s6 + $0x20] sm:$0xff]  ;;  %v1779_v3 = vpack.c.bf16 %v255_v59, %v251_v39 }
  0xef   :  { %358 = vmatmul.mubr.f32.vlgmr.msra.gmra.mrb[4].mxu0 %v271_v62  ;;  %428 = vmatmul.mubr.f32.vlgmr.msra.gmra.mrb[4].mxu1 %v285_v25  ;;  %v248_v62 = vld [vmem:[%s1937_s6] sm:$0xff] }
  0xf0   :  { %v1781_v25 = vpack.c.bf16 %v252_v0, %v248_v62  ;;  %1252 = vmatprep.subr.bf16.mxu1 %v1779_v3  ;;  %502 = vmatprep.mubr.f32.mxu0 %v1363_v27 }
  0xf1   :  { %1254 = vmatpush1.bf16.msra.mxu1 %v1790_v46  ;;  %573 = vmatprep.mubr.f32.mxu1 %v1363_v27 }
  0xf2   :  { %1246 = vmatpush1.bf16.msra.mxu0 %v1781_v25  ;;  %1256 = vmatprep.subr.bf16.mxu1 %v1815_v8 }
  0xf3   :  { %1248 = vmatprep.subr.bf16.mxu0 %v1804_v63 }
  0xf5   :  { %1258 = vmatpush1.bf16.msra.mxu1 %v1826_v21 }
  0xf6   :  { %1250 = vmatpush1.bf16.msra.mxu0 %v1817_v10  ;;  %1292 = vmatprep.subr.bf16.mxu1 %v1446_v15 }
  0xf7   :  { %1260 = vmatprep.subr.bf16.mxu0 %v1444_v14 }
 0x1c2   :  { %v1071_v29 = vpop.f32.mrb[4].mxu0  ;;  %v1106_v34 = vpop.f32.mrb[4].mxu1 }
 0x1c3   :  { %v1072_v38 = vpop.f32.mrb[5].mxu0  ;;  %v1107_v30 = vpop.f32.mrb[5].mxu1 }
 0x1c4   :  { %v1073_v33 = vadd.f32 %v1072_v38, %v1071_v29  ;;  %v1108_v39 = vadd.f32 %v1107_v30, %v1106_v34 }
 0x1c6   :  { %v430_v59 = vadd.f32 %v1108_v39, %v1073_v33 }
 0x1c8   :  { %v434_v62 = vmul.f32 0.03125, %v430_v59  ;;  %v942_v59 = vld [vmem:[%s1938_s3] sm:$0xf] }
 0x1ca   :  { %1035 = vmatmul.mubr.msk.f32.vlgmr.msra.gmra.mrb[6].mxu0 %vm98_vm0, %v434_v62  ;;  %1036 = vmatmul.mubr.msk.f32.vlgmr.msra.gmra.mrb[6].mxu1 %vm98_vm0, %v434_v62  ;;  %v968_v62 = vld [vmem:[%s1939_s4] sm:$0xf] }
 0x1cb   :  { %1262 = vmatpush3.bf16.msra.mxu0 %v1457_v19  ;;  %1294 = vmatpush3.bf16.msra.mxu1 %v1470_v23 }
 0x1cc   :  { %1264 = vmatprep.subr.bf16.mxu0 %v1472_v24  ;;  %1296 = vmatprep.subr.bf16.mxu1 %v1483_v28 }
 0x1cf   :  { %1266 = vmatpush3.bf16.msra.mxu0 %v1507_v35  ;;  %1298 = vmatpush3.bf16.msra.mxu1 %v1509_v36 }
 0x1d0   :  { %1268 = vmatprep.subr.bf16.mxu0 %v1522_v40  ;;  %1300 = vmatprep.subr.bf16.mxu1 %v1524_v41 }
 0x1d3   :  { %1270 = vmatpush3.bf16.msra.mxu0 %v1546_v48  ;;  %1302 = vmatpush3.bf16.msra.mxu1 %v1548_v49  ;;  %v1954_v49 = vld [vmem:[#allocation6_spill] sm:$0xff] }
 0x1d4   :  { %1272 = vmatprep.subr.bf16.mxu0 %v1555_v51  ;;  %1304 = vmatprep.subr.bf16.mxu1 %v1557_v52 }
 0x1d7   :  { %1274 = vmatpush3.bf16.msra.mxu0 %v1570_v56  ;;  %1306 = vmatpush3.bf16.msra.mxu1 %v1572_v57 }
 0x1d8   :  { %1276 = vmatprep.subr.bf16.mxu0 %v1587_v61  ;;  %1308 = vmatprep.subr.bf16.mxu1 %v1598_v1 }
 0x1db   :  { %1278 = vmatpush3.bf16.msra.mxu0 %v1600_v2  ;;  %1310 = vmatpush3.bf16.msra.mxu1 %v1609_v5 }
 0x1dc   :  { %1280 = vmatprep.subr.bf16.mxu0 %v1623_v9  ;;  %1312 = vmatprep.subr.bf16.mxu1 %v1634_v13 }
 0x1df   :  { %1282 = vmatpush3.bf16.msra.mxu0 %v1636_v16  ;;  %1314 = vmatpush3.bf16.msra.mxu1 %v1645_v20 }
 0x1e0   :  { %1284 = vmatprep.subr.bf16.mxu0 %v1659_v26  ;;  %1316 = vmatprep.subr.bf16.mxu1 %v1670_v31 }
 0x1e3   :  { %1286 = vmatpush3.bf16.msra.mxu0 %v1672_v32  ;;  %1318 = vmatpush3.bf16.msra.mxu1 %v1681_v37 }
 0x1e4   :  { %1288 = vmatprep.subr.bf16.mxu0 %v1695_v43  ;;  %1320 = vmatprep.subr.bf16.mxu1 %v1706_v47 }
 0x1e7   :  { %1290 = vmatpush3.bf16.msra.mxu0 %v1708_v50  ;;  %1322 = vmatpush3.bf16.msra.mxu1 %v1719_v55 }
 0x1e8   :  { %1324 = vmatprep.subr.bf16.mxu0 %v1768_v42  ;;  %1332 = vmatprep.subr.bf16.mxu1 %v1779_v3 }
 0x29d   :  { %v504_v14 = vpop.f32.mrb[6].mxu0  ;;  %v575_v15 = vpop.f32.mrb[6].mxu1 }
 0x29e   :  { %v583_v19 = vrot.slane %v504_v14, %v1725_v60  ;;  %v591_v23 = vrot.slane %v575_v15, %v1725_v60  ;;  %v506_v24 = vpop.f32.mrb[7].mxu0  ;;  %v577_v28 = vpop.f32.mrb[7].mxu1 }
 0x29f   :  { %v587_v35 = vrot.slane %v506_v24, %v1725_v60  ;;  %v595_v36 = vrot.slane %v577_v28, %v1725_v60  ;;  %v1955_v28 = vld [vmem:[#allocation3_spill] sm:$0xff] }
 0x2a0   :  { %v1874_v40 = vsub.f32 %v1743_v12, %v583_v19  ;;  %v1877_v41 = vsub.f32 %v1745_v17, %v591_v23  ;;  %v947_v23 = vrot.slane %v942_v59, %v1725_v60 }
 0x2a1   :  { %v1880_v48 = vsub.f32 %v1747_v22, %v587_v35  ;;  %v1883_v51 = vsub.f32 %v1954_v49, %v595_v36  ;;  %v955_v35 = vrot.slane %v942_v59, %v1955_v28  ;;  %v973_v36 = vrot.slane %v968_v62, %v1725_v60 }
 0x2a2   :  { %v600_v52 = vmul.f32 %v1874_v40, %v1874_v40  ;;  %v602_v56 = vmul.f32 %v1877_v41, %v1877_v41 }
 0x2a3   :  { %v601_v57 = vmul.f32 %v1880_v48, %v1880_v48  ;;  %v603_v61 = vmul.f32 %v1883_v51, %v1883_v51 }
 0x2a4   :  { %v604_v1 = vsel %vm264_vm1, %v600_v52, 0.0  ;;  %v618_v2 = vsel %vm264_vm1, %v602_v56, 0.0  ;;  %v1956_v56 = vld [vmem:[#allocation4_spill] sm:$0xff] }
 0x2a5   :  { %v605_v5 = vrot.slane %v604_v1, 4  ;;  %v619_v9 = vrot.slane %v618_v2, 4  ;;  %v611_v13 = vsel %vm264_vm1, %v601_v57, 0.0  ;;  %v625_v16 = vsel %vm264_vm1, %v603_v61, 0.0 }
 0x2a6   :  { %v612_v20 = vrot.slane %v611_v13, 4  ;;  %v626_v26 = vrot.slane %v625_v16, 4  ;;  %v951_v57 = vrot.slane %v942_v59, %v1956_v56 }
 0x2a7   :  { %v606_v31 = vadd.f32 %v605_v5, %v604_v1  ;;  %v620_v32 = vadd.f32 %v619_v9, %v618_v2  ;;  %v1364_v2 = vmov 1983009808   ;;  %v981_v9 = vrot.slane %v968_v62, %v1955_v28 }
 0x2a8   :  { %v613_v37 = vadd.f32 %v612_v20, %v611_v13  ;;  %v627_v43 = vadd.f32 %v626_v26, %v625_v16  ;;  %v1005_v5 = vunpack.c.l.s4 %v1364_v2  ;;  %v1957_v13 = vld [vmem:[#allocation5_spill] sm:$0xff] }
 0x2a9   :  { %v607_v47 = vrot.slane %v606_v31, 2  ;;  %v621_v50 = vrot.slane %v620_v32, 2  ;;  %v959_v16 = vrot.slane %v942_v59, %v1957_v13 }
 0x2aa   :  { %v614_v55 = vrot.slane %v613_v37, 2  ;;  %v628_v12 = vrot.slane %v627_v43, 2 }
 0x2ab   :  { %v608_v17 = vadd.f32 %v607_v47, %v606_v31  ;;  %v622_v22 = vadd.f32 %v621_v50, %v620_v32  ;;  %v977_v31 = vrot.slane %v968_v62, %v1956_v56 }
 0x2ac   :  { %v615_v42 = vadd.f32 %v614_v55, %v613_v37  ;;  %v629_v0 = vadd.f32 %v628_v12, %v627_v43  ;;  %v985_v43 = vrot.slane %v968_v62, %v1957_v13  ;;  %v1006_v12 = vunpack.c.0.s8 %v1005_v5 }
 0x2ad   :  { %v609_v3 = vrot.slane %v608_v17, 1  ;;  %v623_v44 = vrot.slane %v622_v22, 1 }
 0x2ae   :  { %v616_v45 = vrot.slane %v615_v42, 1  ;;  %v630_v53 = vrot.slane %v629_v0, 1 }
 0x2af   :  { %v610_v4 = vadd.f32 %v609_v3, %v608_v17  ;;  %v624_v6 = vadd.f32 %v623_v44, %v622_v22  ;;  %v1958_v44 = vld [vmem:[#allocation2_spill] sm:$0xff] }
 0x2b0   :  { %v617_v54 = vadd.f32 %v616_v45, %v615_v42  ;;  %v631_v58 = vadd.f32 %v630_v53, %v629_v0  ;;  %v1009_v45 = vsub.s32 %v1006_v12, %v1958_v44 }
 0x2b2   :  { %696 = vmatprep.mubr.f32.mxu0 %v617_v54  ;;  %766 = vmatprep.mubr.f32.mxu1 %v631_v58 }
 0x2b3   :  { %697 = vmatmul.mubr.f32.vlgmr.msra.gmra.mrb[8].mxu0 %v610_v4  ;;  %767 = vmatmul.mubr.f32.vlgmr.msra.gmra.mrb[8].mxu1 %v624_v6 }
 0x2b4   :  { %1326 = vmatpush1.bf16.msra.mxu0 %v1781_v25  ;;  %1334 = vmatpush1.bf16.msra.mxu1 %v1790_v46 }
 0x2b5   :  { %1328 = vmatprep.subr.bf16.mxu0 %v1804_v63  ;;  %1336 = vmatprep.subr.bf16.mxu1 %v1815_v8 }
 0x2b6   :  { %840 = vmatprep.mubr.f32.mxu0 %v1363_v27  ;;  %911 = vmatprep.mubr.f32.mxu1 %v1363_v27 }
 0x2b8   :  { %1330 = vmatpush1.bf16.msra.mxu0 %v1817_v10  ;;  %1338 = vmatpush1.bf16.msra.mxu1 %v1826_v21 }
 0x386   :  { %v1141_v7 = vpop.f32.mrb[8].mxu0  ;;  %v1176_v11 = vpop.f32.mrb[8].mxu1 }
 0x387   :  { %v1142_v18 = vpop.f32.mrb[9].mxu0  ;;  %v1177_v29 = vpop.f32.mrb[9].mxu1 }
 0x388   :  { %v1143_v34 = vadd.f32 %v1142_v18, %v1141_v7  ;;  %v1178_v25 = vadd.f32 %v1177_v29, %v1176_v11 }
 0x38a   :  { %v769_v38 = vadd.f32 %v1178_v25, %v1143_v34 }
 0x38c   :  { %v772_v46 = vmul.f32 0.03125, %v769_v38 }
 0x38e   :  { %1037 = vmatmul.mubr.msk.f32.vlgmr.msra.gmra.mrb[10].mxu0 %vm98_vm0, %v772_v46  ;;  %1038 = vmatmul.mubr.msk.f32.vlgmr.msra.gmra.mrb[10].mxu1 %vm98_vm0, %v772_v46 }
 0x461   :  { %v842_v63 = vpop.f32.mrb[10].mxu0  ;;  %v913_v8 = vpop.f32.mrb[10].mxu1 }
 0x462   :  { %v843_v30 = vadd.f32 1e-05, %v842_v63  ;;  %v914_v27 = vadd.f32 1e-05, %v913_v8  ;;  %v844_v33 = vpop.f32.mrb[11].mxu0  ;;  %v915_v10 = vpop.f32.mrb[11].mxu1 }
 0x463   :  { %v845_v39 = vadd.f32 1e-05, %v844_v33  ;;  %v916_v21 = vadd.f32 1e-05, %v915_v10 }
 0x464   :  { %1354 = vrsqrt.f32 %v843_v30 }
 0x465   :  { %1356 = vrsqrt.f32 %v914_v27 }
 0x466   :  { %1358 = vrsqrt.f32 %v845_v39 }
 0x467   :  { %1360 = vrsqrt.f32 %v916_v21 }
 0x46e   :  { %v1355_v14 = vpop.eup %1354 }
 0x46f   :  { %v1357_v15 = vpop.eup %1356  ;;  %v925_v19 = vrot.slane %v1355_v14, %v1725_v60 }
 0x470   :  { %v1359_v24 = vpop.eup %1358  ;;  %v933_v49 = vrot.slane %v1357_v15, %v1725_v60 }
 0x471   :  { %v1361_v52 = vpop.eup %1360  ;;  %v938_v61 = vmul.f32 %v925_v19, %v1874_v40  ;;  %v929_v1 = vrot.slane %v1359_v24, %v1725_v60 }
 0x472   :  { %v940_v20 = vmul.f32 %v933_v49, %v1877_v41  ;;  %v937_v26 = vrot.slane %v1361_v52, %v1725_v60 }
 0x473   :  { %v964_v32 = vmul.f32 %v947_v23, %v938_v61  ;;  %v939_v37 = vmul.f32 %v929_v1, %v1880_v48 }
 0x474   :  { %v966_v40 = vmul.f32 %v955_v35, %v940_v20  ;;  %v941_v47 = vmul.f32 %v937_v26, %v1883_v51 }
 0x475   :  { %v990_v50 = vadd.f32 %v973_v36, %v964_v32  ;;  %v965_v55 = vmul.f32 %v951_v57, %v939_v37 }
 0x476   :  { %v992_v17 = vadd.f32 %v981_v9, %v966_v40  ;;  %v967_v22 = vmul.f32 %v959_v16, %v941_v47 }
 0x477   :  { %v994_v42 = vmax.f32 %v990_v50, 0.0  ;;  %v991_v0 = vadd.f32 %v977_v31, %v965_v55 }
 0x478   :  { %v996_v41 = vmax.f32 %v992_v17, 0.0  ;;  %v993_v3 = vadd.f32 %v985_v43, %v967_v22 }
 0x479   :  { %v995_v60 = vmax.f32 %v991_v0, 0.0 }
 0x47a   :  { %v997_v53 = vmax.f32 %v993_v3, 0.0 }
 0x47b   :  { %v1002_v54 = vcombine.low %v994_v42, %v995_v60 }
 0x47c   :  { %v1003_v48 = vcombine.low %v996_v41, %v997_v53 }
 0x47d   :  { %v1010_v58 = vrot.slane %v1002_v54, %v1009_v45 }
 0x47e   :  { %v1017_v4 = vrot.slane %v1003_v48, %v1009_v45 }
 0x480   :  { %v1018_v6 = vcombine.low %v1010_v58, %v1017_v4 }
 0x482   :  { %1020 = vst [vmem:[%s1940_s7] sm:$0xff] %v1018_v6 }

// kernel: wgan_forward.6
= control target key start
LH: loop header
LB: loop body
LE: loop exit
PB: predicated region body
PF: predicated region fallthrough
CT: control target
= control target key end

     0   :  { %vm1680_vm0 = vcmask 130048   ;;  %s1674_s1 = inlined_call_operand.vmem [shape: bf16[512,16], index: 1, kind: input, shape index: {}]   ;;  %s1675_s0 = inlined_call_operand.vmem [shape: bf16[128,512], index: 0, kind: input, shape index: {}]   ;;  %s1676_s2 = inlined_call_operand.vmem [shape: f32[1,16], index: 2, kind: input, shape index: {}]   ;;  %s1677_s3 = inlined_call_operand.vmem [shape: f32[1,16], index: 3, kind: input, shape index: {}]   ;;  %s1678_s4 = inlined_call_operand.vmem [shape: f32[1,16], index: 4, kind: input, shape index: {}]   ;;  %s1679_s5 = inlined_call_operand.vmem [shape: f32[128,16], index: 5, kind: output, shape index: {}]  }
   0x1   :  { %v1107_v0 = vld [vmem:[%s1674_s1 + $0x40] sm:$0xff]   ;;  %v1111_v4 = vld [vmem:[%s1674_s1 + $0x48] sm:$0xff]   ;;  %v1115_v8 = vld [vmem:[%s1674_s1 + $0x50] sm:$0xff]  }
   0x2   :  { %v1108_v1 = vld [vmem:[%s1674_s1 + $0xc0] sm:$0xff]   ;;  %979 = vmatprep.subr.bf16.mxu0 %v1107_v0  ;;  %v1112_v5 = vld [vmem:[%s1674_s1 + $0xc8] sm:$0xff]   ;;  %v1116_v9 = vld [vmem:[%s1674_s1 + $0xd0] sm:$0xff]  }
   0x3   :  { %v1109_v2 = vld [vmem:[%s1674_s1] sm:$0xff]   ;;  %1043 = vmatprep.subr.bf16.mxu1 %v1108_v1  ;;  %v1113_v6 = vld [vmem:[%s1674_s1 + $0x8] sm:$0xff]   ;;  %v1117_v10 = vld [vmem:[%s1674_s1 + $0x10] sm:$0xff]  }
   0x4   :  { %v1110_v3 = vld [vmem:[%s1674_s1 + $0x80] sm:$0xff]   ;;  %980 = vmatpush3.bf16.msra.mxu0 %v1109_v2  ;;  %v1114_v7 = vld [vmem:[%s1674_s1 + $0x88] sm:$0xff]   ;;  %v1118_v11 = vld [vmem:[%s1674_s1 + $0x90] sm:$0xff]  }
   0x5   :  { %1044 = vmatpush3.bf16.msra.mxu1 %v1110_v3  ;;  %981 = vmatprep.subr.bf16.mxu0 %v1111_v4  ;;  %v1119_v12 = vld [vmem:[%s1674_s1 + $0x58] sm:$0xff]   ;;  %v1123_v16 = vld [vmem:[%s1674_s1 + $0x60] sm:$0xff]   ;;  %v1127_v20 = vld [vmem:[%s1674_s1 + $0x68] sm:$0xff]  }
   0x6   :  { %1045 = vmatprep.subr.bf16.mxu1 %v1112_v5  ;;  %v1120_v13 = vld [vmem:[%s1674_s1 + $0xd8] sm:$0xff]   ;;  %v1124_v17 = vld [vmem:[%s1674_s1 + $0xe0] sm:$0xff]   ;;  %v1128_v21 = vld [vmem:[%s1674_s1 + $0xe8] sm:$0xff]  }
   0x7   :  { %v1121_v14 = vld [vmem:[%s1674_s1 + $0x18] sm:$0xff]   ;;  %v1125_v18 = vld [vmem:[%s1674_s1 + $0x20] sm:$0xff]   ;;  %v1129_v22 = vld [vmem:[%s1674_s1 + $0x28] sm:$0xff]  }
   0x8   :  { %982 = vmatpush3.bf16.msra.mxu0 %v1113_v6  ;;  %v1122_v15 = vld [vmem:[%s1674_s1 + $0x98] sm:$0xff]   ;;  %v1126_v19 = vld [vmem:[%s1674_s1 + $0xa0] sm:$0xff]   ;;  %v1130_v23 = vld [vmem:[%s1674_s1 + $0xa8] sm:$0xff]  }
   0x9   :  { %1046 = vmatpush3.bf16.msra.mxu1 %v1114_v7  ;;  %983 = vmatprep.subr.bf16.mxu0 %v1115_v8  ;;  %v1131_v24 = vld [vmem:[%s1674_s1 + $0x70] sm:$0xff]   ;;  %v1135_v28 = vld [vmem:[%s1674_s1 + $0x78] sm:$0xff]   ;;  %v1414_v2 = vld [vmem:[%s1676_s2] ss:$0 sm:$0xff] }
   0xa   :  { %1047 = vmatprep.subr.bf16.mxu1 %v1116_v9  ;;  %v1132_v25 = vld [vmem:[%s1674_s1 + $0xf0] sm:$0xff]   ;;  %v1136_v29 = vld [vmem:[%s1674_s1 + $0xf8] sm:$0xff]  }
   0xb   :  { %v1133_v26 = vld [vmem:[%s1674_s1 + $0x30] sm:$0xff]   ;;  %v1137_v30 = vld [vmem:[%s1674_s1 + $0x38] sm:$0xff]  }
   0xc   :  { %984 = vmatpush3.bf16.msra.mxu0 %v1117_v10  ;;  %v1134_v27 = vld [vmem:[%s1674_s1 + $0xb0] sm:$0xff]   ;;  %v1138_v31 = vld [vmem:[%s1674_s1 + $0xb8] sm:$0xff]  }
   0xd   :  { %1048 = vmatpush3.bf16.msra.mxu1 %v1118_v11  ;;  %985 = vmatprep.subr.bf16.mxu0 %v1119_v12  ;;  %v1139_v32 = vld [vmem:[%s1675_s0] ss:$16 sps:$4 sm:$0xff]   ;;  %v1141_v33 = vld [vmem:[%s1675_s0 + $0x4] ss:$16 sps:$4 sm:$0xff]   ;;  %v1142_v34 = vld [vmem:[%s1675_s0 + $0x8] ss:$16 sps:$4 sm:$0xff]  }
   0xe   :  { %1049 = vmatprep.subr.bf16.mxu1 %v1120_v13  ;;  %v1144_v35 = vld [vmem:[%s1675_s0 + $0xc] ss:$16 sps:$4 sm:$0xff]   ;;  %508 = vmatprep.mubr.bf16.mxu0 %v1141_v33  ;;  %v1145_v36 = vld [vmem:[%s1675_s0 + $0x24] ss:$16 sps:$4 sm:$0xff]   ;;  %v1149_v38 = vld [vmem:[%s1675_s0 + $0x20] ss:$16 sps:$4 sm:$0xff]  }
   0xf   :  { %605 = vmatprep.mubr.bf16.mxu1 %v1144_v35  ;;  %v1147_v37 = vld [vmem:[%s1675_s0 + $0x2c] ss:$16 sps:$4 sm:$0xff]   ;;  %v1150_v39 = vld [vmem:[%s1675_s0 + $0x28] ss:$16 sps:$4 sm:$0xff]   ;;  %v1151_v40 = vld [vmem:[%s1675_s0 + $0x44] ss:$16 sps:$4 sm:$0xff]  }
  0x10   :  { %986 = vmatpush3.bf16.msra.mxu0 %v1121_v14  ;;  %v1153_v41 = vld [vmem:[%s1675_s0 + $0x4c] ss:$16 sps:$4 sm:$0xff]   ;;  %v1155_v42 = vld [vmem:[%s1675_s0 + $0x40] ss:$16 sps:$4 sm:$0xff]   ;;  %v1156_v43 = vld [vmem:[%s1675_s0 + $0x48] ss:$16 sps:$4 sm:$0xff]  }
  0x11   :  { %1050 = vmatpush3.bf16.msra.mxu1 %v1122_v15  ;;  %987 = vmatprep.subr.bf16.mxu0 %v1123_v16  ;;  %v1157_v44 = vld [vmem:[%s1675_s0 + $0x64] ss:$16 sps:$4 sm:$0xff]   ;;  %v1159_v45 = vld [vmem:[%s1675_s0 + $0x6c] ss:$16 sps:$4 sm:$0xff]   ;;  %v1161_v46 = vld [vmem:[%s1675_s0 + $0x60] ss:$16 sps:$4 sm:$0xff]  }
  0x12   :  { %1051 = vmatprep.subr.bf16.mxu1 %v1124_v17  ;;  %v1162_v47 = vld [vmem:[%s1675_s0 + $0x68] ss:$16 sps:$4 sm:$0xff]   ;;  %v1163_v48 = vld [vmem:[%s1675_s0 + $0x84] ss:$16 sps:$4 sm:$0xff]   ;;  %v1165_v49 = vld [vmem:[%s1675_s0 + $0x8c] ss:$16 sps:$4 sm:$0xff]  }
  0x13   :  { %v1167_v50 = vld [vmem:[%s1675_s0 + $0x80] ss:$16 sps:$4 sm:$0xff]   ;;  %v1168_v51 = vld [vmem:[%s1675_s0 + $0x88] ss:$16 sps:$4 sm:$0xff]   ;;  %v1169_v52 = vld [vmem:[%s1675_s0 + $0xa4] ss:$16 sps:$4 sm:$0xff]  }
  0x14   :  { %988 = vmatpush3.bf16.msra.mxu0 %v1125_v18  ;;  %v1171_v53 = vld [vmem:[%s1675_s0 + $0xac] ss:$16 sps:$4 sm:$0xff]   ;;  %v1173_v54 = vld [vmem:[%s1675_s0 + $0xa0] ss:$16 sps:$4 sm:$0xff]   ;;  %v1174_v55 = vld [vmem:[%s1675_s0 + $0xa8] ss:$16 sps:$4 sm:$0xff]  }
  0x15   :  { %1052 = vmatpush3.bf16.msra.mxu1 %v1126_v19  ;;  %989 = vmatprep.subr.bf16.mxu0 %v1127_v20  ;;  %v1175_v56 = vld [vmem:[%s1675_s0 + $0xc4] ss:$16 sps:$4 sm:$0xff]   ;;  %v1177_v57 = vld [vmem:[%s1675_s0 + $0xcc] ss:$16 sps:$4 sm:$0xff]   ;;  %v1179_v58 = vld [vmem:[%s1675_s0 + $0xc0] ss:$16 sps:$4 sm:$0xff]  }
  0x16   :  { %1053 = vmatprep.subr.bf16.mxu1 %v1128_v21  ;;  %v1180_v59 = vld [vmem:[%s1675_s0 + $0xc8] ss:$16 sps:$4 sm:$0xff]   ;;  %v1181_v60 = vld [vmem:[%s1675_s0 + $0xe4] ss:$16 sps:$4 sm:$0xff]   ;;  %v1183_v61 = vld [vmem:[%s1675_s0 + $0xec] ss:$16 sps:$4 sm:$0xff]  }
  0x17   :  { %v1185_v62 = vld [vmem:[%s1675_s0 + $0xe0] ss:$16 sps:$4 sm:$0xff]   ;;  %v1186_v63 = vld [vmem:[%s1675_s0 + $0xe8] ss:$16 sps:$4 sm:$0xff]  }
  0x18   :  { %990 = vmatpush3.bf16.msra.mxu0 %v1129_v22 }
  0x19   :  { %1054 = vmatpush3.bf16.msra.mxu1 %v1130_v23  ;;  %991 = vmatprep.subr.bf16.mxu0 %v1131_v24 }
  0x1a   :  { %1055 = vmatprep.subr.bf16.mxu1 %v1132_v25 }
  0x1c   :  { %992 = vmatpush3.bf16.msra.mxu0 %v1133_v26 }
  0x1d   :  { %1056 = vmatpush3.bf16.msra.mxu1 %v1134_v27  ;;  %993 = vmatprep.subr.bf16.mxu0 %v1135_v28 }
  0x1e   :  { %1057 = vmatprep.subr.bf16.mxu1 %v1136_v29 }
  0x20   :  { %994 = vmatpush3.bf16.msra.mxu0 %v1137_v30 }
  0x21   :  { %1058 = vmatpush3.bf16.msra.mxu1 %v1138_v31 }
  0x23   :  { %509 = vmatmul.mubr.bf16.vlgmr.msra.gmra.mrb[0].mxu0 %v1139_v32 }
  0x24   :  { %606 = vmatmul.mubr.bf16.vlgmr.msra.gmra.mrb[0].mxu1 %v1142_v34  ;;  %516 = vmatprep.mubr.bf16.mxu0 %v1145_v36 }
  0x25   :  { %613 = vmatprep.mubr.bf16.mxu1 %v1147_v37 }
  0x2b   :  { %517 = vmatmul.mubr.bf16.gmra.mrb[4].mxu0 %v1149_v38 }
  0x2c   :  { %614 = vmatmul.mubr.bf16.gmra.mrb[4].mxu1 %v1150_v39  ;;  %524 = vmatprep.mubr.bf16.mxu0 %v1151_v40 }
  0x2d   :  { %621 = vmatprep.mubr.bf16.mxu1 %v1153_v41 }
  0x33   :  { %525 = vmatmul.mubr.bf16.gmra.mrb[8].mxu0 %v1155_v42 }
  0x34   :  { %622 = vmatmul.mubr.bf16.gmra.mrb[8].mxu1 %v1156_v43  ;;  %532 = vmatprep.mubr.bf16.mxu0 %v1157_v44 }
  0x35   :  { %629 = vmatprep.mubr.bf16.mxu1 %v1159_v45 }
  0x3b   :  { %533 = vmatmul.mubr.bf16.gmra.mrb[12].mxu0 %v1161_v46 }
  0x3c   :  { %630 = vmatmul.mubr.bf16.gmra.mrb[12].mxu1 %v1162_v47  ;;  %540 = vmatprep.mubr.bf16.mxu0 %v1163_v48 }
  0x3d   :  { %637 = vmatprep.mubr.bf16.mxu1 %v1165_v49 }
  0x43   :  { %541 = vmatmul.mubr.bf16.gmra.mrb[16].mxu0 %v1167_v50 }
  0x44   :  { %638 = vmatmul.mubr.bf16.gmra.mrb[16].mxu1 %v1168_v51  ;;  %548 = vmatprep.mubr.bf16.mxu0 %v1169_v52 }
  0x45   :  { %645 = vmatprep.mubr.bf16.mxu1 %v1171_v53 }
  0x4b   :  { %549 = vmatmul.mubr.bf16.gmra.mrb[20].mxu0 %v1173_v54 }
  0x4c   :  { %646 = vmatmul.mubr.bf16.gmra.mrb[20].mxu1 %v1174_v55  ;;  %556 = vmatprep.mubr.bf16.mxu0 %v1175_v56 }
  0x4d   :  { %653 = vmatprep.mubr.bf16.mxu1 %v1177_v57 }
  0x53   :  { %557 = vmatmul.mubr.bf16.gmra.mrb[24].mxu0 %v1179_v58 }
  0x54   :  { %654 = vmatmul.mubr.bf16.gmra.mrb[24].mxu1 %v1180_v59  ;;  %564 = vmatprep.mubr.bf16.mxu0 %v1181_v60 }
  0x55   :  { %661 = vmatprep.mubr.bf16.mxu1 %v1183_v61 }
  0x5b   :  { %565 = vmatmul.mubr.bf16.gmra.mrb[28].mxu0 %v1185_v62 }
  0x5c   :  { %662 = vmatmul.mubr.bf16.gmra.mrb[28].mxu1 %v1186_v63 }
  0xf6   :  { %v995_v0 = vpop.f32.mrb[0].mxu0 }
  0xf7   :  { %v1059_v1 = vpop.f32.mrb[0].mxu1  ;;  %v996_v3 = vpop.f32.mrb[1].mxu0 }
  0xf8   :  { %v997_v4 = vadd.f32 %v996_v3, %v995_v0  ;;  %v1060_v5 = vpop.f32.mrb[1].mxu1  ;;  %v998_v6 = vpop.f32.mrb[2].mxu0 }
  0xf9   :  { %v1061_v7 = vadd.f32 %v1060_v5, %v1059_v1  ;;  %v1062_v8 = vpop.f32.mrb[2].mxu1  ;;  %v999_v9 = vpop.f32.mrb[3].mxu0 }
  0xfa   :  { %v511_v10 = vadd.f32 %v997_v4, %v1414_v2  ;;  %v1000_v11 = vadd.f32 %v999_v9, %v998_v6  ;;  %v1063_v12 = vpop.f32.mrb[3].mxu1 }
  0xfb   :  { %v1064_v13 = vadd.f32 %v1063_v12, %v1062_v8 }
  0xfc   :  { %v1417_v14 = vadd.f32 %v1061_v7, %v511_v10  ;;  %v514_v15 = vadd.f32 %v1000_v11, %v1414_v2 }
  0xfe   :  { %v1420_v16 = vadd.f32 %v1064_v13, %v514_v15  ;;  %v1001_v17 = vpop.f32.mrb[4].mxu0  ;;  %v671_v20 = vsel %vm1680_vm0, %v1417_v14, 0.0 }
  0xff   :  { %v1065_v18 = vpop.f32.mrb[4].mxu1  ;;  %v1002_v19 = vpop.f32.mrb[5].mxu0 }
 0x100   :  { %v672_v21 = vsel %vm1680_vm0, %v1420_v16, 0.0  ;;  %v1003_v22 = vadd.f32 %v1002_v19, %v1001_v17  ;;  %v1066_v23 = vpop.f32.mrb[5].mxu1  ;;  %v1004_v24 = vpop.f32.mrb[6].mxu0 }
 0x101   :  { %v673_v25 = vadd.f32 %v672_v21, %v671_v20  ;;  %v1067_v26 = vadd.f32 %v1066_v23, %v1065_v18  ;;  %v1068_v27 = vpop.f32.mrb[6].mxu1  ;;  %v1005_v28 = vpop.f32.mrb[7].mxu0 }
 0x102   :  { %v519_v29 = vadd.f32 %v1003_v22, %v1414_v2  ;;  %v1006_v30 = vadd.f32 %v1005_v28, %v1004_v24  ;;  %v1069_v31 = vpop.f32.mrb[7].mxu1 }
 0x103   :  { %v1070_v32 = vadd.f32 %v1069_v31, %v1068_v27 }
 0x104   :  { %v1427_v33 = vadd.f32 %v1067_v26, %v519_v29  ;;  %v522_v34 = vadd.f32 %v1006_v30, %v1414_v2 }
 0x106   :  { %v674_v35 = vsel %vm1680_vm0, %v1427_v33, 0.0  ;;  %v1432_v36 = vadd.f32 %v1070_v32, %v522_v34  ;;  %v1007_v37 = vpop.f32.mrb[8].mxu0 }
 0x107   :  { %v675_v38 = vadd.f32 %v674_v35, %v673_v25  ;;  %v1071_v39 = vpop.f32.mrb[8].mxu1  ;;  %v1008_v40 = vpop.f32.mrb[9].mxu0 }
 0x108   :  { %v676_v41 = vsel %vm1680_vm0, %v1432_v36, 0.0  ;;  %v1009_v42 = vadd.f32 %v1008_v40, %v1007_v37  ;;  %v1072_v43 = vpop.f32.mrb[9].mxu1  ;;  %v1010_v44 = vpop.f32.mrb[10].mxu0 }
 0x109   :  { %v677_v45 = vadd.f32 %v676_v41, %v675_v38  ;;  %v1073_v46 = vadd.f32 %v1072_v43, %v1071_v39  ;;  %v1074_v47 = vpop.f32.mrb[10].mxu1  ;;  %v1011_v48 = vpop.f32.mrb[11].mxu0 }
 0x10a   :  { %v527_v49 = vadd.f32 %v1009_v42, %v1414_v2  ;;  %v1012_v50 = vadd.f32 %v1011_v48, %v1010_v44  ;;  %v1075_v51 = vpop.f32.mrb[11].mxu1 }
 0x10b   :  { %v1076_v52 = vadd.f32 %v1075_v51, %v1074_v47 }
 0x10c   :  { %v1437_v53 = vadd.f32 %v1073_v46, %v527_v49  ;;  %v530_v54 = vadd.f32 %v1012_v50, %v1414_v2 }
 0x10e   :  { %v678_v55 = vsel %vm1680_vm0, %v1437_v53, 0.0  ;;  %v1442_v56 = vadd.f32 %v1076_v52, %v530_v54  ;;  %v1013_v57 = vpop.f32.mrb[12].mxu0 }
 0x10f   :  { %v679_v58 = vadd.f32 %v678_v55, %v677_v45  ;;  %v1077_v59 = vpop.f32.mrb[12].mxu1  ;;  %v1014_v60 = vpop.f32.mrb[13].mxu0 }
 0x110   :  { %v680_v61 = vsel %vm1680_vm0, %v1442_v56, 0.0  ;;  %v1015_v62 = vadd.f32 %v1014_v60, %v1013_v57  ;;  %v1078_v63 = vpop.f32.mrb[13].mxu1  ;;  %v1016_v0 = vpop.f32.mrb[14].mxu0 }
 0x111   :  { %v681_v1 = vadd.f32 %v680_v61, %v679_v58  ;;  %v1079_v3 = vadd.f32 %v1078_v63, %v1077_v59  ;;  %v1080_v4 = vpop.f32.mrb[14].mxu1  ;;  %v1017_v5 = vpop.f32.mrb[15].mxu0 }
 0x112   :  { %v535_v6 = vadd.f32 %v1015_v62, %v1414_v2  ;;  %v1018_v7 = vadd.f32 %v1017_v5, %v1016_v0  ;;  %v1081_v8 = vpop.f32.mrb[15].mxu1 }
 0x113   :  { %v1082_v9 = vadd.f32 %v1081_v8, %v1080_v4 }
 0x114   :  { %v1447_v10 = vadd.f32 %v1079_v3, %v535_v6  ;;  %v538_v11 = vadd.f32 %v1018_v7, %v1414_v2 }
 0x116   :  { %v682_v12 = vsel %vm1680_vm0, %v1447_v10, 0.0  ;;  %v1452_v13 = vadd.f32 %v1082_v9, %v538_v11  ;;  %v1019_v15 = vpop.f32.mrb[16].mxu0 }
 0x117   :  { %v683_v17 = vadd.f32 %v682_v12, %v681_v1  ;;  %v1083_v18 = vpop.f32.mrb[16].mxu1  ;;  %v1020_v19 = vpop.f32.mrb[17].mxu0 }
 0x118   :  { %v684_v20 = vsel %vm1680_vm0, %v1452_v13, 0.0  ;;  %v1021_v21 = vadd.f32 %v1020_v19, %v1019_v15  ;;  %v1084_v22 = vpop.f32.mrb[17].mxu1  ;;  %v1022_v23 = vpop.f32.mrb[18].mxu0 }
 0x119   :  { %v685_v24 = vadd.f32 %v684_v20, %v683_v17  ;;  %v1085_v25 = vadd.f32 %v1084_v22, %v1083_v18  ;;  %v1086_v26 = vpop.f32.mrb[18].mxu1  ;;  %v1023_v27 = vpop.f32.mrb[19].mxu0 }
 0x11a   :  { %v543_v28 = vadd.f32 %v1021_v21, %v1414_v2  ;;  %v1024_v29 = vadd.f32 %v1023_v27, %v1022_v23  ;;  %v1087_v30 = vpop.f32.mrb[19].mxu1 }
 0x11b   :  { %v1088_v31 = vadd.f32 %v1087_v30, %v1086_v26 }
 0x11c   :  { %v1457_v32 = vadd.f32 %v1085_v25, %v543_v28  ;;  %v546_v34 = vadd.f32 %v1024_v29, %v1414_v2 }
 0x11e   :  { %v686_v35 = vsel %vm1680_vm0, %v1457_v32, 0.0  ;;  %v1462_v37 = vadd.f32 %v1088_v31, %v546_v34  ;;  %v1025_v38 = vpop.f32.mrb[20].mxu0 }
 0x11f   :  { %v687_v39 = vadd.f32 %v686_v35, %v685_v24  ;;  %v1089_v40 = vpop.f32.mrb[20].mxu1  ;;  %v1026_v41 = vpop.f32.mrb[21].mxu0 }
 0x120   :  { %v688_v42 = vsel %vm1680_vm0, %v1462_v37, 0.0  ;;  %v1027_v43 = vadd.f32 %v1026_v41, %v1025_v38  ;;  %v1090_v44 = vpop.f32.mrb[21].mxu1  ;;  %v1028_v45 = vpop.f32.mrb[22].mxu0 }
 0x121   :  { %v689_v46 = vadd.f32 %v688_v42, %v687_v39  ;;  %v1091_v47 = vadd.f32 %v1090_v44, %v1089_v40  ;;  %v1092_v48 = vpop.f32.mrb[22].mxu1  ;;  %v1029_v49 = vpop.f32.mrb[23].mxu0 }
 0x122   :  { %v551_v50 = vadd.f32 %v1027_v43, %v1414_v2  ;;  %v1030_v51 = vadd.f32 %v1029_v49, %v1028_v45  ;;  %v1093_v52 = vpop.f32.mrb[23].mxu1 }
 0x123   :  { %v1094_v54 = vadd.f32 %v1093_v52, %v1092_v48 }
 0x124   :  { %v1467_v55 = vadd.f32 %v1091_v47, %v551_v50  ;;  %v554_v57 = vadd.f32 %v1030_v51, %v1414_v2 }
 0x126   :  { %v690_v58 = vsel %vm1680_vm0, %v1467_v55, 0.0  ;;  %v651_v59 = vadd.f32 %v1094_v54, %v554_v57  ;;  %v1031_v60 = vpop.f32.mrb[24].mxu0 }
 0x127   :  { %v691_v61 = vadd.f32 %v690_v58, %v689_v46  ;;  %v1095_v62 = vpop.f32.mrb[24].mxu1  ;;  %v1032_v63 = vpop.f32.mrb[25].mxu0 }
 0x128   :  { %v692_v0 = vsel %vm1680_vm0, %v651_v59, 0.0  ;;  %v1033_v1 = vadd.f32 %v1032_v63, %v1031_v60  ;;  %v1096_v3 = vpop.f32.mrb[25].mxu1  ;;  %v1034_v4 = vpop.f32.mrb[26].mxu0 }
 0x129   :  { %v693_v5 = vadd.f32 %v692_v0, %v691_v61  ;;  %v1097_v6 = vadd.f32 %v1096_v3, %v1095_v62  ;;  %v1098_v7 = vpop.f32.mrb[26].mxu1  ;;  %v1035_v8 = vpop.f32.mrb[27].mxu0 }
 0x12a   :  { %v559_v9 = vadd.f32 %v1033_v1, %v1414_v2  ;;  %v1036_v11 = vadd.f32 %v1035_v8, %v1034_v4  ;;  %v1099_v12 = vpop.f32.mrb[27].mxu1 }
 0x12b   :  { %v1100_v15 = vadd.f32 %v1099_v12, %v1098_v7 }
 0x12c   :  { %v656_v17 = vadd.f32 %v1097_v6, %v559_v9  ;;  %v562_v18 = vadd.f32 %v1036_v11, %v1414_v2 }
 0x12e   :  { %v694_v19 = vsel %vm1680_vm0, %v656_v17, 0.0  ;;  %v659_v20 = vadd.f32 %v1100_v15, %v562_v18  ;;  %v1037_v21 = vpop.f32.mrb[28].mxu0 }
 0x12f   :  { %v695_v22 = vadd.f32 %v694_v19, %v693_v5  ;;  %v1101_v23 = vpop.f32.mrb[28].mxu1  ;;  %v1038_v24 = vpop.f32.mrb[29].mxu0 }
 0x130   :  { %v696_v25 = vsel %vm1680_vm0, %v659_v20, 0.0  ;;  %v1039_v26 = vadd.f32 %v1038_v24, %v1037_v21  ;;  %v1102_v27 = vpop.f32.mrb[29].mxu1  ;;  %v1040_v28 = vpop.f32.mrb[30].mxu0 }
 0x131   :  { %v697_v29 = vadd.f32 %v696_v25, %v695_v22  ;;  %v1103_v30 = vadd.f32 %v1102_v27, %v1101_v23  ;;  %v1104_v31 = vpop.f32.mrb[30].mxu1  ;;  %v1041_v34 = vpop.f32.mrb[31].mxu0 }
 0x132   :  { %v567_v35 = vadd.f32 %v1039_v26, %v1414_v2  ;;  %v1042_v38 = vadd.f32 %v1041_v34, %v1040_v28  ;;  %v1105_v39 = vpop.f32.mrb[31].mxu1 }
 0x133   :  { %v1106_v40 = vadd.f32 %v1105_v39, %v1104_v31 }
 0x134   :  { %v664_v41 = vadd.f32 %v1103_v30, %v567_v35  ;;  %v570_v42 = vadd.f32 %v1042_v38, %v1414_v2 }
 0x136   :  { %v698_v43 = vsel %vm1680_vm0, %v664_v41, 0.0  ;;  %v667_v44 = vadd.f32 %v1106_v40, %v570_v42 }
 0x137   :  { %v699_v45 = vadd.f32 %v698_v43, %v697_v29 }
 0x138   :  { %v700_v46 = vsel %vm1680_vm0, %v667_v44, 0.0 }
 0x139   :  { %v701_v47 = vadd.f32 %v700_v46, %v699_v45 }
 0x13b   :  { %v702_v48 = vrot.slane %v701_v47, 4 }
 0x13d   :  { %v703_v49 = vadd.f32 %v702_v48, %v701_v47 }
 0x13f   :  { %v704_v50 = vrot.slane %v703_v49, 2 }
 0x141   :  { %v705_v51 = vadd.f32 %v704_v50, %v703_v49 }
 0x143   :  { %v706_v52 = vrot.slane %v705_v51, 1 }
 0x145   :  { %v707_v54 = vadd.f32 %v706_v52, %v705_v51 }
 0x147   :  { %v709_v57 = vmul.f32 0.0078125, %v707_v54 }
 0x149   :  { %v1482_v58 = vsub.f32 %v1417_v14, %v709_v57  ;;  %v1485_v60 = vsub.f32 %v1420_v16, %v709_v57  ;;  %v1488_v2 = vsub.f32 %v1427_v33, %v709_v57  ;;  %v1491_v61 = vsub.f32 %v1432_v36, %v709_v57 }
 0x14a   :  { %v1494_v62 = vsub.f32 %v1437_v53, %v709_v57  ;;  %v1497_v63 = vsub.f32 %v1442_v56, %v709_v57  ;;  %v1500_v0 = vsub.f32 %v1447_v10, %v709_v57  ;;  %v1503_v14 = vsub.f32 %v1452_v13, %v709_v57 }
 0x14b   :  { %v1506_v16 = vsub.f32 %v1457_v32, %v709_v57  ;;  %v1509_v33 = vsub.f32 %v1462_v37, %v709_v57  ;;  %v1512_v36 = vsub.f32 %v1467_v55, %v709_v57  ;;  %v1514_v53 = vsub.f32 %v651_v59, %v709_v57 }
 0x14c   :  { %v1516_v1 = vsub.f32 %v656_v17, %v709_v57  ;;  %v1518_v56 = vsub.f32 %v659_v20, %v709_v57  ;;  %v1520_v10 = vsub.f32 %v664_v41, %v709_v57  ;;  %v1522_v3 = vsub.f32 %v667_v44, %v709_v57 }
 0x14d   :  { %v726_v13 = vmul.f32 %v1482_v58, %v1482_v58  ;;  %v727_v32 = vmul.f32 %v1485_v60, %v1485_v60  ;;  %v728_v37 = vmul.f32 %v1488_v2, %v1488_v2  ;;  %v729_v55 = vmul.f32 %v1491_v61, %v1491_v61 }
 0x14e   :  { %v730_v6 = vmul.f32 %v1494_v62, %v1494_v62  ;;  %v731_v9 = vmul.f32 %v1497_v63, %v1497_v63  ;;  %v732_v15 = vmul.f32 %v1500_v0, %v1500_v0  ;;  %v733_v19 = vmul.f32 %v1503_v14, %v1503_v14 }
 0x14f   :  { %v742_v59 = vsel %vm1680_vm0, %v726_v13, 0.0  ;;  %v743_v4 = vsel %vm1680_vm0, %v727_v32, 0.0  ;;  %v745_v7 = vsel %vm1680_vm0, %v728_v37, 0.0  ;;  %v747_v11 = vsel %vm1680_vm0, %v729_v55, 0.0 }
 0x150   :  { %v744_v5 = vadd.f32 %v743_v4, %v742_v59  ;;  %v749_v17 = vsel %vm1680_vm0, %v730_v6, 0.0  ;;  %v751_v20 = vsel %vm1680_vm0, %v731_v9, 0.0  ;;  %v734_v22 = vmul.f32 %v1506_v16, %v1506_v16 }
 0x151   :  { %v753_v23 = vsel %vm1680_vm0, %v732_v15, 0.0  ;;  %v735_v25 = vmul.f32 %v1509_v33, %v1509_v33  ;;  %v755_v26 = vsel %vm1680_vm0, %v733_v19, 0.0  ;;  %v736_v28 = vmul.f32 %v1512_v36, %v1512_v36  ;;  %v977_v19 = vld [vmem:[%s1677_s3] ss:$0 sm:$0xff] }
 0x152   :  { %v746_v8 = vadd.f32 %v745_v7, %v744_v5  ;;  %v757_v29 = vsel %vm1680_vm0, %v734_v22, 0.0  ;;  %v737_v31 = vmul.f32 %v1514_v53, %v1514_v53  ;;  %v738_v38 = vmul.f32 %v1516_v1, %v1516_v1 }
 0x153   :  { %v759_v34 = vsel %vm1680_vm0, %v735_v25, 0.0  ;;  %v761_v39 = vsel %vm1680_vm0, %v736_v28, 0.0  ;;  %v739_v41 = vmul.f32 %v1518_v56, %v1518_v56  ;;  %v740_v44 = vmul.f32 %v1520_v10, %v1520_v10 }
 0x154   :  { %v748_v12 = vadd.f32 %v747_v11, %v746_v8  ;;  %v763_v42 = vsel %vm1680_vm0, %v737_v31, 0.0  ;;  %v765_v45 = vsel %vm1680_vm0, %v738_v38, 0.0  ;;  %v741_v47 = vmul.f32 %v1522_v3, %v1522_v3 }
 0x155   :  { %v767_v48 = vsel %vm1680_vm0, %v739_v41, 0.0  ;;  %v769_v50 = vsel %vm1680_vm0, %v740_v44, 0.0 }
 0x156   :  { %v750_v18 = vadd.f32 %v749_v17, %v748_v12  ;;  %v771_v52 = vsel %vm1680_vm0, %v741_v47, 0.0  ;;  %vm1681_vm0 = vcmask 130048  }
 0x158   :  { %v752_v21 = vadd.f32 %v751_v20, %v750_v18 }
 0x15a   :  { %v754_v24 = vadd.f32 %v753_v23, %v752_v21 }
 0x15c   :  { %v756_v27 = vadd.f32 %v755_v26, %v754_v24 }
 0x15e   :  { %v758_v30 = vadd.f32 %v757_v29, %v756_v27 }
 0x160   :  { %v760_v35 = vadd.f32 %v759_v34, %v758_v30 }
 0x162   :  { %v762_v40 = vadd.f32 %v761_v39, %v760_v35 }
 0x164   :  { %v764_v43 = vadd.f32 %v763_v42, %v762_v40 }
 0x166   :  { %v766_v46 = vadd.f32 %v765_v45, %v764_v43 }
 0x168   :  { %v768_v49 = vadd.f32 %v767_v48, %v766_v46 }
 0x16a   :  { %v770_v51 = vadd.f32 %v769_v50, %v768_v49 }
 0x16c   :  { %v772_v54 = vadd.f32 %v771_v52, %v770_v51 }
 0x16e   :  { %v773_v57 = vrot.slane %v772_v54, 4 }
 0x170   :  { %v774_v13 = vadd.f32 %v773_v57, %v772_v54 }
 0x172   :  { %v775_v32 = vrot.slane %v774_v13, 2 }
 0x174   :  { %v776_v37 = vadd.f32 %v775_v32, %v774_v13 }
 0x176   :  { %v777_v55 = vrot.slane %v776_v37, 1 }
 0x178   :  { %v778_v59 = vadd.f32 %v777_v55, %v776_v37 }
 0x17a   :  { %v779_v4 = vmul.f32 0.0078125, %v778_v59 }
 0x17c   :  { %v780_v5 = vadd.f32 1e-05, %v779_v4 }
 0x17e   :  { %1187 = vrsqrt.f32 %v780_v5 }
 0x188   :  { %v1188_v6 = vpop.eup %1187 }
 0x189   :  { %v782_v7 = vmul.f32 %v1188_v6, %v1482_v58  ;;  %v783_v8 = vmul.f32 %v1188_v6, %v1485_v60  ;;  %v784_v9 = vmul.f32 %v1188_v6, %v1488_v2  ;;  %v785_v11 = vmul.f32 %v1188_v6, %v1491_v61 }
 0x18a   :  { %v786_v12 = vmul.f32 %v1188_v6, %v1494_v62  ;;  %v787_v15 = vmul.f32 %v1188_v6, %v1497_v63  ;;  %v788_v17 = vmul.f32 %v1188_v6, %v1500_v0  ;;  %v789_v18 = vmul.f32 %v1188_v6, %v1503_v14 }
 0x18b   :  { %v790_v58 = vmul.f32 %v1188_v6, %v1506_v16  ;;  %v791_v60 = vmul.f32 %v1188_v6, %v1509_v33  ;;  %v792_v2 = vmul.f32 %v1188_v6, %v1512_v36  ;;  %v793_v61 = vmul.f32 %v1188_v6, %v1514_v53  ;;  %v978_v36 = vld [vmem:[%s1678_s4] ss:$0 sm:$0xff] }
 0x18c   :  { %v794_v62 = vmul.f32 %v1188_v6, %v1516_v1  ;;  %v795_v63 = vmul.f32 %v1188_v6, %v1518_v56  ;;  %v796_v0 = vmul.f32 %v1188_v6, %v1520_v10  ;;  %v797_v14 = vmul.f32 %v1188_v6, %v1522_v3 }
 0x18d   :  { %v805_v20 = vmul.f32 %v977_v19, %v782_v7  ;;  %v806_v21 = vmul.f32 %v977_v19, %v783_v8  ;;  %v807_v22 = vmul.f32 %v977_v19, %v784_v9  ;;  %v808_v23 = vmul.f32 %v977_v19, %v785_v11 }
 0x18e   :  { %v809_v24 = vmul.f32 %v977_v19, %v786_v12  ;;  %v810_v16 = vmul.f32 %v977_v19, %v787_v15  ;;  %v811_v25 = vmul.f32 %v977_v19, %v788_v17  ;;  %v812_v33 = vmul.f32 %v977_v19, %v789_v18 }
 0x18f   :  { %v813_v53 = vmul.f32 %v977_v19, %v790_v58  ;;  %v814_v1 = vmul.f32 %v977_v19, %v791_v60  ;;  %v815_v26 = vmul.f32 %v977_v19, %v792_v2  ;;  %v816_v56 = vmul.f32 %v977_v19, %v793_v61 }
 0x190   :  { %v817_v27 = vmul.f32 %v977_v19, %v794_v62  ;;  %v818_v10 = vmul.f32 %v977_v19, %v795_v63  ;;  %v819_v28 = vmul.f32 %v977_v19, %v796_v0  ;;  %v820_v3 = vmul.f32 %v977_v19, %v797_v14 }
 0x191   :  { %v828_v29 = vadd.f32 %v978_v36, %v805_v20  ;;  %v829_v30 = vadd.f32 %v978_v36, %v806_v21  ;;  %v830_v31 = vadd.f32 %v978_v36, %v807_v22  ;;  %v831_v34 = vadd.f32 %v978_v36, %v808_v23 }
 0x192   :  { %v832_v35 = vadd.f32 %v978_v36, %v809_v24  ;;  %v833_v38 = vadd.f32 %v978_v36, %v810_v16  ;;  %v834_v39 = vadd.f32 %v978_v36, %v811_v25  ;;  %v835_v40 = vadd.f32 %v978_v36, %v812_v33 }
 0x193   :  { %v836_v41 = vadd.f32 %v978_v36, %v813_v53  ;;  %v837_v42 = vadd.f32 %v978_v36, %v814_v1  ;;  %v838_v43 = vadd.f32 %v978_v36, %v815_v26  ;;  %v839_v44 = vadd.f32 %v978_v36, %v816_v56 }
 0x194   :  { %v840_v45 = vadd.f32 %v978_v36, %v817_v27  ;;  %v841_v46 = vadd.f32 %v978_v36, %v818_v10  ;;  %v842_v47 = vadd.f32 %v978_v36, %v819_v28  ;;  %v843_v48 = vadd.f32 %v978_v36, %v820_v3 }
 0x195   :  { %vm844_vm1 = vcmp.ge.f32.partialorder %v828_v29, 0.0  ;;  %vm845_vm2 = vcmp.ge.f32.partialorder %v829_v30, 0.0  ;;  %vm846_vm3 = vcmp.ge.f32.partialorder %v830_v31, 0.0  ;;  %vm847_vm4 = vcmp.ge.f32.partialorder %v831_v34, 0.0 }
 0x196   :  { %vm848_vm5 = vcmp.ge.f32.partialorder %v832_v35, 0.0  ;;  %vm849_vm6 = vcmp.ge.f32.partialorder %v833_v38, 0.0  ;;  %vm850_vm7 = vcmp.ge.f32.partialorder %v834_v39, 0.0  ;;  %vm851_vm8 = vcmp.ge.f32.partialorder %v835_v40, 0.0 }
 0x197   :  { %vm852_vm9 = vcmp.ge.f32.partialorder %v836_v41, 0.0  ;;  %vm853_vm10 = vcmp.ge.f32.partialorder %v837_v42, 0.0  ;;  %vm854_vm11 = vcmp.ge.f32.partialorder %v838_v43, 0.0  ;;  %vm855_vm12 = vcmp.ge.f32.partialorder %v839_v44, 0.0 }
 0x198   :  { %vm856_vm13 = vcmp.ge.f32.partialorder %v840_v45, 0.0  ;;  %vm857_vm14 = vcmp.ge.f32.partialorder %v841_v46, 0.0  ;;  %vm858_vm15 = vcmp.ge.f32.partialorder %v842_v47, 0.0  ;;  %v860_v49 = vmul.f32 0.0, %v828_v29 }
 0x199   :  { %v861_v50 = vmul.f32 0.0, %v829_v30  ;;  %v862_v51 = vmul.f32 0.0, %v830_v31  ;;  %v863_v52 = vmul.f32 0.0, %v831_v34  ;;  %v864_v54 = vmul.f32 0.0, %v832_v35 }
 0x19a   :  { %v865_v57 = vmul.f32 0.0, %v833_v38  ;;  %v866_v13 = vmul.f32 0.0, %v834_v39  ;;  %v867_v32 = vmul.f32 0.0, %v835_v40  ;;  %v868_v37 = vmul.f32 0.0, %v836_v41 }
 0x19b   :  { %v869_v55 = vmul.f32 0.0, %v837_v42  ;;  %v870_v59 = vmul.f32 0.0, %v838_v43  ;;  %v871_v4 = vmul.f32 0.0, %v839_v44  ;;  %v872_v5 = vmul.f32 0.0, %v840_v45 }
 0x19c   :  { %v873_v6 = vmul.f32 0.0, %v841_v46  ;;  %v874_v7 = vmul.f32 0.0, %v842_v47  ;;  %v875_v8 = vmul.f32 0.0, %v843_v48  ;;  %v876_v9 = vsel %vm844_vm1, %v828_v29, %v860_v49  ;;  %vm1682_vm1 = vmmov %vm1681_vm0 }
 0x19d   :  { %v877_v11 = vsel %vm845_vm2, %v829_v30, %v861_v50  ;;  %v878_v12 = vsel %vm846_vm3, %v830_v31, %v862_v51  ;;  %v879_v15 = vsel %vm847_vm4, %v831_v34, %v863_v52  ;;  %v880_v17 = vsel %vm848_vm5, %v832_v35, %v864_v54  ;;  %892 = vst.msk [vmem:[%s1679_s5] sm:$0xff] %vm1681_vm0, %v876_v9  ;;  %vm1683_vm2 = vmmov %vm1681_vm0 }
 0x19e   :  { %v881_v18 = vsel %vm849_vm6, %v833_v38, %v865_v57  ;;  %v882_v19 = vsel %vm850_vm7, %v834_v39, %v866_v13  ;;  %v883_v58 = vsel %vm851_vm8, %v835_v40, %v867_v32  ;;  %893 = vst.msk [vmem:[%s1679_s5 + $0x8] sm:$0xff] %vm1682_vm1, %v877_v11  ;;  %vm1684_vm3 = vmmov %vm1681_vm0  ;;  %v884_v60 = vsel %vm852_vm9, %v836_v41, %v868_v37 }
 0x19f   :  { %894 = vst.msk [vmem:[%s1679_s5 + $0x10] sm:$0xff] %vm1683_vm2, %v878_v12  ;;  %v885_v2 = vsel %vm853_vm10, %v837_v42, %v869_v55  ;;  %v886_v61 = vsel %vm854_vm11, %v838_v43, %v870_v59  ;;  %v887_v62 = vsel %vm855_vm12, %v839_v44, %v871_v4  ;;  %vm1685_vm4 = vmmov %vm1681_vm0  ;;  %v888_v63 = vsel %vm856_vm13, %v840_v45, %v872_v5 }
 0x1a0   :  { %895 = vst.msk [vmem:[%s1679_s5 + $0x18] sm:$0xff] %vm1684_vm3, %v879_v15  ;;  %vm1686_vm5 = vmmov %vm1681_vm0  ;;  %v889_v0 = vsel %vm857_vm14, %v841_v46, %v873_v6  ;;  %v890_v14 = vsel %vm858_vm15, %v842_v47, %v874_v7  ;;  %vm1688_vm7 = vcmp.ge.f32.partialorder %v843_v48, 0.0 }
 0x1a1   :  { %896 = vst.msk [vmem:[%s1679_s5 + $0x20] sm:$0xff] %vm1681_vm0, %v880_v17  ;;  %vm1687_vm6 = vmmov %vm1681_vm0  ;;  %v891_v20 = vsel %vm1688_vm7, %v843_v48, %v875_v8 }
 0x1a2   :  { %897 = vst.msk [vmem:[%s1679_s5 + $0x28] sm:$0xff] %vm1685_vm4, %v881_v18  ;;  %vm1689_vm8 = vmmov %vm1681_vm0 }
 0x1a3   :  { %898 = vst.msk [vmem:[%s1679_s5 + $0x30] sm:$0xff] %vm1686_vm5, %v882_v19  ;;  %vm1690_vm9 = vmmov %vm1681_vm0 }
 0x1a4   :  { %899 = vst.msk [vmem:[%s1679_s5 + $0x38] sm:$0xff] %vm1687_vm6, %v883_v58  ;;  %vm1691_vm10 = vmmov %vm1681_vm0 }
 0x1a5   :  { %900 = vst.msk [vmem:[%s1679_s5 + $0x40] sm:$0xff] %vm1689_vm8, %v884_v60  ;;  %vm1692_vm11 = vmmov %vm1681_vm0 }
 0x1a6   :  { %901 = vst.msk [vmem:[%s1679_s5 + $0x48] sm:$0xff] %vm1690_vm9, %v885_v2  ;;  %vm1693_vm12 = vmmov %vm1681_vm0 }
 0x1a7   :  { %902 = vst.msk [vmem:[%s1679_s5 + $0x50] sm:$0xff] %vm1691_vm10, %v886_v61  ;;  %vm1694_vm13 = vmmov %vm1681_vm0 }
 0x1a8   :  { %903 = vst.msk [vmem:[%s1679_s5 + $0x58] sm:$0xff] %vm1692_vm11, %v887_v62  ;;  %vm1695_vm14 = vmmov %vm1681_vm0 }
 0x1a9   :  { %904 = vst.msk [vmem:[%s1679_s5 + $0x60] sm:$0xff] %vm1693_vm12, %v888_v63  ;;  %vm1696_vm15 = vmmov %vm1681_vm0 }
 0x1aa   :  { %905 = vst.msk [vmem:[%s1679_s5 + $0x68] sm:$0xff] %vm1694_vm13, %v889_v0 }
 0x1ab   :  { %906 = vst.msk [vmem:[%s1679_s5 + $0x70] sm:$0xff] %vm1695_vm14, %v890_v14 }
 0x1ac   :  { %907 = vst.msk [vmem:[%s1679_s5 + $0x78] sm:$0xff] %vm1696_vm15, %v891_v20 }

// kernel: wgan_forward.7
= control target key start
LH: loop header
LB: loop body
LE: loop exit
PB: predicated region body
PF: predicated region fallthrough
CT: control target
= control target key end

     0   :  { %v1310_v0 = vmov 0   ;;  %vm887_vm0 = vcmask 23552   ;;  %s1928_s1 = inlined_call_operand.vmem [shape: bf16[256,3], index: 1, kind: input, shape index: {}]   ;;  %s1929_s0 = inlined_call_operand.vmem [shape: bf16[512,256], index: 0, kind: input, shape index: {}]   ;;  %s1930_s2 = inlined_call_operand.vmem [shape: f32[1,3], index: 2, kind: input, shape index: {}]   ;;  %s1931_s3 = inlined_call_operand.vmem [shape: f32[512,3], index: 3, kind: output, shape index: {}]  }
   0x1   :  { %534 = vmatprep.subr.bf16.mxu0 %v1310_v0  ;;  %1037 = vmatprep.subr.bf16.mxu1 %v1310_v0  ;;  %v1070_v1 = vld [vmem:[%s1928_s1] sm:$0xff]   ;;  %v1071_v2 = vld [vmem:[%s1928_s1 + $0x8] sm:$0xff]   ;;  %v1072_v3 = vld [vmem:[%s1928_s1 + $0x10] sm:$0xff]  }
   0x2   :  { %535 = vmatpush1.bf16.msra.mxu0 %v1070_v1  ;;  %1053 = vmatpush1.bf16.msra.mxu1 %v1070_v1  ;;  %v1073_v4 = vld [vmem:[%s1928_s1 + $0x18] sm:$0xff]   ;;  %v1074_v5 = vld [vmem:[%s1928_s1 + $0x20] sm:$0xff]   ;;  %v1075_v7 = vld [vmem:[%s1928_s1 + $0x28] sm:$0xff]  }
   0x3   :  { %536 = vmatprep.subr.bf16.mxu0 %v1310_v0  ;;  %1038 = vmatprep.subr.bf16.mxu1 %v1310_v0  ;;  %v1088_v6 = vld [vmem:[%s1929_s0 + $0x4] ss:$8 sps:$4 sm:$0xff]   ;;  %v1076_v9 = vld [vmem:[%s1928_s1 + $0x30] sm:$0xff]   ;;  %v1077_v10 = vld [vmem:[%s1928_s1 + $0x38] sm:$0xff]  }
   0x4   :  { %v1091_v8 = vld [vmem:[%s1929_s0 + $0x104] ss:$8 sps:$4 sm:$0xff]   ;;  %566 = vmatprep.mubr.bf16.mxu0 %v1088_v6  ;;  %v1080_v13 = vld [vmem:[%s1928_s1 + $0x50] sm:$0xff]   ;;  %v1081_v14 = vld [vmem:[%s1928_s1 + $0x58] sm:$0xff]  }
   0x5   :  { %694 = vmatprep.mubr.bf16.mxu1 %v1091_v8  ;;  %v1078_v11 = vld [vmem:[%s1928_s1 + $0x40] sm:$0xff]   ;;  %v1079_v12 = vld [vmem:[%s1928_s1 + $0x48] sm:$0xff]   ;;  %v1084_v17 = vld [vmem:[%s1928_s1 + $0x70] sm:$0xff]  }
   0x6   :  { %537 = vmatpush1.bf16.msra.mxu0 %v1071_v2  ;;  %1054 = vmatpush1.bf16.msra.mxu1 %v1071_v2  ;;  %v1082_v15 = vld [vmem:[%s1928_s1 + $0x60] sm:$0xff]   ;;  %v1083_v16 = vld [vmem:[%s1928_s1 + $0x68] sm:$0xff]   ;;  %v1085_v18 = vld [vmem:[%s1928_s1 + $0x78] sm:$0xff]  }
   0x7   :  { %538 = vmatprep.subr.bf16.mxu0 %v1310_v0  ;;  %1039 = vmatprep.subr.bf16.mxu1 %v1310_v0  ;;  %v1086_v19 = vld [vmem:[%s1929_s0] ss:$8 sps:$4 sm:$0xff]   ;;  %v1092_v21 = vld [vmem:[%s1929_s0 + $0x14] ss:$8 sps:$4 sm:$0xff]   ;;  %v1096_v23 = vld [vmem:[%s1929_s0 + $0x10] ss:$8 sps:$4 sm:$0xff]  }
   0x8   :  { %v1089_v20 = vld [vmem:[%s1929_s0 + $0x100] ss:$8 sps:$4 sm:$0xff]   ;;  %v1094_v22 = vld [vmem:[%s1929_s0 + $0x114] ss:$8 sps:$4 sm:$0xff]   ;;  %v1097_v24 = vld [vmem:[%s1929_s0 + $0x110] ss:$8 sps:$4 sm:$0xff]  }
   0x9   :  { %v1098_v25 = vld [vmem:[%s1929_s0 + $0x24] ss:$8 sps:$4 sm:$0xff]   ;;  %v1102_v27 = vld [vmem:[%s1929_s0 + $0x20] ss:$8 sps:$4 sm:$0xff]   ;;  %v1104_v29 = vld [vmem:[%s1929_s0 + $0x34] ss:$8 sps:$4 sm:$0xff]  }
   0xa   :  { %539 = vmatpush1.bf16.msra.mxu0 %v1072_v3  ;;  %1055 = vmatpush1.bf16.msra.mxu1 %v1072_v3  ;;  %v1100_v26 = vld [vmem:[%s1929_s0 + $0x124] ss:$8 sps:$4 sm:$0xff]   ;;  %v1103_v28 = vld [vmem:[%s1929_s0 + $0x120] ss:$8 sps:$4 sm:$0xff]   ;;  %v1106_v30 = vld [vmem:[%s1929_s0 + $0x134] ss:$8 sps:$4 sm:$0xff]  }
   0xb   :  { %540 = vmatprep.subr.bf16.mxu0 %v1310_v0  ;;  %1040 = vmatprep.subr.bf16.mxu1 %v1310_v0  ;;  %v1108_v31 = vld [vmem:[%s1929_s0 + $0x30] ss:$8 sps:$4 sm:$0xff]   ;;  %v1110_v33 = vld [vmem:[%s1929_s0 + $0x44] ss:$8 sps:$4 sm:$0xff]   ;;  %v1114_v35 = vld [vmem:[%s1929_s0 + $0x40] ss:$8 sps:$4 sm:$0xff]  }
   0xc   :  { %v1109_v32 = vld [vmem:[%s1929_s0 + $0x130] ss:$8 sps:$4 sm:$0xff]   ;;  %v1112_v34 = vld [vmem:[%s1929_s0 + $0x144] ss:$8 sps:$4 sm:$0xff]   ;;  %v1115_v36 = vld [vmem:[%s1929_s0 + $0x140] ss:$8 sps:$4 sm:$0xff]  }
   0xd   :  { %v1116_v37 = vld [vmem:[%s1929_s0 + $0x54] ss:$8 sps:$4 sm:$0xff]   ;;  %v1120_v39 = vld [vmem:[%s1929_s0 + $0x50] ss:$8 sps:$4 sm:$0xff]   ;;  %v1122_v41 = vld [vmem:[%s1929_s0 + $0x64] ss:$8 sps:$4 sm:$0xff]  }
   0xe   :  { %541 = vmatpush1.bf16.msra.mxu0 %v1073_v4  ;;  %1056 = vmatpush1.bf16.msra.mxu1 %v1073_v4  ;;  %v1118_v38 = vld [vmem:[%s1929_s0 + $0x154] ss:$8 sps:$4 sm:$0xff]   ;;  %v1121_v40 = vld [vmem:[%s1929_s0 + $0x150] ss:$8 sps:$4 sm:$0xff]   ;;  %v1124_v42 = vld [vmem:[%s1929_s0 + $0x164] ss:$8 sps:$4 sm:$0xff]  }
   0xf   :  { %542 = vmatprep.subr.bf16.mxu0 %v1310_v0  ;;  %1041 = vmatprep.subr.bf16.mxu1 %v1310_v0  ;;  %v1126_v43 = vld [vmem:[%s1929_s0 + $0x60] ss:$8 sps:$4 sm:$0xff]   ;;  %v1128_v45 = vld [vmem:[%s1929_s0 + $0x74] ss:$8 sps:$4 sm:$0xff]   ;;  %v1132_v47 = vld [vmem:[%s1929_s0 + $0x70] ss:$8 sps:$4 sm:$0xff]  }
  0x10   :  { %v1127_v44 = vld [vmem:[%s1929_s0 + $0x160] ss:$8 sps:$4 sm:$0xff]   ;;  %v1130_v46 = vld [vmem:[%s1929_s0 + $0x174] ss:$8 sps:$4 sm:$0xff]   ;;  %v1133_v48 = vld [vmem:[%s1929_s0 + $0x170] ss:$8 sps:$4 sm:$0xff]  }
  0x11   :  { %v1134_v49 = vld [vmem:[%s1929_s0 + $0x84] ss:$8 sps:$4 sm:$0xff]   ;;  %v1138_v51 = vld [vmem:[%s1929_s0 + $0x80] ss:$8 sps:$4 sm:$0xff]   ;;  %v1140_v53 = vld [vmem:[%s1929_s0 + $0x94] ss:$8 sps:$4 sm:$0xff]  }
  0x12   :  { %543 = vmatpush1.bf16.msra.mxu0 %v1074_v5  ;;  %1057 = vmatpush1.bf16.msra.mxu1 %v1074_v5  ;;  %v1136_v50 = vld [vmem:[%s1929_s0 + $0x184] ss:$8 sps:$4 sm:$0xff]   ;;  %v1139_v52 = vld [vmem:[%s1929_s0 + $0x180] ss:$8 sps:$4 sm:$0xff]   ;;  %v1142_v54 = vld [vmem:[%s1929_s0 + $0x194] ss:$8 sps:$4 sm:$0xff]  }
  0x13   :  { %544 = vmatprep.subr.bf16.mxu0 %v1310_v0  ;;  %1042 = vmatprep.subr.bf16.mxu1 %v1310_v0  ;;  %v1144_v55 = vld [vmem:[%s1929_s0 + $0x90] ss:$8 sps:$4 sm:$0xff]   ;;  %v1146_v57 = vld [vmem:[%s1929_s0 + $0xa4] ss:$8 sps:$4 sm:$0xff]   ;;  %v1150_v59 = vld [vmem:[%s1929_s0 + $0xa0] ss:$8 sps:$4 sm:$0xff]  }
  0x14   :  { %v1145_v56 = vld [vmem:[%s1929_s0 + $0x190] ss:$8 sps:$4 sm:$0xff]   ;;  %v1148_v58 = vld [vmem:[%s1929_s0 + $0x1a4] ss:$8 sps:$4 sm:$0xff]   ;;  %v1151_v60 = vld [vmem:[%s1929_s0 + $0x1a0] ss:$8 sps:$4 sm:$0xff]  }
  0x15   :  { %v1152_v61 = vld [vmem:[%s1929_s0 + $0xb4] ss:$8 sps:$4 sm:$0xff]   ;;  %v1156_v63 = vld [vmem:[%s1929_s0 + $0xb0] ss:$8 sps:$4 sm:$0xff]   ;;  %v1158_v1 = vld [vmem:[%s1929_s0 + $0xc4] ss:$8 sps:$4 sm:$0xff]  }
  0x16   :  { %545 = vmatpush1.bf16.msra.mxu0 %v1075_v7  ;;  %1058 = vmatpush1.bf16.msra.mxu1 %v1075_v7  ;;  %v1154_v62 = vld [vmem:[%s1929_s0 + $0x1b4] ss:$8 sps:$4 sm:$0xff]   ;;  %v1160_v2 = vld [vmem:[%s1929_s0 + $0x1c4] ss:$8 sps:$4 sm:$0xff]   ;;  %v1162_v3 = vld [vmem:[%s1929_s0 + $0xc0] ss:$8 sps:$4 sm:$0xff]  }
  0x17   :  { %546 = vmatprep.subr.bf16.mxu0 %v1310_v0  ;;  %1043 = vmatprep.subr.bf16.mxu1 %v1310_v0  ;;  %v1163_v4 = vld [vmem:[%s1929_s0 + $0x1c0] ss:$8 sps:$4 sm:$0xff]   ;;  %v1164_v5 = vld [vmem:[%s1929_s0 + $0xd4] ss:$8 sps:$4 sm:$0xff]   ;;  %v1168_v7 = vld [vmem:[%s1929_s0 + $0xd0] ss:$8 sps:$4 sm:$0xff]  }
  0x18   :  { %v1166_v6 = vld [vmem:[%s1929_s0 + $0x1d4] ss:$8 sps:$4 sm:$0xff]   ;;  %v1169_v8 = vld [vmem:[%s1929_s0 + $0x1d0] ss:$8 sps:$4 sm:$0xff]  }
  0x1a   :  { %547 = vmatpush1.bf16.msra.mxu0 %v1076_v9  ;;  %1059 = vmatpush1.bf16.msra.mxu1 %v1076_v9  ;;  %v1170_v9 = vld [vmem:[%s1929_s0 + $0xe4] ss:$8 sps:$4 sm:$0xff]  }
  0x1b   :  { %548 = vmatprep.subr.bf16.mxu0 %v1310_v0  ;;  %1044 = vmatprep.subr.bf16.mxu1 %v1310_v0 }
  0x1e   :  { %549 = vmatpush1.bf16.msra.mxu0 %v1077_v10  ;;  %1060 = vmatpush1.bf16.msra.mxu1 %v1077_v10  ;;  %v1172_v10 = vld [vmem:[%s1929_s0 + $0x1e4] ss:$8 sps:$4 sm:$0xff]  }
  0x1f   :  { %550 = vmatprep.subr.bf16.mxu0 %v1310_v0  ;;  %1045 = vmatprep.subr.bf16.mxu1 %v1310_v0 }
  0x22   :  { %551 = vmatpush1.bf16.msra.mxu0 %v1078_v11  ;;  %1061 = vmatpush1.bf16.msra.mxu1 %v1078_v11  ;;  %v1174_v11 = vld [vmem:[%s1929_s0 + $0xe0] ss:$8 sps:$4 sm:$0xff]  }
  0x23   :  { %552 = vmatprep.subr.bf16.mxu0 %v1310_v0  ;;  %1046 = vmatprep.subr.bf16.mxu1 %v1310_v0 }
  0x26   :  { %553 = vmatpush1.bf16.msra.mxu0 %v1079_v12  ;;  %1062 = vmatpush1.bf16.msra.mxu1 %v1079_v12  ;;  %v1175_v12 = vld [vmem:[%s1929_s0 + $0x1e0] ss:$8 sps:$4 sm:$0xff]  }
  0x27   :  { %554 = vmatprep.subr.bf16.mxu0 %v1310_v0  ;;  %1047 = vmatprep.subr.bf16.mxu1 %v1310_v0 }
  0x2a   :  { %555 = vmatpush1.bf16.msra.mxu0 %v1080_v13  ;;  %1063 = vmatpush1.bf16.msra.mxu1 %v1080_v13  ;;  %v1176_v13 = vld [vmem:[%s1929_s0 + $0xf4] ss:$8 sps:$4 sm:$0xff]  }
  0x2b   :  { %556 = vmatprep.subr.bf16.mxu0 %v1310_v0  ;;  %1048 = vmatprep.subr.bf16.mxu1 %v1310_v0 }
  0x2e   :  { %557 = vmatpush1.bf16.msra.mxu0 %v1081_v14  ;;  %1064 = vmatpush1.bf16.msra.mxu1 %v1081_v14  ;;  %v1178_v14 = vld [vmem:[%s1929_s0 + $0x1f4] ss:$8 sps:$4 sm:$0xff]  }
  0x2f   :  { %558 = vmatprep.subr.bf16.mxu0 %v1310_v0  ;;  %1049 = vmatprep.subr.bf16.mxu1 %v1310_v0 }
  0x32   :  { %559 = vmatpush1.bf16.msra.mxu0 %v1082_v15  ;;  %1065 = vmatpush1.bf16.msra.mxu1 %v1082_v15  ;;  %v1180_v15 = vld [vmem:[%s1929_s0 + $0xf0] ss:$8 sps:$4 sm:$0xff]  }
  0x33   :  { %560 = vmatprep.subr.bf16.mxu0 %v1310_v0  ;;  %1050 = vmatprep.subr.bf16.mxu1 %v1310_v0 }
  0x36   :  { %561 = vmatpush1.bf16.msra.mxu0 %v1083_v16  ;;  %1066 = vmatpush1.bf16.msra.mxu1 %v1083_v16  ;;  %v1181_v16 = vld [vmem:[%s1929_s0 + $0x1f0] ss:$8 sps:$4 sm:$0xff]  }
  0x37   :  { %562 = vmatprep.subr.bf16.mxu0 %v1310_v0  ;;  %1051 = vmatprep.subr.bf16.mxu1 %v1310_v0 }
  0x3a   :  { %563 = vmatpush1.bf16.msra.mxu0 %v1084_v17  ;;  %1067 = vmatpush1.bf16.msra.mxu1 %v1084_v17  ;;  %v1606_v17 = vld [vmem:[%s1930_s2] ss:$0 sm:$0xff] }
  0x3b   :  { %564 = vmatprep.subr.bf16.mxu0 %v1310_v0  ;;  %1052 = vmatprep.subr.bf16.mxu1 %v1310_v0  ;;  %v1157_v0 = vld [vmem:[%s1929_s0 + $0x1b0] ss:$8 sps:$4 sm:$0xff]  }
  0x3e   :  { %565 = vmatpush1.bf16.msra.mxu0 %v1085_v18  ;;  %1068 = vmatpush1.bf16.msra.mxu1 %v1085_v18 }
  0x41   :  { %567 = vmatmul.mubr.bf16.vlgmr.msra.gmra.mrb[0].mxu0 %v1086_v19  ;;  %695 = vmatmul.mubr.bf16.vlgmr.msra.gmra.mrb[0].mxu1 %v1089_v20 }
  0x42   :  { %574 = vmatprep.mubr.bf16.mxu0 %v1092_v21  ;;  %702 = vmatprep.mubr.bf16.mxu1 %v1094_v22 }
  0x49   :  { %575 = vmatmul.mubr.bf16.gmra.mrb[4].mxu0 %v1096_v23  ;;  %703 = vmatmul.mubr.bf16.gmra.mrb[4].mxu1 %v1097_v24 }
  0x4a   :  { %582 = vmatprep.mubr.bf16.mxu0 %v1098_v25  ;;  %710 = vmatprep.mubr.bf16.mxu1 %v1100_v26 }
  0x51   :  { %583 = vmatmul.mubr.bf16.gmra.mrb[8].mxu0 %v1102_v27  ;;  %711 = vmatmul.mubr.bf16.gmra.mrb[8].mxu1 %v1103_v28 }
  0x52   :  { %590 = vmatprep.mubr.bf16.mxu0 %v1104_v29  ;;  %718 = vmatprep.mubr.bf16.mxu1 %v1106_v30 }
  0x59   :  { %591 = vmatmul.mubr.bf16.gmra.mrb[12].mxu0 %v1108_v31  ;;  %719 = vmatmul.mubr.bf16.gmra.mrb[12].mxu1 %v1109_v32 }
  0x5a   :  { %598 = vmatprep.mubr.bf16.mxu0 %v1110_v33  ;;  %726 = vmatprep.mubr.bf16.mxu1 %v1112_v34 }
  0x61   :  { %599 = vmatmul.mubr.bf16.gmra.mrb[16].mxu0 %v1114_v35  ;;  %727 = vmatmul.mubr.bf16.gmra.mrb[16].mxu1 %v1115_v36 }
  0x62   :  { %606 = vmatprep.mubr.bf16.mxu0 %v1116_v37  ;;  %734 = vmatprep.mubr.bf16.mxu1 %v1118_v38 }
  0x69   :  { %607 = vmatmul.mubr.bf16.gmra.mrb[20].mxu0 %v1120_v39  ;;  %735 = vmatmul.mubr.bf16.gmra.mrb[20].mxu1 %v1121_v40 }
  0x6a   :  { %614 = vmatprep.mubr.bf16.mxu0 %v1122_v41  ;;  %742 = vmatprep.mubr.bf16.mxu1 %v1124_v42 }
  0x71   :  { %615 = vmatmul.mubr.bf16.gmra.mrb[24].mxu0 %v1126_v43  ;;  %743 = vmatmul.mubr.bf16.gmra.mrb[24].mxu1 %v1127_v44 }
  0x72   :  { %622 = vmatprep.mubr.bf16.mxu0 %v1128_v45  ;;  %750 = vmatprep.mubr.bf16.mxu1 %v1130_v46 }
  0x79   :  { %623 = vmatmul.mubr.bf16.gmra.mrb[28].mxu0 %v1132_v47  ;;  %751 = vmatmul.mubr.bf16.gmra.mrb[28].mxu1 %v1133_v48 }
  0x7a   :  { %630 = vmatprep.mubr.bf16.mxu0 %v1134_v49  ;;  %758 = vmatprep.mubr.bf16.mxu1 %v1136_v50 }
  0x81   :  { %631 = vmatmul.mubr.bf16.gmra.mrb[32].mxu0 %v1138_v51  ;;  %759 = vmatmul.mubr.bf16.gmra.mrb[32].mxu1 %v1139_v52 }
  0x82   :  { %638 = vmatprep.mubr.bf16.mxu0 %v1140_v53  ;;  %766 = vmatprep.mubr.bf16.mxu1 %v1142_v54 }
  0x89   :  { %639 = vmatmul.mubr.bf16.gmra.mrb[36].mxu0 %v1144_v55  ;;  %767 = vmatmul.mubr.bf16.gmra.mrb[36].mxu1 %v1145_v56 }
  0x8a   :  { %646 = vmatprep.mubr.bf16.mxu0 %v1146_v57  ;;  %774 = vmatprep.mubr.bf16.mxu1 %v1148_v58 }
  0x91   :  { %647 = vmatmul.mubr.bf16.gmra.mrb[40].mxu0 %v1150_v59  ;;  %775 = vmatmul.mubr.bf16.gmra.mrb[40].mxu1 %v1151_v60 }
  0x92   :  { %654 = vmatprep.mubr.bf16.mxu0 %v1152_v61  ;;  %782 = vmatprep.mubr.bf16.mxu1 %v1154_v62 }
  0x99   :  { %655 = vmatmul.mubr.bf16.gmra.mrb[44].mxu0 %v1156_v63  ;;  %783 = vmatmul.mubr.bf16.gmra.mrb[44].mxu1 %v1157_v0 }
  0x9a   :  { %662 = vmatprep.mubr.bf16.mxu0 %v1158_v1  ;;  %790 = vmatprep.mubr.bf16.mxu1 %v1160_v2 }
  0xa1   :  { %663 = vmatmul.mubr.bf16.gmra.mrb[48].mxu0 %v1162_v3  ;;  %791 = vmatmul.mubr.bf16.gmra.mrb[48].mxu1 %v1163_v4 }
  0xa2   :  { %670 = vmatprep.mubr.bf16.mxu0 %v1164_v5  ;;  %798 = vmatprep.mubr.bf16.mxu1 %v1166_v6 }
  0xa9   :  { %671 = vmatmul.mubr.bf16.gmra.mrb[52].mxu0 %v1168_v7  ;;  %799 = vmatmul.mubr.bf16.gmra.mrb[52].mxu1 %v1169_v8 }
  0xaa   :  { %678 = vmatprep.mubr.bf16.mxu0 %v1170_v9  ;;  %806 = vmatprep.mubr.bf16.mxu1 %v1172_v10 }
  0xb1   :  { %679 = vmatmul.mubr.bf16.gmra.mrb[56].mxu0 %v1174_v11  ;;  %807 = vmatmul.mubr.bf16.gmra.mrb[56].mxu1 %v1175_v12 }
  0xb2   :  { %686 = vmatprep.mubr.bf16.mxu0 %v1176_v13  ;;  %814 = vmatprep.mubr.bf16.mxu1 %v1178_v14 }
  0xb9   :  { %687 = vmatmul.mubr.bf16.gmra.mrb[60].mxu0 %v1180_v15  ;;  %815 = vmatmul.mubr.bf16.gmra.mrb[60].mxu1 %v1181_v16 }
 0x114   :  { %v568_v18 = vpop.f32.mrb[0].mxu0  ;;  %v696_v19 = vpop.f32.mrb[0].mxu1 }
 0x115   :  { %v569_v20 = vadd.f32 %v1606_v17, %v568_v18  ;;  %v697_v21 = vadd.f32 %v1606_v17, %v696_v19  ;;  %v570_v22 = vpop.f32.mrb[1].mxu0  ;;  %v698_v23 = vpop.f32.mrb[1].mxu1 }
 0x116   :  { %v571_v24 = vpop.f32.mrb[2].mxu0  ;;  %v699_v25 = vpop.f32.mrb[2].mxu1 }
 0x117   :  { %1182 = vtanh.f32 %v569_v20  ;;  %v572_v26 = vadd.f32 %v1606_v17, %v571_v24  ;;  %v700_v27 = vadd.f32 %v1606_v17, %v699_v25  ;;  %v573_v28 = vpop.f32.mrb[3].mxu0  ;;  %v701_v29 = vpop.f32.mrb[3].mxu1 }
 0x118   :  { %1184 = vtanh.f32 %v697_v21 }
 0x119   :  { %1186 = vtanh.f32 %v572_v26 }
 0x11a   :  { %1188 = vtanh.f32 %v700_v27 }
 0x11c   :  { %v576_v30 = vpop.f32.mrb[4].mxu0  ;;  %v704_v31 = vpop.f32.mrb[4].mxu1 }
 0x11d   :  { %v577_v32 = vadd.f32 %v1606_v17, %v576_v30  ;;  %v705_v33 = vadd.f32 %v1606_v17, %v704_v31  ;;  %v578_v34 = vpop.f32.mrb[5].mxu0  ;;  %v706_v35 = vpop.f32.mrb[5].mxu1 }
 0x11e   :  { %v579_v36 = vpop.f32.mrb[6].mxu0  ;;  %v707_v37 = vpop.f32.mrb[6].mxu1 }
 0x11f   :  { %1190 = vtanh.f32 %v577_v32  ;;  %v580_v38 = vadd.f32 %v1606_v17, %v579_v36  ;;  %v708_v39 = vadd.f32 %v1606_v17, %v707_v37  ;;  %v581_v40 = vpop.f32.mrb[7].mxu0  ;;  %v709_v41 = vpop.f32.mrb[7].mxu1 }
 0x120   :  { %1192 = vtanh.f32 %v705_v33 }
 0x121   :  { %v1183_v42 = vpop.eup %1182  ;;  %1194 = vtanh.f32 %v580_v38 }
 0x122   :  { %v1185_v43 = vpop.eup %1184  ;;  %888 = vst.msk [vmem:[%s1931_s3] sm:$0xff] %vm887_vm0, %v1183_v42  ;;  %1196 = vtanh.f32 %v708_v39 }
 0x123   :  { %v1187_v44 = vpop.eup %1186  ;;  %920 = vst.msk [vmem:[%s1931_s3 + $0x100] sm:$0xff] %vm887_vm0, %v1185_v43 }
 0x124   :  { %v1189_v45 = vpop.eup %1188  ;;  %889 = vst.msk [vmem:[%s1931_s3 + $0x8] sm:$0xff] %vm887_vm0, %v1187_v44  ;;  %v584_v46 = vpop.f32.mrb[8].mxu0 }
 0x125   :  { %v712_v47 = vpop.f32.mrb[8].mxu1  ;;  %921 = vst.msk [vmem:[%s1931_s3 + $0x108] sm:$0xff] %vm887_vm0, %v1189_v45  ;;  %v585_v48 = vadd.f32 %v1606_v17, %v584_v46  ;;  %v586_v50 = vpop.f32.mrb[9].mxu0 }
 0x126   :  { %v713_v49 = vadd.f32 %v1606_v17, %v712_v47  ;;  %v714_v51 = vpop.f32.mrb[9].mxu1  ;;  %v587_v52 = vpop.f32.mrb[10].mxu0 }
 0x127   :  { %v715_v53 = vpop.f32.mrb[10].mxu1  ;;  %1198 = vtanh.f32 %v585_v48  ;;  %v588_v54 = vadd.f32 %v1606_v17, %v587_v52  ;;  %v589_v56 = vpop.f32.mrb[11].mxu0 }
 0x128   :  { %v716_v55 = vadd.f32 %v1606_v17, %v715_v53  ;;  %v717_v57 = vpop.f32.mrb[11].mxu1  ;;  %1200 = vtanh.f32 %v713_v49 }
 0x129   :  { %v1191_v58 = vpop.eup %1190  ;;  %1202 = vtanh.f32 %v588_v54 }
 0x12a   :  { %v1193_v59 = vpop.eup %1192  ;;  %890 = vst.msk [vmem:[%s1931_s3 + $0x10] sm:$0xff] %vm887_vm0, %v1191_v58  ;;  %1204 = vtanh.f32 %v716_v55 }
 0x12b   :  { %v1195_v60 = vpop.eup %1194  ;;  %922 = vst.msk [vmem:[%s1931_s3 + $0x110] sm:$0xff] %vm887_vm0, %v1193_v59 }
 0x12c   :  { %v1197_v61 = vpop.eup %1196  ;;  %891 = vst.msk [vmem:[%s1931_s3 + $0x18] sm:$0xff] %vm887_vm0, %v1195_v60  ;;  %v592_v62 = vpop.f32.mrb[12].mxu0 }
 0x12d   :  { %v720_v63 = vpop.f32.mrb[12].mxu1  ;;  %923 = vst.msk [vmem:[%s1931_s3 + $0x118] sm:$0xff] %vm887_vm0, %v1197_v61  ;;  %v593_v0 = vadd.f32 %v1606_v17, %v592_v62  ;;  %v594_v2 = vpop.f32.mrb[13].mxu0 }
 0x12e   :  { %v721_v1 = vadd.f32 %v1606_v17, %v720_v63  ;;  %v722_v3 = vpop.f32.mrb[13].mxu1  ;;  %v595_v4 = vpop.f32.mrb[14].mxu0 }
 0x12f   :  { %v723_v5 = vpop.f32.mrb[14].mxu1  ;;  %1206 = vtanh.f32 %v593_v0  ;;  %v596_v6 = vadd.f32 %v1606_v17, %v595_v4  ;;  %v597_v8 = vpop.f32.mrb[15].mxu0 }
 0x130   :  { %v724_v7 = vadd.f32 %v1606_v17, %v723_v5  ;;  %v725_v9 = vpop.f32.mrb[15].mxu1  ;;  %1208 = vtanh.f32 %v721_v1 }
 0x131   :  { %v1199_v10 = vpop.eup %1198  ;;  %1210 = vtanh.f32 %v596_v6 }
 0x132   :  { %v1201_v11 = vpop.eup %1200  ;;  %892 = vst.msk [vmem:[%s1931_s3 + $0x20] sm:$0xff] %vm887_vm0, %v1199_v10  ;;  %1212 = vtanh.f32 %v724_v7 }
 0x133   :  { %v1203_v12 = vpop.eup %1202  ;;  %924 = vst.msk [vmem:[%s1931_s3 + $0x120] sm:$0xff] %vm887_vm0, %v1201_v11 }
 0x134   :  { %v1205_v13 = vpop.eup %1204  ;;  %893 = vst.msk [vmem:[%s1931_s3 + $0x28] sm:$0xff] %vm887_vm0, %v1203_v12  ;;  %v600_v14 = vpop.f32.mrb[16].mxu0 }
 0x135   :  { %v728_v15 = vpop.f32.mrb[16].mxu1  ;;  %925 = vst.msk [vmem:[%s1931_s3 + $0x128] sm:$0xff] %vm887_vm0, %v1205_v13  ;;  %v601_v16 = vadd.f32 %v1606_v17, %v600_v14  ;;  %v602_v19 = vpop.f32.mrb[17].mxu0 }
 0x136   :  { %v729_v18 = vadd.f32 %v1606_v17, %v728_v15  ;;  %v730_v20 = vpop.f32.mrb[17].mxu1  ;;  %v603_v21 = vpop.f32.mrb[18].mxu0 }
 0x137   :  { %v731_v22 = vpop.f32.mrb[18].mxu1  ;;  %1214 = vtanh.f32 %v601_v16  ;;  %v604_v23 = vadd.f32 %v1606_v17, %v603_v21  ;;  %v605_v25 = vpop.f32.mrb[19].mxu0 }
 0x138   :  { %v732_v24 = vadd.f32 %v1606_v17, %v731_v22  ;;  %v733_v26 = vpop.f32.mrb[19].mxu1  ;;  %1216 = vtanh.f32 %v729_v18 }
 0x139   :  { %v1207_v27 = vpop.eup %1206  ;;  %1218 = vtanh.f32 %v604_v23 }
 0x13a   :  { %v1209_v28 = vpop.eup %1208  ;;  %894 = vst.msk [vmem:[%s1931_s3 + $0x30] sm:$0xff] %vm887_vm0, %v1207_v27  ;;  %1220 = vtanh.f32 %v732_v24 }
 0x13b   :  { %v1211_v29 = vpop.eup %1210  ;;  %926 = vst.msk [vmem:[%s1931_s3 + $0x130] sm:$0xff] %vm887_vm0, %v1209_v28 }
 0x13c   :  { %v1213_v30 = vpop.eup %1212  ;;  %895 = vst.msk [vmem:[%s1931_s3 + $0x38] sm:$0xff] %vm887_vm0, %v1211_v29  ;;  %v608_v31 = vpop.f32.mrb[20].mxu0 }
 0x13d   :  { %v736_v32 = vpop.f32.mrb[20].mxu1  ;;  %927 = vst.msk [vmem:[%s1931_s3 + $0x138] sm:$0xff] %vm887_vm0, %v1213_v30  ;;  %v609_v33 = vadd.f32 %v1606_v17, %v608_v31  ;;  %v610_v35 = vpop.f32.mrb[21].mxu0 }
 0x13e   :  { %v737_v34 = vadd.f32 %v1606_v17, %v736_v32  ;;  %v738_v36 = vpop.f32.mrb[21].mxu1  ;;  %v611_v37 = vpop.f32.mrb[22].mxu0 }
 0x13f   :  { %v739_v38 = vpop.f32.mrb[22].mxu1  ;;  %1222 = vtanh.f32 %v609_v33  ;;  %v612_v39 = vadd.f32 %v1606_v17, %v611_v37  ;;  %v613_v41 = vpop.f32.mrb[23].mxu0 }
 0x140   :  { %v740_v40 = vadd.f32 %v1606_v17, %v739_v38  ;;  %v741_v42 = vpop.f32.mrb[23].mxu1  ;;  %1224 = vtanh.f32 %v737_v34 }
 0x141   :  { %v1215_v43 = vpop.eup %1214  ;;  %1226 = vtanh.f32 %v612_v39 }
 0x142   :  { %v1217_v44 = vpop.eup %1216  ;;  %896 = vst.msk [vmem:[%s1931_s3 + $0x40] sm:$0xff] %vm887_vm0, %v1215_v43  ;;  %1228 = vtanh.f32 %v740_v40 }
 0x143   :  { %v1219_v45 = vpop.eup %1218  ;;  %928 = vst.msk [vmem:[%s1931_s3 + $0x140] sm:$0xff] %vm887_vm0, %v1217_v44 }
 0x144   :  { %v1221_v46 = vpop.eup %1220  ;;  %897 = vst.msk [vmem:[%s1931_s3 + $0x48] sm:$0xff] %vm887_vm0, %v1219_v45  ;;  %v616_v47 = vpop.f32.mrb[24].mxu0 }
 0x145   :  { %v744_v48 = vpop.f32.mrb[24].mxu1  ;;  %929 = vst.msk [vmem:[%s1931_s3 + $0x148] sm:$0xff] %vm887_vm0, %v1221_v46  ;;  %v617_v49 = vadd.f32 %v1606_v17, %v616_v47  ;;  %v618_v51 = vpop.f32.mrb[25].mxu0 }
 0x146   :  { %v745_v50 = vadd.f32 %v1606_v17, %v744_v48  ;;  %v746_v52 = vpop.f32.mrb[25].mxu1  ;;  %v619_v53 = vpop.f32.mrb[26].mxu0 }
 0x147   :  { %v747_v54 = vpop.f32.mrb[26].mxu1  ;;  %1230 = vtanh.f32 %v617_v49  ;;  %v620_v55 = vadd.f32 %v1606_v17, %v619_v53  ;;  %v621_v57 = vpop.f32.mrb[27].mxu0 }
 0x148   :  { %v748_v56 = vadd.f32 %v1606_v17, %v747_v54  ;;  %v749_v58 = vpop.f32.mrb[27].mxu1  ;;  %1232 = vtanh.f32 %v745_v50 }
 0x149   :  { %v1223_v59 = vpop.eup %1222  ;;  %1234 = vtanh.f32 %v620_v55 }
 0x14a   :  { %v1225_v60 = vpop.eup %1224  ;;  %898 = vst.msk [vmem:[%s1931_s3 + $0x50] sm:$0xff] %vm887_vm0, %v1223_v59  ;;  %1236 = vtanh.f32 %v748_v56 }
 0x14b   :  { %v1227_v61 = vpop.eup %1226  ;;  %930 = vst.msk [vmem:[%s1931_s3 + $0x150] sm:$0xff] %vm887_vm0, %v1225_v60 }
 0x14c   :  { %v1229_v62 = vpop.eup %1228  ;;  %899 = vst.msk [vmem:[%s1931_s3 + $0x58] sm:$0xff] %vm887_vm0, %v1227_v61  ;;  %v624_v63 = vpop.f32.mrb[28].mxu0 }
 0x14d   :  { %v752_v0 = vpop.f32.mrb[28].mxu1  ;;  %931 = vst.msk [vmem:[%s1931_s3 + $0x158] sm:$0xff] %vm887_vm0, %v1229_v62  ;;  %v625_v1 = vadd.f32 %v1606_v17, %v624_v63  ;;  %v626_v3 = vpop.f32.mrb[29].mxu0 }
 0x14e   :  { %v753_v2 = vadd.f32 %v1606_v17, %v752_v0  ;;  %v754_v4 = vpop.f32.mrb[29].mxu1  ;;  %v627_v5 = vpop.f32.mrb[30].mxu0 }
 0x14f   :  { %v755_v6 = vpop.f32.mrb[30].mxu1  ;;  %1238 = vtanh.f32 %v625_v1  ;;  %v628_v7 = vadd.f32 %v1606_v17, %v627_v5  ;;  %v629_v9 = vpop.f32.mrb[31].mxu0 }
 0x150   :  { %v756_v8 = vadd.f32 %v1606_v17, %v755_v6  ;;  %v757_v10 = vpop.f32.mrb[31].mxu1  ;;  %1240 = vtanh.f32 %v753_v2 }
 0x151   :  { %v1231_v11 = vpop.eup %1230  ;;  %1242 = vtanh.f32 %v628_v7 }
 0x152   :  { %v1233_v12 = vpop.eup %1232  ;;  %900 = vst.msk [vmem:[%s1931_s3 + $0x60] sm:$0xff] %vm887_vm0, %v1231_v11  ;;  %1244 = vtanh.f32 %v756_v8 }
 0x153   :  { %v1235_v13 = vpop.eup %1234  ;;  %932 = vst.msk [vmem:[%s1931_s3 + $0x160] sm:$0xff] %vm887_vm0, %v1233_v12 }
 0x154   :  { %v1237_v14 = vpop.eup %1236  ;;  %901 = vst.msk [vmem:[%s1931_s3 + $0x68] sm:$0xff] %vm887_vm0, %v1235_v13  ;;  %v632_v15 = vpop.f32.mrb[32].mxu0 }
 0x155   :  { %v760_v16 = vpop.f32.mrb[32].mxu1  ;;  %933 = vst.msk [vmem:[%s1931_s3 + $0x168] sm:$0xff] %vm887_vm0, %v1237_v14  ;;  %v633_v18 = vadd.f32 %v1606_v17, %v632_v15  ;;  %v634_v20 = vpop.f32.mrb[33].mxu0 }
 0x156   :  { %v761_v19 = vadd.f32 %v1606_v17, %v760_v16  ;;  %v762_v21 = vpop.f32.mrb[33].mxu1  ;;  %v635_v22 = vpop.f32.mrb[34].mxu0 }
 0x157   :  { %v763_v23 = vpop.f32.mrb[34].mxu1  ;;  %1246 = vtanh.f32 %v633_v18  ;;  %v636_v24 = vadd.f32 %v1606_v17, %v635_v22  ;;  %v637_v26 = vpop.f32.mrb[35].mxu0 }
 0x158   :  { %v764_v25 = vadd.f32 %v1606_v17, %v763_v23  ;;  %v765_v27 = vpop.f32.mrb[35].mxu1  ;;  %1248 = vtanh.f32 %v761_v19 }
 0x159   :  { %v1239_v28 = vpop.eup %1238  ;;  %1250 = vtanh.f32 %v636_v24 }
 0x15a   :  { %v1241_v29 = vpop.eup %1240  ;;  %902 = vst.msk [vmem:[%s1931_s3 + $0x70] sm:$0xff] %vm887_vm0, %v1239_v28  ;;  %1252 = vtanh.f32 %v764_v25 }
 0x15b   :  { %v1243_v30 = vpop.eup %1242  ;;  %934 = vst.msk [vmem:[%s1931_s3 + $0x170] sm:$0xff] %vm887_vm0, %v1241_v29 }
 0x15c   :  { %v1245_v31 = vpop.eup %1244  ;;  %903 = vst.msk [vmem:[%s1931_s3 + $0x78] sm:$0xff] %vm887_vm0, %v1243_v30  ;;  %v640_v32 = vpop.f32.mrb[36].mxu0 }
 0x15d   :  { %v768_v33 = vpop.f32.mrb[36].mxu1  ;;  %935 = vst.msk [vmem:[%s1931_s3 + $0x178] sm:$0xff] %vm887_vm0, %v1245_v31  ;;  %v641_v34 = vadd.f32 %v1606_v17, %v640_v32  ;;  %v642_v36 = vpop.f32.mrb[37].mxu0 }
 0x15e   :  { %v769_v35 = vadd.f32 %v1606_v17, %v768_v33  ;;  %v770_v37 = vpop.f32.mrb[37].mxu1  ;;  %v643_v38 = vpop.f32.mrb[38].mxu0 }
 0x15f   :  { %v771_v39 = vpop.f32.mrb[38].mxu1  ;;  %1254 = vtanh.f32 %v641_v34  ;;  %v644_v40 = vadd.f32 %v1606_v17, %v643_v38  ;;  %v645_v42 = vpop.f32.mrb[39].mxu0 }
 0x160   :  { %v772_v41 = vadd.f32 %v1606_v17, %v771_v39  ;;  %v773_v43 = vpop.f32.mrb[39].mxu1  ;;  %1256 = vtanh.f32 %v769_v35 }
 0x161   :  { %v1247_v44 = vpop.eup %1246  ;;  %1258 = vtanh.f32 %v644_v40 }
 0x162   :  { %v1249_v45 = vpop.eup %1248  ;;  %904 = vst.msk [vmem:[%s1931_s3 + $0x80] sm:$0xff] %vm887_vm0, %v1247_v44  ;;  %1260 = vtanh.f32 %v772_v41 }
 0x163   :  { %v1251_v46 = vpop.eup %1250  ;;  %936 = vst.msk [vmem:[%s1931_s3 + $0x180] sm:$0xff] %vm887_vm0, %v1249_v45 }
 0x164   :  { %v1253_v47 = vpop.eup %1252  ;;  %905 = vst.msk [vmem:[%s1931_s3 + $0x88] sm:$0xff] %vm887_vm0, %v1251_v46  ;;  %v648_v48 = vpop.f32.mrb[40].mxu0 }
 0x165   :  { %v776_v49 = vpop.f32.mrb[40].mxu1  ;;  %937 = vst.msk [vmem:[%s1931_s3 + $0x188] sm:$0xff] %vm887_vm0, %v1253_v47  ;;  %v649_v50 = vadd.f32 %v1606_v17, %v648_v48  ;;  %v650_v52 = vpop.f32.mrb[41].mxu0 }
 0x166   :  { %v777_v51 = vadd.f32 %v1606_v17, %v776_v49  ;;  %v778_v53 = vpop.f32.mrb[41].mxu1  ;;  %v651_v54 = vpop.f32.mrb[42].mxu0 }
 0x167   :  { %v779_v55 = vpop.f32.mrb[42].mxu1  ;;  %1262 = vtanh.f32 %v649_v50  ;;  %v652_v56 = vadd.f32 %v1606_v17, %v651_v54  ;;  %v653_v58 = vpop.f32.mrb[43].mxu0 }
 0x168   :  { %v780_v57 = vadd.f32 %v1606_v17, %v779_v55  ;;  %v781_v59 = vpop.f32.mrb[43].mxu1  ;;  %1264 = vtanh.f32 %v777_v51 }
 0x169   :  { %v1255_v60 = vpop.eup %1254  ;;  %1266 = vtanh.f32 %v652_v56 }
 0x16a   :  { %v1257_v61 = vpop.eup %1256  ;;  %906 = vst.msk [vmem:[%s1931_s3 + $0x90] sm:$0xff] %vm887_vm0, %v1255_v60  ;;  %1268 = vtanh.f32 %v780_v57 }
 0x16b   :  { %v1259_v62 = vpop.eup %1258  ;;  %938 = vst.msk [vmem:[%s1931_s3 + $0x190] sm:$0xff] %vm887_vm0, %v1257_v61 }
 0x16c   :  { %v1261_v63 = vpop.eup %1260  ;;  %907 = vst.msk [vmem:[%s1931_s3 + $0x98] sm:$0xff] %vm887_vm0, %v1259_v62  ;;  %v656_v0 = vpop.f32.mrb[44].mxu0 }
 0x16d   :  { %v784_v1 = vpop.f32.mrb[44].mxu1  ;;  %939 = vst.msk [vmem:[%s1931_s3 + $0x198] sm:$0xff] %vm887_vm0, %v1261_v63  ;;  %v657_v2 = vadd.f32 %v1606_v17, %v656_v0  ;;  %v658_v4 = vpop.f32.mrb[45].mxu0 }
 0x16e   :  { %v785_v3 = vadd.f32 %v1606_v17, %v784_v1  ;;  %v786_v5 = vpop.f32.mrb[45].mxu1  ;;  %v659_v6 = vpop.f32.mrb[46].mxu0 }
 0x16f   :  { %v787_v7 = vpop.f32.mrb[46].mxu1  ;;  %1270 = vtanh.f32 %v657_v2  ;;  %v660_v8 = vadd.f32 %v1606_v17, %v659_v6  ;;  %v661_v10 = vpop.f32.mrb[47].mxu0 }
 0x170   :  { %v788_v9 = vadd.f32 %v1606_v17, %v787_v7  ;;  %v789_v11 = vpop.f32.mrb[47].mxu1  ;;  %1272 = vtanh.f32 %v785_v3 }
 0x171   :  { %v1263_v12 = vpop.eup %1262  ;;  %1274 = vtanh.f32 %v660_v8 }
 0x172   :  { %v1265_v13 = vpop.eup %1264  ;;  %908 = vst.msk [vmem:[%s1931_s3 + $0xa0] sm:$0xff] %vm887_vm0, %v1263_v12  ;;  %1276 = vtanh.f32 %v788_v9 }
 0x173   :  { %v1267_v14 = vpop.eup %1266  ;;  %940 = vst.msk [vmem:[%s1931_s3 + $0x1a0] sm:$0xff] %vm887_vm0, %v1265_v13 }
 0x174   :  { %v1269_v15 = vpop.eup %1268  ;;  %909 = vst.msk [vmem:[%s1931_s3 + $0xa8] sm:$0xff] %vm887_vm0, %v1267_v14  ;;  %v664_v16 = vpop.f32.mrb[48].mxu0 }
 0x175   :  { %v792_v18 = vpop.f32.mrb[48].mxu1  ;;  %941 = vst.msk [vmem:[%s1931_s3 + $0x1a8] sm:$0xff] %vm887_vm0, %v1269_v15  ;;  %v665_v19 = vadd.f32 %v1606_v17, %v664_v16  ;;  %v666_v21 = vpop.f32.mrb[49].mxu0 }
 0x176   :  { %v793_v20 = vadd.f32 %v1606_v17, %v792_v18  ;;  %v794_v22 = vpop.f32.mrb[49].mxu1  ;;  %v667_v23 = vpop.f32.mrb[50].mxu0 }
 0x177   :  { %v795_v24 = vpop.f32.mrb[50].mxu1  ;;  %1278 = vtanh.f32 %v665_v19  ;;  %v668_v25 = vadd.f32 %v1606_v17, %v667_v23  ;;  %v669_v27 = vpop.f32.mrb[51].mxu0 }
 0x178   :  { %v796_v26 = vadd.f32 %v1606_v17, %v795_v24  ;;  %v797_v28 = vpop.f32.mrb[51].mxu1  ;;  %1280 = vtanh.f32 %v793_v20 }
 0x179   :  { %v1271_v29 = vpop.eup %1270  ;;  %1282 = vtanh.f32 %v668_v25 }
 0x17a   :  { %v1273_v30 = vpop.eup %1272  ;;  %910 = vst.msk [vmem:[%s1931_s3 + $0xb0] sm:$0xff] %vm887_vm0, %v1271_v29  ;;  %1284 = vtanh.f32 %v796_v26 }
 0x17b   :  { %v1275_v31 = vpop.eup %1274  ;;  %942 = vst.msk [vmem:[%s1931_s3 + $0x1b0] sm:$0xff] %vm887_vm0, %v1273_v30 }
 0x17c   :  { %v1277_v32 = vpop.eup %1276  ;;  %911 = vst.msk [vmem:[%s1931_s3 + $0xb8] sm:$0xff] %vm887_vm0, %v1275_v31  ;;  %v672_v33 = vpop.f32.mrb[52].mxu0 }
 0x17d   :  { %v800_v34 = vpop.f32.mrb[52].mxu1  ;;  %943 = vst.msk [vmem:[%s1931_s3 + $0x1b8] sm:$0xff] %vm887_vm0, %v1277_v32  ;;  %v673_v35 = vadd.f32 %v1606_v17, %v672_v33  ;;  %v674_v37 = vpop.f32.mrb[53].mxu0 }
 0x17e   :  { %v801_v36 = vadd.f32 %v1606_v17, %v800_v34  ;;  %v802_v38 = vpop.f32.mrb[53].mxu1  ;;  %v675_v39 = vpop.f32.mrb[54].mxu0 }
 0x17f   :  { %v803_v40 = vpop.f32.mrb[54].mxu1  ;;  %1286 = vtanh.f32 %v673_v35  ;;  %v676_v41 = vadd.f32 %v1606_v17, %v675_v39  ;;  %v677_v43 = vpop.f32.mrb[55].mxu0 }
 0x180   :  { %v804_v42 = vadd.f32 %v1606_v17, %v803_v40  ;;  %v805_v44 = vpop.f32.mrb[55].mxu1  ;;  %1288 = vtanh.f32 %v801_v36 }
 0x181   :  { %v1279_v45 = vpop.eup %1278  ;;  %1290 = vtanh.f32 %v676_v41 }
 0x182   :  { %v1281_v46 = vpop.eup %1280  ;;  %912 = vst.msk [vmem:[%s1931_s3 + $0xc0] sm:$0xff] %vm887_vm0, %v1279_v45  ;;  %1292 = vtanh.f32 %v804_v42 }
 0x183   :  { %v1283_v47 = vpop.eup %1282  ;;  %944 = vst.msk [vmem:[%s1931_s3 + $0x1c0] sm:$0xff] %vm887_vm0, %v1281_v46 }
 0x184   :  { %v1285_v48 = vpop.eup %1284  ;;  %913 = vst.msk [vmem:[%s1931_s3 + $0xc8] sm:$0xff] %vm887_vm0, %v1283_v47  ;;  %v680_v49 = vpop.f32.mrb[56].mxu0 }
 0x185   :  { %v808_v50 = vpop.f32.mrb[56].mxu1  ;;  %945 = vst.msk [vmem:[%s1931_s3 + $0x1c8] sm:$0xff] %vm887_vm0, %v1285_v48  ;;  %v681_v51 = vadd.f32 %v1606_v17, %v680_v49  ;;  %v682_v53 = vpop.f32.mrb[57].mxu0 }
 0x186   :  { %v809_v52 = vadd.f32 %v1606_v17, %v808_v50  ;;  %v810_v54 = vpop.f32.mrb[57].mxu1  ;;  %v683_v55 = vpop.f32.mrb[58].mxu0 }
 0x187   :  { %v811_v56 = vpop.f32.mrb[58].mxu1  ;;  %1294 = vtanh.f32 %v681_v51  ;;  %v684_v57 = vadd.f32 %v1606_v17, %v683_v55  ;;  %v685_v59 = vpop.f32.mrb[59].mxu0 }
 0x188   :  { %v812_v58 = vadd.f32 %v1606_v17, %v811_v56  ;;  %v813_v60 = vpop.f32.mrb[59].mxu1  ;;  %1296 = vtanh.f32 %v809_v52 }
 0x189   :  { %v1287_v61 = vpop.eup %1286  ;;  %1298 = vtanh.f32 %v684_v57 }
 0x18a   :  { %v1289_v62 = vpop.eup %1288  ;;  %914 = vst.msk [vmem:[%s1931_s3 + $0xd0] sm:$0xff] %vm887_vm0, %v1287_v61  ;;  %1300 = vtanh.f32 %v812_v58 }
 0x18b   :  { %v1291_v63 = vpop.eup %1290  ;;  %946 = vst.msk [vmem:[%s1931_s3 + $0x1d0] sm:$0xff] %vm887_vm0, %v1289_v62 }
 0x18c   :  { %v1293_v0 = vpop.eup %1292  ;;  %915 = vst.msk [vmem:[%s1931_s3 + $0xd8] sm:$0xff] %vm887_vm0, %v1291_v63  ;;  %v688_v1 = vpop.f32.mrb[60].mxu0 }
 0x18d   :  { %v816_v2 = vpop.f32.mrb[60].mxu1  ;;  %947 = vst.msk [vmem:[%s1931_s3 + $0x1d8] sm:$0xff] %vm887_vm0, %v1293_v0  ;;  %v689_v3 = vadd.f32 %v1606_v17, %v688_v1  ;;  %v690_v5 = vpop.f32.mrb[61].mxu0 }
 0x18e   :  { %v817_v4 = vadd.f32 %v1606_v17, %v816_v2  ;;  %v818_v6 = vpop.f32.mrb[61].mxu1  ;;  %v691_v7 = vpop.f32.mrb[62].mxu0 }
 0x18f   :  { %v819_v8 = vpop.f32.mrb[62].mxu1  ;;  %1302 = vtanh.f32 %v689_v3  ;;  %v692_v9 = vadd.f32 %v1606_v17, %v691_v7  ;;  %v693_v11 = vpop.f32.mrb[63].mxu0 }
 0x190   :  { %v820_v10 = vadd.f32 %v1606_v17, %v819_v8  ;;  %v821_v12 = vpop.f32.mrb[63].mxu1  ;;  %1304 = vtanh.f32 %v817_v4 }
 0x191   :  { %v1295_v13 = vpop.eup %1294  ;;  %1306 = vtanh.f32 %v692_v9 }
 0x192   :  { %v1297_v14 = vpop.eup %1296  ;;  %916 = vst.msk [vmem:[%s1931_s3 + $0xe0] sm:$0xff] %vm887_vm0, %v1295_v13  ;;  %1308 = vtanh.f32 %v820_v10 }
 0x193   :  { %v1299_v15 = vpop.eup %1298  ;;  %948 = vst.msk [vmem:[%s1931_s3 + $0x1e0] sm:$0xff] %vm887_vm0, %v1297_v14 }
 0x194   :  { %v1301_v16 = vpop.eup %1300  ;;  %917 = vst.msk [vmem:[%s1931_s3 + $0xe8] sm:$0xff] %vm887_vm0, %v1299_v15 }
 0x195   :  { %949 = vst.msk [vmem:[%s1931_s3 + $0x1e8] sm:$0xff] %vm887_vm0, %v1301_v16 }
 0x199   :  { %v1303_v17 = vpop.eup %1302 }
 0x19a   :  { %v1305_v18 = vpop.eup %1304  ;;  %918 = vst.msk [vmem:[%s1931_s3 + $0xf0] sm:$0xff] %vm887_vm0, %v1303_v17 }
 0x19b   :  { %v1307_v19 = vpop.eup %1306  ;;  %950 = vst.msk [vmem:[%s1931_s3 + $0x1f0] sm:$0xff] %vm887_vm0, %v1305_v18 }
 0x19c   :  { %v1309_v20 = vpop.eup %1308  ;;  %919 = vst.msk [vmem:[%s1931_s3 + $0xf8] sm:$0xff] %vm887_vm0, %v1307_v19 }
 0x19d   :  { %951 = vst.msk [vmem:[%s1931_s3 + $0x1f8] sm:$0xff] %vm887_vm0, %v1309_v20 }

// kernel: wgan_forward.8
= control target key start
LH: loop header
LB: loop body
LE: loop exit
PB: predicated region body
PF: predicated region fallthrough
CT: control target
= control target key end

     0   :  { %vm158_vm0 = vcmask 392192   ;;  %vm464_vm1 = vcmask 130048   ;;  %s877_s1 = inlined_call_operand.vmem [shape: bf16[48,16], index: 1, kind: input, shape index: {}]   ;;  %s878_s0 = inlined_call_operand.vmem [shape: bf16[256,48], index: 0, kind: input, shape index: {}]   ;;  %s879_s2 = inlined_call_operand.vmem [shape: f32[1,16], index: 2, kind: input, shape index: {}]   ;;  %s880_s3 = inlined_call_operand.vmem [shape: f32[256,16], index: 3, kind: output, shape index: {}]  }
   0x1   :  { %v600_v0 = vld [vmem:[%s877_s1] sm:$0xff]   ;;  %v601_v1 = vld [vmem:[%s877_s1 + $0x8] sm:$0xff]   ;;  %v602_v2 = vld [vmem:[%s877_s1 + $0x10] sm:$0xff]  }
   0x2   :  { %556 = vmatprep.subr.bf16.mxu0 %v600_v0  ;;  %594 = vmatprep.subr.bf16.mxu1 %v600_v0  ;;  %v603_v3 = vld [vmem:[%s878_s0] sm:$0xff]   ;;  %v605_v5 = vld [vmem:[%s878_s0 + $0x8] sm:$0xff]   ;;  %v607_v7 = vld [vmem:[%s878_s0 + $0x10] sm:$0xff]  }
   0x3   :  { %557 = vmatpush3.bf16.msra.mxu0 %v600_v0  ;;  %597 = vmatpush3.bf16.msra.mxu1 %v600_v0  ;;  %v604_v4 = vld [vmem:[%s878_s0 + $0x40] sm:$0xff]   ;;  %v606_v6 = vld [vmem:[%s878_s0 + $0x48] sm:$0xff]   ;;  %v608_v8 = vld [vmem:[%s878_s0 + $0x50] sm:$0xff]  }
   0x4   :  { %558 = vmatprep.subr.bf16.mxu0 %v601_v1  ;;  %595 = vmatprep.subr.bf16.mxu1 %v601_v1  ;;  %v609_v9 = vld [vmem:[%s878_s0 + $0x18] sm:$0xff]   ;;  %v611_v11 = vld [vmem:[%s878_s0 + $0x20] sm:$0xff]   ;;  %v613_v13 = vld [vmem:[%s878_s0 + $0x28] sm:$0xff]  }
   0x5   :  { %562 = vmatprep.mubr.msk.bf16.mxu0 %vm158_vm0, %v603_v3  ;;  %578 = vmatprep.mubr.msk.bf16.mxu1 %vm158_vm0, %v604_v4  ;;  %v610_v10 = vld [vmem:[%s878_s0 + $0x58] sm:$0xff]   ;;  %v612_v12 = vld [vmem:[%s878_s0 + $0x60] sm:$0xff]   ;;  %v614_v14 = vld [vmem:[%s878_s0 + $0x68] sm:$0xff]  }
   0x6   :  { %v615_v15 = vld [vmem:[%s878_s0 + $0x30] sm:$0xff]   ;;  %v617_v17 = vld [vmem:[%s878_s0 + $0x38] sm:$0xff]   ;;  %v715_v19 = vld [vmem:[%s879_s2] ss:$0 sm:$0xff] }
   0x7   :  { %559 = vmatpush3.bf16.msra.mxu0 %v601_v1  ;;  %598 = vmatpush3.bf16.msra.mxu1 %v601_v1  ;;  %v616_v16 = vld [vmem:[%s878_s0 + $0x70] sm:$0xff]   ;;  %v618_v18 = vld [vmem:[%s878_s0 + $0x78] sm:$0xff]  }
   0x8   :  { %560 = vmatprep.subr.bf16.mxu0 %v602_v2  ;;  %596 = vmatprep.subr.bf16.mxu1 %v602_v2 }
   0xb   :  { %561 = vmatpush3.bf16.msra.mxu0 %v602_v2  ;;  %599 = vmatpush3.bf16.msra.mxu1 %v602_v2 }
   0xe   :  { %563 = vmatmul.mubr.msk.bf16.vlgmr.msra.gmra.mrb[0].mxu0 %vm158_vm0, %v605_v5  ;;  %579 = vmatmul.mubr.msk.bf16.vlgmr.msra.gmra.mrb[0].mxu1 %vm158_vm0, %v606_v6 }
   0xf   :  { %566 = vmatprep.mubr.msk.bf16.mxu0 %vm158_vm0, %v607_v7  ;;  %582 = vmatprep.mubr.msk.bf16.mxu1 %vm158_vm0, %v608_v8 }
  0x16   :  { %567 = vmatmul.mubr.msk.bf16.gmra.mrb[4].mxu0 %vm158_vm0, %v609_v9  ;;  %583 = vmatmul.mubr.msk.bf16.gmra.mrb[4].mxu1 %vm158_vm0, %v610_v10 }
  0x17   :  { %570 = vmatprep.mubr.msk.bf16.mxu0 %vm158_vm0, %v611_v11  ;;  %586 = vmatprep.mubr.msk.bf16.mxu1 %vm158_vm0, %v612_v12 }
  0x1e   :  { %571 = vmatmul.mubr.msk.bf16.gmra.mrb[8].mxu0 %vm158_vm0, %v613_v13  ;;  %587 = vmatmul.mubr.msk.bf16.gmra.mrb[8].mxu1 %vm158_vm0, %v614_v14 }
  0x1f   :  { %574 = vmatprep.mubr.msk.bf16.mxu0 %vm158_vm0, %v615_v15  ;;  %590 = vmatprep.mubr.msk.bf16.mxu1 %vm158_vm0, %v616_v16 }
  0x26   :  { %575 = vmatmul.mubr.msk.bf16.gmra.mrb[12].mxu0 %vm158_vm0, %v617_v17  ;;  %591 = vmatmul.mubr.msk.bf16.gmra.mrb[12].mxu1 %vm158_vm0, %v618_v18 }
  0xe1   :  { %v564_v20 = vpop.f32.mrb[0].mxu0  ;;  %v580_v21 = vpop.f32.mrb[0].mxu1 }
  0xe2   :  { %v250_v22 = vadd.f32 %v564_v20, %v715_v19  ;;  %v314_v23 = vadd.f32 %v580_v21, %v715_v19  ;;  %v241_v24 = vpop.f32.mrb[1].mxu0  ;;  %v305_v25 = vpop.f32.mrb[1].mxu1 }
  0xe3   :  { %v242_v26 = vadd.f32 %v715_v19, %v241_v24  ;;  %v306_v27 = vadd.f32 %v715_v19, %v305_v25  ;;  %v565_v28 = vpop.f32.mrb[2].mxu0  ;;  %v581_v29 = vpop.f32.mrb[2].mxu1 }
  0xe4   :  { %vm370_vm2 = vcmp.ge.f32.partialorder %v250_v22, 0.0  ;;  %v402_v30 = vmul.f32 0.2, %v250_v22  ;;  %vm386_vm3 = vcmp.ge.f32.partialorder %v314_v23, 0.0  ;;  %v418_v31 = vmul.f32 0.2, %v314_v23 }
  0xe5   :  { %vm368_vm4 = vcmp.ge.f32.partialorder %v242_v26, 0.0  ;;  %v400_v32 = vmul.f32 0.2, %v242_v26  ;;  %vm384_vm5 = vcmp.ge.f32.partialorder %v306_v27, 0.0  ;;  %v416_v33 = vmul.f32 0.2, %v306_v27 }
  0xe6   :  { %v434_v34 = vsel %vm370_vm2, %v250_v22, %v402_v30  ;;  %v450_v35 = vsel %vm386_vm3, %v314_v23, %v418_v31  ;;  %v253_v36 = vadd.f32 %v565_v28, %v715_v19  ;;  %v317_v37 = vadd.f32 %v581_v29, %v715_v19  ;;  %v244_v38 = vpop.f32.mrb[3].mxu0  ;;  %v308_v39 = vpop.f32.mrb[3].mxu1 }
  0xe7   :  { %467 = vst.msk [vmem:[%s880_s3 + $0x10] sm:$0xff] %vm464_vm1, %v434_v34  ;;  %483 = vst.msk [vmem:[%s880_s3 + $0x90] sm:$0xff] %vm464_vm1, %v450_v35  ;;  %v432_v40 = vsel %vm368_vm4, %v242_v26, %v400_v32  ;;  %v448_v41 = vsel %vm384_vm5, %v306_v27, %v416_v33  ;;  %v245_v42 = vadd.f32 %v715_v19, %v244_v38 }
  0xe8   :  { %v309_v43 = vadd.f32 %v715_v19, %v308_v39  ;;  %465 = vst.msk [vmem:[%s880_s3] sm:$0xff] %vm464_vm1, %v432_v40  ;;  %481 = vst.msk [vmem:[%s880_s3 + $0x80] sm:$0xff] %vm464_vm1, %v448_v41  ;;  %vm371_vm6 = vcmp.ge.f32.partialorder %v253_v36, 0.0  ;;  %v403_v44 = vmul.f32 0.2, %v253_v36  ;;  %vm387_vm7 = vcmp.ge.f32.partialorder %v317_v37, 0.0 }
  0xe9   :  { %v419_v45 = vmul.f32 0.2, %v317_v37  ;;  %vm369_vm8 = vcmp.ge.f32.partialorder %v245_v42, 0.0  ;;  %v401_v46 = vmul.f32 0.2, %v245_v42  ;;  %v568_v50 = vpop.f32.mrb[4].mxu0 }
  0xea   :  { %vm385_vm9 = vcmp.ge.f32.partialorder %v309_v43, 0.0  ;;  %v417_v47 = vmul.f32 0.2, %v309_v43  ;;  %v435_v48 = vsel %vm371_vm6, %v253_v36, %v403_v44  ;;  %v584_v51 = vpop.f32.mrb[4].mxu1  ;;  %v266_v54 = vadd.f32 %v568_v50, %v715_v19  ;;  %v257_v56 = vpop.f32.mrb[5].mxu0 }
  0xeb   :  { %v451_v49 = vsel %vm387_vm7, %v317_v37, %v419_v45  ;;  %468 = vst.msk [vmem:[%s880_s3 + $0x18] sm:$0xff] %vm464_vm1, %v435_v48  ;;  %v433_v52 = vsel %vm369_vm8, %v245_v42, %v401_v46  ;;  %v330_v55 = vadd.f32 %v584_v51, %v715_v19  ;;  %v321_v57 = vpop.f32.mrb[5].mxu1  ;;  %v258_v58 = vadd.f32 %v715_v19, %v257_v56  ;;  %v569_v60 = vpop.f32.mrb[6].mxu0 }
  0xec   :  { %484 = vst.msk [vmem:[%s880_s3 + $0x98] sm:$0xff] %vm464_vm1, %v451_v49  ;;  %v449_v53 = vsel %vm385_vm9, %v309_v43, %v417_v47  ;;  %466 = vst.msk [vmem:[%s880_s3 + $0x8] sm:$0xff] %vm464_vm1, %v433_v52  ;;  %v322_v59 = vadd.f32 %v715_v19, %v321_v57  ;;  %v585_v61 = vpop.f32.mrb[6].mxu1  ;;  %vm374_vm10 = vcmp.ge.f32.partialorder %v266_v54, 0.0  ;;  %v406_v62 = vmul.f32 0.2, %v266_v54 }
  0xed   :  { %482 = vst.msk [vmem:[%s880_s3 + $0x88] sm:$0xff] %vm464_vm1, %v449_v53  ;;  %vm390_vm11 = vcmp.ge.f32.partialorder %v330_v55, 0.0  ;;  %v422_v63 = vmul.f32 0.2, %v330_v55  ;;  %vm372_vm12 = vcmp.ge.f32.partialorder %v258_v58, 0.0  ;;  %v269_v4 = vadd.f32 %v569_v60, %v715_v19  ;;  %v260_v6 = vpop.f32.mrb[7].mxu0 }
  0xee   :  { %v404_v0 = vmul.f32 0.2, %v258_v58  ;;  %vm388_vm13 = vcmp.ge.f32.partialorder %v322_v59, 0.0  ;;  %v420_v1 = vmul.f32 0.2, %v322_v59  ;;  %v438_v2 = vsel %vm374_vm10, %v266_v54, %v406_v62  ;;  %v324_v7 = vpop.f32.mrb[7].mxu1 }
  0xef   :  { %v454_v3 = vsel %vm390_vm11, %v330_v55, %v422_v63  ;;  %v333_v5 = vadd.f32 %v585_v61, %v715_v19  ;;  %471 = vst.msk [vmem:[%s880_s3 + $0x30] sm:$0xff] %vm464_vm1, %v438_v2  ;;  %v261_v10 = vadd.f32 %v715_v19, %v260_v6  ;;  %v325_v11 = vadd.f32 %v715_v19, %v324_v7 }
  0xf0   :  { %487 = vst.msk [vmem:[%s880_s3 + $0xb0] sm:$0xff] %vm464_vm1, %v454_v3  ;;  %v436_v8 = vsel %vm372_vm12, %v258_v58, %v404_v0  ;;  %v452_v9 = vsel %vm388_vm13, %v322_v59, %v420_v1  ;;  %vm375_vm14 = vcmp.ge.f32.partialorder %v269_v4, 0.0  ;;  %v407_v12 = vmul.f32 0.2, %v269_v4 }
  0xf1   :  { %469 = vst.msk [vmem:[%s880_s3 + $0x20] sm:$0xff] %vm464_vm1, %v436_v8  ;;  %485 = vst.msk [vmem:[%s880_s3 + $0xa0] sm:$0xff] %vm464_vm1, %v452_v9  ;;  %vm391_vm15 = vcmp.ge.f32.partialorder %v333_v5, 0.0  ;;  %v423_v13 = vmul.f32 0.2, %v333_v5  ;;  %vm373_vm0 = vcmp.ge.f32.partialorder %v261_v10, 0.0 }
  0xf2   :  { %v405_v14 = vmul.f32 0.2, %v261_v10  ;;  %vm389_vm2 = vcmp.ge.f32.partialorder %v325_v11, 0.0  ;;  %v421_v15 = vmul.f32 0.2, %v325_v11  ;;  %v439_v16 = vsel %vm375_vm14, %v269_v4, %v407_v12  ;;  %v572_v18 = vpop.f32.mrb[8].mxu0 }
  0xf3   :  { %v455_v17 = vsel %vm391_vm15, %v333_v5, %v423_v13  ;;  %v588_v20 = vpop.f32.mrb[8].mxu1  ;;  %472 = vst.msk [vmem:[%s880_s3 + $0x38] sm:$0xff] %vm464_vm1, %v439_v16  ;;  %v282_v23 = vadd.f32 %v572_v18, %v715_v19  ;;  %v273_v25 = vpop.f32.mrb[9].mxu0 }
  0xf4   :  { %488 = vst.msk [vmem:[%s880_s3 + $0xb8] sm:$0xff] %vm464_vm1, %v455_v17  ;;  %v437_v21 = vsel %vm373_vm0, %v261_v10, %v405_v14  ;;  %v453_v22 = vsel %vm389_vm2, %v325_v11, %v421_v15  ;;  %v346_v24 = vadd.f32 %v588_v20, %v715_v19  ;;  %v337_v26 = vpop.f32.mrb[9].mxu1  ;;  %v274_v27 = vadd.f32 %v715_v19, %v273_v25  ;;  %v573_v29 = vpop.f32.mrb[10].mxu0 }
  0xf5   :  { %470 = vst.msk [vmem:[%s880_s3 + $0x28] sm:$0xff] %vm464_vm1, %v437_v21  ;;  %486 = vst.msk [vmem:[%s880_s3 + $0xa8] sm:$0xff] %vm464_vm1, %v453_v22  ;;  %v338_v28 = vadd.f32 %v715_v19, %v337_v26  ;;  %v589_v30 = vpop.f32.mrb[10].mxu1  ;;  %vm378_vm3 = vcmp.ge.f32.partialorder %v282_v23, 0.0  ;;  %v410_v31 = vmul.f32 0.2, %v282_v23  ;;  %v285_v37 = vadd.f32 %v573_v29, %v715_v19 }
  0xf6   :  { %vm394_vm4 = vcmp.ge.f32.partialorder %v346_v24, 0.0  ;;  %v426_v32 = vmul.f32 0.2, %v346_v24  ;;  %vm376_vm5 = vcmp.ge.f32.partialorder %v274_v27, 0.0  ;;  %v408_v33 = vmul.f32 0.2, %v274_v27 }
  0xf7   :  { %vm392_vm6 = vcmp.ge.f32.partialorder %v338_v28, 0.0  ;;  %v424_v34 = vmul.f32 0.2, %v338_v28  ;;  %v442_v35 = vsel %vm378_vm3, %v282_v23, %v410_v31  ;;  %v349_v38 = vadd.f32 %v589_v30, %v715_v19  ;;  %v276_v39 = vpop.f32.mrb[11].mxu0  ;;  %v340_v40 = vpop.f32.mrb[11].mxu1 }
  0xf8   :  { %v458_v36 = vsel %vm394_vm4, %v346_v24, %v426_v32  ;;  %475 = vst.msk [vmem:[%s880_s3 + $0x50] sm:$0xff] %vm464_vm1, %v442_v35  ;;  %v440_v41 = vsel %vm376_vm5, %v274_v27, %v408_v33  ;;  %v277_v43 = vadd.f32 %v715_v19, %v276_v39  ;;  %v341_v44 = vadd.f32 %v715_v19, %v340_v40 }
  0xf9   :  { %491 = vst.msk [vmem:[%s880_s3 + $0xd0] sm:$0xff] %vm464_vm1, %v458_v36  ;;  %v456_v42 = vsel %vm392_vm6, %v338_v28, %v424_v34  ;;  %v576_v45 = vpop.f32.mrb[12].mxu0  ;;  %v592_v46 = vpop.f32.mrb[12].mxu1  ;;  %473 = vst.msk [vmem:[%s880_s3 + $0x40] sm:$0xff] %vm464_vm1, %v440_v41  ;;  %vm379_vm7 = vcmp.ge.f32.partialorder %v285_v37, 0.0  ;;  %vm395_vm8 = vcmp.ge.f32.partialorder %v349_v38, 0.0 }
  0xfa   :  { %489 = vst.msk [vmem:[%s880_s3 + $0xc0] sm:$0xff] %vm464_vm1, %v456_v42  ;;  %v411_v47 = vmul.f32 0.2, %v285_v37  ;;  %v427_v48 = vmul.f32 0.2, %v349_v38  ;;  %vm377_vm9 = vcmp.ge.f32.partialorder %v277_v43, 0.0  ;;  %v298_v53 = vadd.f32 %v576_v45, %v715_v19 }
  0xfb   :  { %v409_v49 = vmul.f32 0.2, %v277_v43  ;;  %vm393_vm10 = vcmp.ge.f32.partialorder %v341_v44, 0.0  ;;  %v425_v50 = vmul.f32 0.2, %v341_v44  ;;  %v362_v54 = vadd.f32 %v592_v46, %v715_v19  ;;  %v289_v55 = vpop.f32.mrb[13].mxu0 }
  0xfc   :  { %v443_v51 = vsel %vm379_vm7, %v285_v37, %v411_v47  ;;  %v459_v52 = vsel %vm395_vm8, %v349_v38, %v427_v48  ;;  %v353_v56 = vpop.f32.mrb[13].mxu1  ;;  %v290_v59 = vadd.f32 %v715_v19, %v289_v55  ;;  %v577_v61 = vpop.f32.mrb[14].mxu0  ;;  %vm382_vm11 = vcmp.ge.f32.partialorder %v298_v53, 0.0 }
  0xfd   :  { %476 = vst.msk [vmem:[%s880_s3 + $0x58] sm:$0xff] %vm464_vm1, %v443_v51  ;;  %492 = vst.msk [vmem:[%s880_s3 + $0xd8] sm:$0xff] %vm464_vm1, %v459_v52  ;;  %v441_v57 = vsel %vm377_vm9, %v277_v43, %v409_v49  ;;  %v457_v58 = vsel %vm393_vm10, %v341_v44, %v425_v50  ;;  %v354_v60 = vadd.f32 %v715_v19, %v353_v56  ;;  %v593_v62 = vpop.f32.mrb[14].mxu1  ;;  %v414_v63 = vmul.f32 0.2, %v298_v53  ;;  %v292_v7 = vpop.f32.mrb[15].mxu0 }
  0xfe   :  { %474 = vst.msk [vmem:[%s880_s3 + $0x48] sm:$0xff] %vm464_vm1, %v441_v57  ;;  %490 = vst.msk [vmem:[%s880_s3 + $0xc8] sm:$0xff] %vm464_vm1, %v457_v58  ;;  %vm398_vm12 = vcmp.ge.f32.partialorder %v362_v54, 0.0  ;;  %v430_v0 = vmul.f32 0.2, %v362_v54  ;;  %vm380_vm13 = vcmp.ge.f32.partialorder %v290_v59, 0.0  ;;  %v301_v5 = vadd.f32 %v577_v61, %v715_v19 }
  0xff   :  { %v412_v1 = vmul.f32 0.2, %v290_v59  ;;  %vm396_vm14 = vcmp.ge.f32.partialorder %v354_v60, 0.0  ;;  %v428_v2 = vmul.f32 0.2, %v354_v60  ;;  %v446_v3 = vsel %vm382_vm11, %v298_v53, %v414_v63  ;;  %v356_v8 = vpop.f32.mrb[15].mxu1 }
 0x100   :  { %v462_v4 = vsel %vm398_vm12, %v362_v54, %v430_v0  ;;  %v365_v6 = vadd.f32 %v593_v62, %v715_v19  ;;  %479 = vst.msk [vmem:[%s880_s3 + $0x70] sm:$0xff] %vm464_vm1, %v446_v3  ;;  %v293_v11 = vadd.f32 %v715_v19, %v292_v7  ;;  %v357_v12 = vadd.f32 %v715_v19, %v356_v8 }
 0x101   :  { %495 = vst.msk [vmem:[%s880_s3 + $0xf0] sm:$0xff] %vm464_vm1, %v462_v4  ;;  %v444_v9 = vsel %vm380_vm13, %v290_v59, %v412_v1  ;;  %v460_v10 = vsel %vm396_vm14, %v354_v60, %v428_v2  ;;  %vm383_vm15 = vcmp.ge.f32.partialorder %v301_v5, 0.0  ;;  %v415_v13 = vmul.f32 0.2, %v301_v5 }
 0x102   :  { %477 = vst.msk [vmem:[%s880_s3 + $0x60] sm:$0xff] %vm464_vm1, %v444_v9  ;;  %493 = vst.msk [vmem:[%s880_s3 + $0xe0] sm:$0xff] %vm464_vm1, %v460_v10  ;;  %vm399_vm0 = vcmp.ge.f32.partialorder %v365_v6, 0.0  ;;  %v431_v14 = vmul.f32 0.2, %v365_v6  ;;  %vm381_vm2 = vcmp.ge.f32.partialorder %v293_v11, 0.0 }
 0x103   :  { %v413_v15 = vmul.f32 0.2, %v293_v11  ;;  %vm397_vm3 = vcmp.ge.f32.partialorder %v357_v12, 0.0  ;;  %v429_v16 = vmul.f32 0.2, %v357_v12  ;;  %v447_v17 = vsel %vm383_vm15, %v301_v5, %v415_v13 }
 0x104   :  { %v463_v19 = vsel %vm399_vm0, %v365_v6, %v431_v14  ;;  %480 = vst.msk [vmem:[%s880_s3 + $0x78] sm:$0xff] %vm464_vm1, %v447_v17 }
 0x105   :  { %496 = vst.msk [vmem:[%s880_s3 + $0xf8] sm:$0xff] %vm464_vm1, %v463_v19  ;;  %v445_v18 = vsel %vm381_vm2, %v293_v11, %v413_v15  ;;  %v461_v20 = vsel %vm397_vm3, %v357_v12, %v429_v16 }
 0x106   :  { %478 = vst.msk [vmem:[%s880_s3 + $0x68] sm:$0xff] %vm464_vm1, %v445_v18  ;;  %494 = vst.msk [vmem:[%s880_s3 + $0xe8] sm:$0xff] %vm464_vm1, %v461_v20 }

// kernel: wgan_forward.9
= control target key start
LH: loop header
LB: loop body
LE: loop exit
PB: predicated region body
PF: predicated region fallthrough
CT: control target
= control target key end

     0   :  { %s884_s0 = inlined_call_operand.vmem [shape: bf16[64,256], index: 0, kind: input, shape index: {}]   ;;  %s885_s1 = inlined_call_operand.vmem [shape: bf16[256,32], index: 1, kind: input, shape index: {}]   ;;  %s886_s2 = inlined_call_operand.vmem [shape: f32[1,32], index: 2, kind: input, shape index: {}]   ;;  %s887_s3 = inlined_call_operand.vmem [shape: f32[1,32], index: 3, kind: input, shape index: {}]   ;;  %s888_s4 = inlined_call_operand.vmem [shape: f32[1,32], index: 4, kind: input, shape index: {}]   ;;  %s889_s5 = inlined_call_operand.vmem [shape: f32[32,32], index: 5, kind: input, shape index: {}]   ;;  %s890_s6 = inlined_call_operand.<no memory space> [shape: f32[1,1], index: 6, kind: input, shape index: {}]   ;;  %s891_s7 = inlined_call_operand.hbm [shape: f32[1,1], index: 7, kind: output, shape index: {0}]   ;;  %s892_s8 = inlined_call_operand.hbm [shape: f32[1,1], index: 8, kind: output, shape index: {1}]  }
   0x1   :  { %v14_v0 = vstv %s890_s6 }
   0x2   :  { %15 = vst [vmem:[#allocation2] sm:$0x1] %v14_v0 }
   0x3   :  { %16 = vsyncpa [#allocation4], 0  ;;  %v601_v1 = vld [vmem:[%s885_s1 + $0x40] sm:$0xff]   ;;  %v603_v3 = vld [vmem:[%s885_s1 + $0x48] sm:$0xff]  }
   0x4   :  { %v602_v2 = vld [vmem:[%s885_s1] sm:$0xff]   ;;  %537 = vmatprep.subr.bf16.mxu0 %v601_v1  ;;  %577 = vmatprep.subr.bf16.mxu1 %v601_v1  ;;  %v604_v4 = vld [vmem:[%s885_s1 + $0x8] sm:$0xff]   ;;  %v605_v5 = vld [vmem:[%s885_s1 + $0x50] sm:$0xff]  }
   0x5   :  { %538 = vmatpush3.bf16.msra.mxu0 %v602_v2  ;;  %585 = vmatpush3.bf16.msra.mxu1 %v602_v2  ;;  %v606_v6 = vld [vmem:[%s885_s1 + $0x10] sm:$0xff]   ;;  %v607_v7 = vld [vmem:[%s885_s1 + $0x58] sm:$0xff]   ;;  %v609_v9 = vld [vmem:[%s885_s1 + $0x60] sm:$0xff]  }
   0x6   :  { %539 = vmatprep.subr.bf16.mxu0 %v603_v3  ;;  %578 = vmatprep.subr.bf16.mxu1 %v603_v3  ;;  %v608_v8 = vld [vmem:[%s885_s1 + $0x18] sm:$0xff]   ;;  %v610_v10 = vld [vmem:[%s885_s1 + $0x20] sm:$0xff]   ;;  %v611_v11 = vld [vmem:[%s885_s1 + $0x68] sm:$0xff]  }
   0x7   :  { %v619_v12 = vld [vmem:[%s884_s0 + $0x4] ss:$8 sps:$4 sm:$0xff]   ;;  %v613_v15 = vld [vmem:[%s885_s1 + $0x70] sm:$0xff]  }
   0x8   :  { %v622_v13 = vld [vmem:[%s884_s0 + $0x24] ss:$8 sps:$4 sm:$0xff]   ;;  %248 = vmatprep.mubr.bf16.mxu0 %v619_v12 }
   0x9   :  { %540 = vmatpush3.bf16.msra.mxu0 %v604_v4  ;;  %586 = vmatpush3.bf16.msra.mxu1 %v604_v4  ;;  %v612_v14 = vld [vmem:[%s885_s1 + $0x28] sm:$0xff]  }
   0xa   :  { %541 = vmatprep.subr.bf16.mxu0 %v605_v5  ;;  %579 = vmatprep.subr.bf16.mxu1 %v605_v5 }
   0xb   :  { %264 = vmatprep.mubr.bf16.mxu1 %v622_v13 }
   0xd   :  { %542 = vmatpush3.bf16.msra.mxu0 %v606_v6  ;;  %587 = vmatpush3.bf16.msra.mxu1 %v606_v6 }
   0xe   :  { %543 = vmatprep.subr.bf16.mxu0 %v607_v7  ;;  %580 = vmatprep.subr.bf16.mxu1 %v607_v7 }
  0x11   :  { %544 = vmatpush3.bf16.msra.mxu0 %v608_v8  ;;  %588 = vmatpush3.bf16.msra.mxu1 %v608_v8 }
  0x12   :  { %545 = vmatprep.subr.bf16.mxu0 %v609_v9  ;;  %581 = vmatprep.subr.bf16.mxu1 %v609_v9 }
  0x15   :  { %546 = vmatpush3.bf16.msra.mxu0 %v610_v10  ;;  %589 = vmatpush3.bf16.msra.mxu1 %v610_v10 }
  0x16   :  { %547 = vmatprep.subr.bf16.mxu0 %v611_v11  ;;  %582 = vmatprep.subr.bf16.mxu1 %v611_v11 }
  0x17   :  { %17 = vsyncpa [#allocation6], 0  ;;  %v614_v16 = vld [vmem:[%s885_s1 + $0x30] sm:$0xff]   ;;  %v615_v17 = vld [vmem:[%s885_s1 + $0x78] sm:$0xff]   ;;  %vm287_vm0 = vcmask 261120   ;;  %s681_s23 = smov [#allocation5]  }
  0x18   :  { %v616_v18 = vld [vmem:[%s885_s1 + $0x38] sm:$0xff]   ;;  %v617_v19 = vld [vmem:[%s884_s0] ss:$8 sps:$4 sm:$0xff]   ;;  %s498_s24 = sshll.u32 %s681_s23, 4  ;;  %s682_s25 = smov [#allocation3]   ;;  %vm477_vm9 = vcmask 0   ;;  %s499_s24 = int_to_ptr.vmem [resolvable:$true] %s498_s24 }
  0x19   :  { %548 = vmatpush3.bf16.msra.mxu0 %v612_v14  ;;  %590 = vmatpush3.bf16.msra.mxu1 %v612_v14  ;;  %v620_v20 = vld [vmem:[%s884_s0 + $0x20] ss:$8 sps:$4 sm:$0xff]   ;;  %v623_v21 = vld [vmem:[%s884_s0 + $0x14] ss:$8 sps:$4 sm:$0xff]   ;;  %v627_v23 = vld [vmem:[%s884_s0 + $0x10] ss:$8 sps:$4 sm:$0xff]   ;;  %p638_p1 = scmp.lt.s32.totalorder %s499_s24, %s499_s24 }
  0x1a   :  { %549 = vmatprep.subr.bf16.mxu0 %v613_v15  ;;  %583 = vmatprep.subr.bf16.mxu1 %v613_v15  ;;  %v625_v22 = vld [vmem:[%s884_s0 + $0x34] ss:$8 sps:$4 sm:$0xff]   ;;  %v628_v24 = vld [vmem:[%s884_s0 + $0x30] ss:$8 sps:$4 sm:$0xff]   ;;  %v510_v27 = vld [vmem:[%s886_s2] ss:$0 sm:$0xff] }
  0x1b   :  { %s488_s26 = sshll.u32 %s682_s25, 4  ;;  %s633_s28 = scalar_lea.vmem %s499_s24, 16  ;;  %s852_s26 = int_to_ptr.vmem [resolvable:$true] %s488_s26 }
  0x1c   :  { %p634_p0 = scmp.ne.s32.totalorder %s499_s24, %s633_s28  ;;  %s637_s29 = scalar_lea.vmem %s499_s24, 32 }
  0x1d   :  { %550 = vmatpush3.bf16.msra.mxu0 %v614_v16  ;;  %591 = vmatpush3.bf16.msra.mxu1 %v614_v16  ;;  %p639_p2 = scmp.lt.s32.totalorder %s637_s29, %s633_s28 }
  0x1e   :  { %551 = vmatprep.subr.bf16.mxu0 %v615_v17  ;;  %584 = vmatprep.subr.bf16.mxu1 %v615_v17 }
  0x1f   :  { %p640_p3 = por %p639_p2, %p638_p1 }
  0x21   :  { %552 = vmatpush3.bf16.msra.mxu0 %v616_v18  ;;  %592 = vmatpush3.bf16.msra.mxu1 %v616_v18  ;;  %p641_p4 = pnand %p640_p3, %p634_p0 }
  0x24   :  { %249 = vmatmul.mubr.bf16.vlgmr.msra.gmra.mrb[0].mxu0 %v617_v19  ;;  %265 = vmatmul.mubr.bf16.vlgmr.msra.gmra.mrb[0].mxu1 %v620_v20 }
  0x25   :  { %256 = vmatprep.mubr.bf16.mxu0 %v623_v21  ;;  %272 = vmatprep.mubr.bf16.mxu1 %v625_v22 }
  0x2c   :  { %257 = vmatmul.mubr.bf16.gmra.mrb[4].mxu0 %v627_v23  ;;  %273 = vmatmul.mubr.bf16.gmra.mrb[4].mxu1 %v628_v24 }
  0xf7   :  { %v553_v25 = vpop.f32.mrb[0].mxu0  ;;  %v565_v26 = vpop.f32.mrb[0].mxu1 }
  0xf8   :  { %v554_v28 = vpop.f32.mrb[1].mxu0  ;;  %v566_v29 = vpop.f32.mrb[1].mxu1 }
  0xf9   :  { %v555_v30 = vadd.f32 %v554_v28, %v553_v25  ;;  %v556_v31 = vpop.f32.mrb[2].mxu0  ;;  %v567_v32 = vadd.f32 %v566_v29, %v565_v26  ;;  %v568_v33 = vpop.f32.mrb[2].mxu1 }
  0xfa   :  { %v557_v34 = vpop.f32.mrb[3].mxu0  ;;  %v569_v35 = vpop.f32.mrb[3].mxu1 }
  0xfb   :  { %v251_v36 = vadd.f32 %v555_v30, %v510_v27  ;;  %v267_v37 = vadd.f32 %v567_v32, %v510_v27  ;;  %v558_v38 = vadd.f32 %v557_v34, %v556_v31  ;;  %v570_v39 = vadd.f32 %v569_v35, %v568_v33 }
  0xfd   :  { %v383_v40 = vsel %vm287_vm0, %v267_v37, 0.0  ;;  %v254_v41 = vadd.f32 %v558_v38, %v510_v27  ;;  %v270_v42 = vadd.f32 %v570_v39, %v510_v27  ;;  %v288_v43 = vsel %vm287_vm0, %v251_v36, 0.0 }
  0xff   :  { %v289_v44 = vsel %vm287_vm0, %v254_v41, 0.0  ;;  %v384_v45 = vsel %vm287_vm0, %v270_v42, 0.0  ;;  %v559_v46 = vpop.f32.mrb[4].mxu0  ;;  %v571_v47 = vpop.f32.mrb[4].mxu1 }
 0x100   :  { %v290_v48 = vadd.f32 %v289_v44, %v288_v43  ;;  %v385_v49 = vadd.f32 %v384_v45, %v383_v40  ;;  %v560_v50 = vpop.f32.mrb[5].mxu0  ;;  %v572_v51 = vpop.f32.mrb[5].mxu1 }
 0x101   :  { %v561_v52 = vadd.f32 %v560_v50, %v559_v46  ;;  %v573_v53 = vadd.f32 %v572_v51, %v571_v47  ;;  %v562_v54 = vpop.f32.mrb[6].mxu0  ;;  %v574_v55 = vpop.f32.mrb[6].mxu1 }
 0x102   :  { %v563_v56 = vpop.f32.mrb[7].mxu0  ;;  %v575_v57 = vpop.f32.mrb[7].mxu1 }
 0x103   :  { %v259_v58 = vadd.f32 %v561_v52, %v510_v27  ;;  %v275_v59 = vadd.f32 %v573_v53, %v510_v27  ;;  %v564_v60 = vadd.f32 %v563_v56, %v562_v54  ;;  %v576_v61 = vadd.f32 %v575_v57, %v574_v55 }
 0x105   :  { %v291_v62 = vsel %vm287_vm0, %v259_v58, 0.0  ;;  %v386_v63 = vsel %vm287_vm0, %v275_v59, 0.0  ;;  %v262_v0 = vadd.f32 %v564_v60, %v510_v27  ;;  %v278_v1 = vadd.f32 %v576_v61, %v510_v27 }
 0x106   :  { %v292_v2 = vadd.f32 %v291_v62, %v290_v48  ;;  %v387_v3 = vadd.f32 %v386_v63, %v385_v49 }
 0x107   :  { %v293_v4 = vsel %vm287_vm0, %v262_v0, 0.0  ;;  %v388_v5 = vsel %vm287_vm0, %v278_v1, 0.0 }
 0x108   :  { %v294_v6 = vadd.f32 %v293_v4, %v292_v2  ;;  %v389_v7 = vadd.f32 %v388_v5, %v387_v3  ;;  %v535_v5 = vld [vmem:[%s887_s3] ss:$0 sm:$0xff] }
 0x10a   :  { %v295_v8 = vrot.slane %v294_v6, 4  ;;  %v390_v9 = vrot.slane %v389_v7, 4 }
 0x10c   :  { %v296_v10 = vadd.f32 %v295_v8, %v294_v6  ;;  %v391_v11 = vadd.f32 %v390_v9, %v389_v7 }
 0x10e   :  { %v297_v12 = vrot.slane %v296_v10, 2  ;;  %v392_v13 = vrot.slane %v391_v11, 2 }
 0x110   :  { %v298_v14 = vadd.f32 %v297_v12, %v296_v10  ;;  %v393_v15 = vadd.f32 %v392_v13, %v391_v11  ;;  %v536_v12 = vld [vmem:[%s888_s4] ss:$0 sm:$0xff] }
 0x112   :  { %v299_v16 = vrot.slane %v298_v14, 1  ;;  %v394_v17 = vrot.slane %v393_v15, 1 }
 0x114   :  { %v300_v18 = vadd.f32 %v299_v16, %v298_v14  ;;  %v395_v19 = vadd.f32 %v394_v17, %v393_v15 }
 0x116   :  { %v302_v20 = vmul.f32 0.03125, %v300_v18  ;;  %v396_v21 = vmul.f32 0.03125, %v395_v19 }
 0x118   :  { %v303_v22 = vsub.f32 %v251_v36, %v302_v20  ;;  %v304_v23 = vsub.f32 %v254_v41, %v302_v20  ;;  %v305_v24 = vsub.f32 %v259_v58, %v302_v20  ;;  %v306_v25 = vsub.f32 %v262_v0, %v302_v20 }
 0x119   :  { %v397_v26 = vsub.f32 %v267_v37, %v396_v21  ;;  %v398_v27 = vsub.f32 %v270_v42, %v396_v21  ;;  %v399_v28 = vsub.f32 %v275_v59, %v396_v21  ;;  %v400_v29 = vsub.f32 %v278_v1, %v396_v21 }
 0x11a   :  { %v307_v30 = vmul.f32 %v303_v22, %v303_v22  ;;  %v308_v31 = vmul.f32 %v304_v23, %v304_v23  ;;  %v309_v32 = vmul.f32 %v305_v24, %v305_v24  ;;  %v310_v38 = vmul.f32 %v306_v25, %v306_v25 }
 0x11b   :  { %v401_v33 = vmul.f32 %v397_v26, %v397_v26  ;;  %v402_v34 = vmul.f32 %v398_v27, %v398_v27  ;;  %v403_v35 = vmul.f32 %v399_v28, %v399_v28  ;;  %v404_v36 = vmul.f32 %v400_v29, %v400_v29 }
 0x11c   :  { %v311_v39 = vsel %vm287_vm0, %v307_v30, 0.0  ;;  %v312_v40 = vsel %vm287_vm0, %v308_v31, 0.0  ;;  %v314_v42 = vsel %vm287_vm0, %v309_v32, 0.0  ;;  %v316_v47 = vsel %vm287_vm0, %v310_v38, 0.0 }
 0x11d   :  { %v313_v43 = vadd.f32 %v312_v40, %v311_v39  ;;  %v405_v41 = vsel %vm287_vm0, %v401_v33, 0.0  ;;  %v406_v37 = vsel %vm287_vm0, %v402_v34, 0.0  ;;  %v408_v46 = vsel %vm287_vm0, %v403_v35, 0.0  ;;  %v284_v33 = vld [vmem:[%s889_s5 + $0x8] sm:$0xff]  ;;  %v285_v34 = vld [vmem:[%s889_s5 + $0x10] sm:$0xff] }
 0x11e   :  { %v407_v44 = vadd.f32 %v406_v37, %v405_v41  ;;  %v410_v50 = vsel %vm287_vm0, %v404_v36, 0.0 }
 0x11f   :  { %v315_v45 = vadd.f32 %v314_v42, %v313_v43  ;;  %v286_v43 = vld [vmem:[%s889_s5 + $0x18] sm:$0xff] }
 0x120   :  { %v409_v48 = vadd.f32 %v408_v46, %v407_v44 }
 0x121   :  { %v317_v49 = vadd.f32 %v316_v47, %v315_v45 }
 0x122   :  { %v411_v51 = vadd.f32 %v410_v50, %v409_v48 }
 0x123   :  { %v318_v52 = vrot.slane %v317_v49, 4 }
 0x124   :  { %v412_v53 = vrot.slane %v411_v51, 4 }
 0x125   :  { %v319_v54 = vadd.f32 %v318_v52, %v317_v49 }
 0x126   :  { %v413_v55 = vadd.f32 %v412_v53, %v411_v51 }
 0x127   :  { %v320_v56 = vrot.slane %v319_v54, 2 }
 0x128   :  { %v414_v57 = vrot.slane %v413_v55, 2 }
 0x129   :  { %v321_v58 = vadd.f32 %v320_v56, %v319_v54 }
 0x12a   :  { %v415_v59 = vadd.f32 %v414_v57, %v413_v55 }
 0x12b   :  { %v322_v60 = vrot.slane %v321_v58, 1 }
 0x12c   :  { %v416_v61 = vrot.slane %v415_v59, 1 }
 0x12d   :  { %v323_v62 = vadd.f32 %v322_v60, %v321_v58 }
 0x12e   :  { %v417_v63 = vadd.f32 %v416_v61, %v415_v59 }
 0x12f   :  { %v324_v0 = vmul.f32 0.03125, %v323_v62 }
 0x130   :  { %v418_v1 = vmul.f32 0.03125, %v417_v63 }
 0x131   :  { %v325_v2 = vadd.f32 1e-05, %v324_v0 }
 0x132   :  { %v419_v3 = vadd.f32 1e-05, %v418_v1 }
 0x133   :  { %629 = vrsqrt.f32 %v325_v2 }
 0x134   :  { %631 = vrsqrt.f32 %v419_v3 }
 0x13d   :  { %v630_v4 = vpop.eup %629 }
 0x13e   :  { %v632_v6 = vpop.eup %631  ;;  %v330_v7 = vmul.f32 %v630_v4, %v306_v25  ;;  %v327_v8 = vmul.f32 %v630_v4, %v303_v22  ;;  %v328_v9 = vmul.f32 %v630_v4, %v304_v23  ;;  %v329_v10 = vmul.f32 %v630_v4, %v305_v24 }
 0x13f   :  { %v424_v11 = vmul.f32 %v632_v6, %v400_v29  ;;  %v421_v13 = vmul.f32 %v632_v6, %v397_v26  ;;  %v422_v14 = vmul.f32 %v632_v6, %v398_v27  ;;  %v423_v15 = vmul.f32 %v632_v6, %v399_v28  ;;  %v283_v29 = vld [vmem:[%s889_s5] sm:$0xff] }
 0x140   :  { %v340_v16 = vmul.f32 %v535_v5, %v330_v7  ;;  %v337_v17 = vmul.f32 %v535_v5, %v327_v8  ;;  %v338_v18 = vmul.f32 %v535_v5, %v328_v9  ;;  %v339_v19 = vmul.f32 %v535_v5, %v329_v10 }
 0x141   :  { %v428_v20 = vmul.f32 %v535_v5, %v424_v11  ;;  %v425_v21 = vmul.f32 %v535_v5, %v421_v13  ;;  %v426_v30 = vmul.f32 %v535_v5, %v422_v14  ;;  %v427_v31 = vmul.f32 %v535_v5, %v423_v15 }
 0x142   :  { %v347_v25 = vadd.f32 %v536_v12, %v337_v17  ;;  %v348_v22 = vadd.f32 %v536_v12, %v338_v18  ;;  %v349_v23 = vadd.f32 %v536_v12, %v339_v19  ;;  %v350_v24 = vadd.f32 %v536_v12, %v340_v16 }
 0x143   :  { %v429_v32 = vadd.f32 %v536_v12, %v425_v21  ;;  %v430_v26 = vadd.f32 %v536_v12, %v426_v30  ;;  %v431_v27 = vadd.f32 %v536_v12, %v427_v31  ;;  %v432_v28 = vadd.f32 %v536_v12, %v428_v20 }
 0x144   :  { %vm351_vm1 = vcmp.ge.f32.partialorder %v347_v25, 0.0  ;;  %vm352_vm2 = vcmp.ge.f32.partialorder %v348_v22, 0.0  ;;  %vm353_vm3 = vcmp.ge.f32.partialorder %v349_v23, 0.0  ;;  %vm354_vm4 = vcmp.ge.f32.partialorder %v350_v24, 0.0 }
 0x145   :  { %v355_v35 = vmul.f32 0.2, %v347_v25  ;;  %v356_v38 = vmul.f32 0.2, %v348_v22  ;;  %v357_v39 = vmul.f32 0.2, %v349_v23 }
 0x146   :  { %v358_v40 = vmul.f32 0.2, %v350_v24  ;;  %vm433_vm5 = vcmp.ge.f32.partialorder %v429_v32, 0.0  ;;  %vm434_vm6 = vcmp.ge.f32.partialorder %v430_v26, 0.0  ;;  %vm435_vm7 = vcmp.ge.f32.partialorder %v431_v27, 0.0 }
 0x147   :  { %v359_v36 = vsel %vm351_vm1, %v347_v25, %v355_v35  ;;  %v360_v41 = vsel %vm352_vm2, %v348_v22, %v356_v38  ;;  %v361_v37 = vsel %vm353_vm3, %v349_v23, %v357_v39  ;;  %vm436_vm8 = vcmp.ge.f32.partialorder %v432_v28, 0.0  ;;  %v465_v25 = vld [vmem:[#allocation2] sm:$0x1] }
 0x148   :  { %v362_v42 = vsel %vm354_vm4, %v350_v24, %v358_v40  ;;  %v363_v44 = vmul.f32 %v359_v36, %v283_v29  ;;  %v364_v45 = vmul.f32 %v360_v41, %v284_v33  ;;  %v365_v46 = vmul.f32 %v361_v37, %v285_v34 }
 0x149   :  { %v437_v47 = vmul.f32 0.2, %v429_v32  ;;  %v438_v48 = vmul.f32 0.2, %v430_v26  ;;  %v439_v49 = vmul.f32 0.2, %v431_v27  ;;  %v366_v50 = vmul.f32 %v362_v42, %v286_v43 }
 0x14a   :  { %v367_v51 = vsel %vm287_vm0, %v363_v44, 0.0  ;;  %v368_v52 = vsel %vm287_vm0, %v364_v45, 0.0  ;;  %v440_v53 = vmul.f32 0.2, %v432_v28  ;;  %v370_v55 = vsel %vm287_vm0, %v365_v46, 0.0 }
 0x14b   :  { %v369_v54 = vadd.f32 %v368_v52, %v367_v51  ;;  %v441_v56 = vsel %vm433_vm5, %v429_v32, %v437_v47  ;;  %v442_v57 = vsel %vm434_vm6, %v430_v26, %v438_v48  ;;  %v443_v58 = vsel %vm435_vm7, %v431_v27, %v439_v49 }
 0x14c   :  { %v444_v59 = vsel %vm436_vm8, %v432_v28, %v440_v53  ;;  %v445_v60 = vmul.f32 %v441_v56, %v283_v29  ;;  %v446_v61 = vmul.f32 %v442_v57, %v284_v33  ;;  %v447_v63 = vmul.f32 %v443_v58, %v285_v34 }
 0x14d   :  { %v371_v62 = vadd.f32 %v370_v55, %v369_v54  ;;  %v372_v0 = vsel %vm287_vm0, %v366_v50, 0.0  ;;  %v448_v1 = vmul.f32 %v444_v59, %v286_v43 }
 0x14e   :  { %v449_v2 = vsel %vm287_vm0, %v445_v60, 0.0  ;;  %v450_v3 = vsel %vm287_vm0, %v446_v61, 0.0  ;;  %v452_v6 = vsel %vm287_vm0, %v447_v63, 0.0 }
 0x14f   :  { %v373_v4 = vadd.f32 %v372_v0, %v371_v62  ;;  %v451_v5 = vadd.f32 %v450_v3, %v449_v2  ;;  %v454_v8 = vsel %vm287_vm0, %v448_v1, 0.0 }
 0x151   :  { %374 = vadd.xlane.f32.xlu0 %v373_v4  ;;  %v453_v7 = vadd.f32 %v452_v6, %v451_v5 }
 0x153   :  { %v455_v9 = vadd.f32 %v454_v8, %v453_v7 }
 0x155   :  { %456 = vadd.xlane.f32.xlu0 %v455_v9 }
 0x1de   :  { %v375_v10 = vpop.xlane.xlu0 %374 }
 0x1df   :  { %v376_v11 = vrot.slane %v375_v10, 4 }
 0x1e1   :  { %v377_v12 = vadd.f32 %v376_v11, %v375_v10 }
 0x1e2   :  { %v457_v13 = vpop.xlane.xlu0 %456 }
 0x1e3   :  { %v378_v14 = vrot.slane %v377_v12, 2  ;;  %v458_v15 = vrot.slane %v457_v13, 4 }
 0x1e5   :  { %v459_v16 = vadd.f32 %v458_v15, %v457_v13  ;;  %v379_v17 = vadd.f32 %v378_v14, %v377_v12 }
 0x1e7   :  { %v460_v18 = vrot.slane %v459_v16, 2  ;;  %v380_v19 = vrot.slane %v379_v17, 1 }
 0x1e9   :  { %v461_v20 = vadd.f32 %v460_v18, %v459_v16  ;;  %v381_v21 = vadd.f32 %v380_v19, %v379_v17 }
 0x1eb   :  { %593 = vpush %v381_v21  ;;  %v462_v30 = vrot.slane %v461_v20, 1 }
 0x1ed   :  { %v463_v31 = vadd.f32 %v462_v30, %v461_v20 }
 0x1ef   :  { %595 = vpush %v463_v31 }
 0x1f0   :  { %597 = vpush %v465_v25 }
 0x21c   :  { %s594_s5 = spop %593 }
 0x21d   :  { %s469_s17 = smul.f32 0.5, %s594_s5 }
 0x220   :  { %s596_s18 = spop %595 }
 0x221   :  { %s473_s19 = smul.f32 0.5, %s596_s18  ;;  %s598_s20 = spop %597 }
 0x222   :  { %s470_s21 = sadd.f32 %s598_s20, %s469_s17 }
 0x223   :  { %s474_s22 = sadd.f32 %s598_s20, %s473_s19 }
 0x225   :  { %s479_s1 = ssub.f32 %s474_s22, %s470_s21 }
 0x226   :  { %s475_s27 = ssub.f32 0.0, %s474_s22 }
 0x227   :  { %v480_v22 = vstv %s479_s1 }
 0x228   :  { %v476_v23 = vstv %s475_s27  ;;  %481 = vst.msk [vmem:[#allocation5] sm:$0x1] %vm477_vm9, %v480_v22 }
 0x229   :  { %478 = vst.msk [vmem:[#allocation3] sm:$0x1] %vm477_vm9, %v476_v23 }
 0x22a   :  { %644 = shalt.err (!%p641_p4)
}
 0x22b   :  { %s645_s0 = scalar_lea.hbm %s892_s8, 16 }
 0x22c   :  { %p646_p5 = scmp.ne.s32.totalorder %s892_s8, %s645_s0  ;;  %p649_p6 = scmp.lt.u32.totalorder %s645_s0, %s892_s8 }
 0x22e   :  { %p651_p7 = pnand %p649_p6, %p646_p5 }
 0x230   :  { %654 = shalt.err (!%p651_p7)
}
 0x231   :  { %501 = dma.vmem_to_hbm [thread:$0]  %s499_s24, 16, %s892_s8, [#allocation6]  }
 0x232   :  { %s655_s13 = scalar_lea.vmem %s852_s26, 16  ;;  %s659_s6 = scalar_lea.vmem %s852_s26, 32 }
 0x233   :  { %p656_p8 = scmp.ne.s32.totalorder %s852_s26, %s655_s13  ;;  %p660_p9 = scmp.lt.s32.totalorder %s852_s26, %s852_s26 }
 0x234   :  { %p661_p10 = scmp.lt.s32.totalorder %s659_s6, %s655_s13 }
 0x236   :  { %p662_p11 = por %p661_p10, %p660_p9 }
 0x238   :  { %p663_p12 = pnand %p662_p11, %p656_p8 }
 0x23a   :  { %666 = shalt.err (!%p663_p12)
}
 0x23b   :  { %s667_s16 = scalar_lea.hbm %s891_s7, 16 }
 0x23c   :  { %p668_p13 = scmp.ne.s32.totalorder %s891_s7, %s667_s16  ;;  %p671_p0 = scmp.lt.u32.totalorder %s667_s16, %s891_s7 }
 0x23e   :  { %p673_p1 = pnand %p671_p0, %p668_p13 }
 0x240   :  { %676 = shalt.err (!%p673_p1)
}
 0x241   :  { %491 = dma.vmem_to_hbm [thread:$0]  %s852_s26, 16, %s891_s7, [#allocation4]  }
 0x242   :  { %677 = dma.done.wait [#allocation4], 16  }
 0x243   :  { %678 = vsyncadd [#allocation4], 4294967280 }
 0x244   :  { %679 = dma.done.wait [#allocation6], 16  }
 0x245   :  { %680 = vsyncadd [#allocation6], 4294967280 }
 0x246   :  { %508 = vsyncpa [#allocation4], 1 }
 0x247   :  { %509 = vsyncpa [#allocation6], 1 }

</bundles_post_ra>
